<compile_context>
chip_gen: v7x
topology: tpu7x:2x2x1
jax: 0.10.0
libtpu: 0.0.40
codegen_flags: <defaults>
</compile_context>

<pallas_src>
import functools

import jax
import jax.numpy as jnp
from jax.experimental import pallas as pl
from jax.experimental.pallas import tpu as pltpu


# ----------------------------------------------------------------------------
# Pallas kernels
# ----------------------------------------------------------------------------
def _bilstm_core(gx_ref, whh_ref, outf_ref, outb_ref, h_sc, c_sc):
    """Fused fwd+bwd LSTM recurrence over the full sequence (runs once).

    gx_ref  : (T, B, 8H) precomputed input-gate preactivations.  Column layout
              per gate k in (i, f, g, o): [gate_k fwd (H) | gate_k bwd (H)].
              The backward half is already time-reversed, so index t holds the
              backward preactivation for original time T-1-t.
    whh_ref : (2H, 8H)   block "diagonal" hidden->hidden weights matching the
              interleaved gate layout (rows 0..H-1 act on h_fwd, H..2H-1 on h_bwd).
    outf_ref: (T, B, H)  forward hidden states, time order.
    outb_ref: (T, B, H)  backward hidden states, stored at ORIGINAL time positions.
    h_sc    : (B, 2H) f32 carried hidden state [h_fwd | h_bwd].
    c_sc    : (B, 2H) f32 carried cell   state [c_fwd | c_bwd].
    """
    T = gx_ref.shape[0]
    H = outf_ref.shape[-1]
    two_h = 2 * H

    h_sc[...] = jnp.zeros(h_sc.shape, h_sc.dtype)
    c_sc[...] = jnp.zeros(c_sc.shape, c_sc.dtype)

    whh = whh_ref[...]                                  # loaded once, reused every step

    def step(t, carry):
        h_prev = h_sc[...]                              # (B, 2H)
        c_prev = c_sc[...]                              # (B, 2H)

        gates = gx_ref[t] + jnp.dot(
            h_prev, whh, preferred_element_type=jnp.float32)   # (B, 8H)

        i_g = jax.nn.sigmoid(gates[:, 0 * two_h:1 * two_h])
        f_g = jax.nn.sigmoid(gates[:, 1 * two_h:2 * two_h])
        g_g = jnp.tanh(gates[:, 2 * two_h:3 * two_h])
        o_g = jax.nn.sigmoid(gates[:, 3 * two_h:4 * two_h])

        c_new = f_g * c_prev + i_g * g_g                # (B, 2H) both directions at once
        h_new = o_g * jnp.tanh(c_new)

        c_sc[...] = c_new
        h_sc[...] = h_new

        outf_ref[t] = h_new[:, :H]                      # forward hidden for time t
        outb_ref[T - 1 - t] = h_new[:, H:]              # backward hidden, original time pos
        return carry

    jax.lax.fori_loop(0, T, step, 0, unroll=True)


def _bilstm_layer_kernel(gx_ref, whh_ref, outf_ref, outb_ref, h_sc, c_sc):
    """One bidirectional LSTM layer (non-final layers)."""
    _bilstm_core(gx_ref, whh_ref, outf_ref, outb_ref, h_sc, c_sc)


def _bilstm_layer_fc_kernel(gx_ref, whh_ref, wfc_ref, bfc_ref,
                            outf_ref, outb_ref, logits_ref, h_sc, c_sc):
    """Last bidirectional LSTM layer with the final Linear fused in.

    wfc_ref: (2H, C)  fc weight (pre-transposed), bfc_ref: (1, C).
    logits_ref: (B, C) = fc(out[:, -1, :]).
    """
    _bilstm_core(gx_ref, whh_ref, outf_ref, outb_ref, h_sc, c_sc)
    T = outf_ref.shape[0]
    h_last = jnp.concatenate([outf_ref[T - 1], outb_ref[T - 1]], axis=-1)   # (B, 2H)
    logits_ref[...] = (
        jnp.dot(h_last, wfc_ref[...], preferred_element_type=jnp.float32)
        + bfc_ref[...]
    )


# ----------------------------------------------------------------------------
# Host-side weight / activation packing (one-time, plain XLA)
# ----------------------------------------------------------------------------
def _input_projection(xs, p, hidden_size):
    """Hoisted input projection for both directions of one layer.

    xs: list of time-major arrays whose feature-concat is the layer input
        (layer 0: [x]; later layers: [out_fwd, out_bwd] -> avoids an HBM concat).
    Returns gx: (T, B, 8H) with interleaved per-gate layout
        [i_f, i_b, f_f, f_b, g_f, g_b, o_f, o_b]; the backward half is already
        time-reversed so the kernel indexes both halves with the same t.
    """
    H = hidden_size

    def one_dir(w_ih, bias):
        out = None
        off = 0
        for xp in xs:
            d = xp.shape[-1]
            term = jnp.einsum("tbd,gd->tbg", xp, w_ih[:, off:off + d])
            out = term if out is None else out + term
            off += d
        return out + bias                                   # (T, B, 4H)

    gx_f = one_dir(p["w_ih_f"], p["b_ih_f"] + p["b_hh_f"])
    gx_b = one_dir(p["w_ih_b"], p["b_ih_b"] + p["b_hh_b"])[::-1]   # time-reversed

    T, B = gx_f.shape[0], gx_f.shape[1]
    gx = jnp.stack([gx_f.reshape(T, B, 4, H),
                    gx_b.reshape(T, B, 4, H)], axis=3)       # (T, B, 4, 2, H)
    return gx.reshape(T, B, 8 * H)


def _pack_whh(w_hh_f, w_hh_b, hidden_size):
    """Pack the two (4H, H) hidden->hidden weights into one (2H, 8H) matrix
    matching the interleaved gate layout used by the kernel."""
    H = hidden_size
    wf = jnp.transpose(w_hh_f).reshape(H, 4, H)              # rows: h_fwd dims
    wb = jnp.transpose(w_hh_b).reshape(H, 4, H)              # rows: h_bwd dims
    z = jnp.zeros_like(wf)
    top = jnp.stack([wf, z], axis=2).reshape(H, 8 * H)
    bot = jnp.stack([z, wb], axis=2).reshape(H, 8 * H)
    return jnp.concatenate([top, bot], axis=0)               # (2H, 8H)


def _run_layer(gx, whh, hidden_size, fc=None):
    """Launch one fused bidirectional-layer kernel (whole sequence, no grid)."""
    T, B, _ = gx.shape
    H = hidden_size
    scratch = [pltpu.VMEM((B, 2 * H), jnp.float32),          # h carry
               pltpu.VMEM((B, 2 * H), jnp.float32)]          # c carry

    if fc is None:
        out_shape = (jax.ShapeDtypeStruct((T, B, H), jnp.float32),
                     jax.ShapeDtypeStruct((T, B, H), jnp.float32))
        return pl.pallas_call(
            _bilstm_layer_kernel,
            out_shape=out_shape,
            scratch_shapes=scratch,
        )(gx, whh)

    w_fc, b_fc = fc                                          # (C, 2H), (C,)
    C = w_fc.shape[0]
    out_shape = (jax.ShapeDtypeStruct((T, B, H), jnp.float32),
                 jax.ShapeDtypeStruct((T, B, H), jnp.float32),
                 jax.ShapeDtypeStruct((B, C), jnp.float32))
    return pl.pallas_call(
        _bilstm_layer_fc_kernel,
        out_shape=out_shape,
        scratch_shapes=scratch,
    )(gx, whh, jnp.transpose(w_fc), b_fc.reshape(1, C))


def bilstm_forward(x_btd, params, *, num_layers):
    """PyTorch-equivalent BiLSTM.forward.  x_btd: (B, T, input_size) -> (B, C)."""
    x = jnp.transpose(x_btd, (1, 0, 2))                      # time-major (T, B, D)
    H = params["lstm"][0]["w_hh_f"].shape[1]

    xs = [x]
    for layer in range(num_layers):
        p = params["lstm"][layer]
        gx = _input_projection(xs, p, H)                     # one big matmul per direction
        whh = _pack_whh(p["w_hh_f"], p["w_hh_b"], H)
        if layer == num_layers - 1:
            _, _, logits = _run_layer(
                gx, whh, H, fc=(params["fc_w"], params["fc_b"]))
            return logits
        out_f, out_b = _run_layer(gx, whh, H)
        xs = [out_f, out_b]                                  # next layer splits the matmul -> no concat


# ----------------------------------------------------------------------------
# Pure-JAX reference (for correctness check)
# ----------------------------------------------------------------------------
def _lstm_dir_ref(x_tbd, w_ih, w_hh, b_ih, b_hh, reverse):
    T, B, _ = x_tbd.shape
    H = w_hh.shape[1]
    xs = x_tbd[::-1] if reverse else x_tbd

    def step(carry, x_t):
        h, c = carry
        gates = x_t @ w_ih.T + h @ w_hh.T + b_ih + b_hh
        i = jax.nn.sigmoid(gates[:, :H])
        f = jax.nn.sigmoid(gates[:, H:2 * H])
        g = jnp.tanh(gates[:, 2 * H:3 * H])
        o = jax.nn.sigmoid(gates[:, 3 * H:])
        c = f * c + i * g
        h = o * jnp.tanh(c)
        return (h, c), h

    init = (jnp.zeros((B, H), jnp.float32), jnp.zeros((B, H), jnp.float32))
    _, hs = jax.lax.scan(step, init, xs)
    return hs[::-1] if reverse else hs


def bilstm_ref(x_btd, params, *, num_layers):
    x = jnp.transpose(x_btd, (1, 0, 2))
    for layer in range(num_layers):
        p = params["lstm"][layer]
        of = _lstm_dir_ref(x, p["w_ih_f"], p["w_hh_f"], p["b_ih_f"], p["b_hh_f"], False)
        ob = _lstm_dir_ref(x, p["w_ih_b"], p["w_hh_b"], p["b_ih_b"], p["b_hh_b"], True)
        x = jnp.concatenate([of, ob], axis=-1)
    return x[-1] @ params["fc_w"].T + params["fc_b"]


# ----------------------------------------------------------------------------
# Parameter init (deterministic, PyTorch-like uniform(-1/sqrt(H), 1/sqrt(H)))
# ----------------------------------------------------------------------------
def init_params(key, input_size, hidden_size, num_layers, num_classes):
    bound = 1.0 / jnp.sqrt(jnp.float32(hidden_size))
    params = {"lstm": []}
    for layer in range(num_layers):
        d_in = input_size if layer == 0 else 2 * hidden_size
        layer_p = {}
        for tag in ("f", "b"):
            key, k1, k2, k3, k4 = jax.random.split(key, 5)
            layer_p[f"w_ih_{tag}"] = jax.random.uniform(
                k1, (4 * hidden_size, d_in), jnp.float32, -bound, bound)
            layer_p[f"w_hh_{tag}"] = jax.random.uniform(
                k2, (4 * hidden_size, hidden_size), jnp.float32, -bound, bound)
            layer_p[f"b_ih_{tag}"] = jax.random.uniform(
                k3, (4 * hidden_size,), jnp.float32, -bound, bound)
            layer_p[f"b_hh_{tag}"] = jax.random.uniform(
                k4, (4 * hidden_size,), jnp.float32, -bound, bound)
        params["lstm"].append(layer_p)
    key, kw, kb = jax.random.split(key, 3)
    fc_bound = 1.0 / jnp.sqrt(jnp.float32(2 * hidden_size))
    params["fc_w"] = jax.random.uniform(
        kw, (num_classes, 2 * hidden_size), jnp.float32, -fc_bound, fc_bound)
    params["fc_b"] = jax.random.uniform(
        kb, (num_classes,), jnp.float32, -fc_bound, fc_bound)
    return params


# ----------------------------------------------------------------------------
if __name__ == "__main__":
    INPUT_SIZE = 16
    HIDDEN_SIZE = 32
    NUM_LAYERS = 2
    NUM_CLASSES = 5
    BATCH = 2
    SEQ = 8

    key = jax.random.PRNGKey(0)
    key, kx = jax.random.split(key)
    x = jax.random.normal(kx, (BATCH, SEQ, INPUT_SIZE), jnp.float32)
    params = init_params(key, INPUT_SIZE, HIDDEN_SIZE, NUM_LAYERS, NUM_CLASSES)

    fwd = jax.jit(functools.partial(bilstm_forward, num_layers=NUM_LAYERS))
    out = jax.block_until_ready(fwd(x, params))

    ref = bilstm_ref(x, params, num_layers=NUM_LAYERS)
    max_err = float(jnp.max(jnp.abs(out - ref)))
    assert out.shape == (BATCH, NUM_CLASSES), out.shape
    assert max_err < 1e-3, f"mismatch vs reference: {max_err}"

    print("KERNEL_OK")
</pallas_src>

<mosaic_0001>
module attributes {stable_mosaic.version = 11 : i64} {
  func.func @_bilstm_layer_kernel(%arg0: memref<8x2x256xf32, #tpu.memory_space<vmem>>, %arg1: memref<64x256xf32, #tpu.memory_space<vmem>>, %arg2: memref<8x2x32xf32, #tpu.memory_space<vmem>>, %arg3: memref<8x2x32xf32, #tpu.memory_space<vmem>>, %arg4: memref<2x64xf32, #tpu.memory_space<vmem>>, %arg5: memref<2x64xf32, #tpu.memory_space<vmem>>) attributes {dimension_semantics = [], scalar_prefetch = 0 : i64, scratch_operands = 2 : i64, tpu.core_type = #tpu.core_type<tc>} {
    %cst = arith.constant 0.000000e+00 : f32
    %0 = vector.broadcast %cst : f32 to vector<2x64xf32>
    %c0 = arith.constant 0 : index
    %c0_0 = arith.constant 0 : index
    %1 = vector.load %arg4[%c0, %c0_0] : memref<2x64xf32, #tpu.memory_space<vmem>>, vector<2x64xf32>
    tpu.vector_store %arg4[%c0, %c0_0], %0 {strides = array<i32>} : memref<2x64xf32, #tpu.memory_space<vmem>>, vector<2x64xf32>,
    %cst_1 = arith.constant 0.000000e+00 : f32
    %2 = vector.broadcast %cst_1 : f32 to vector<2x64xf32>
    %c0_2 = arith.constant 0 : index
    %c0_3 = arith.constant 0 : index
    %3 = vector.load %arg5[%c0_2, %c0_3] : memref<2x64xf32, #tpu.memory_space<vmem>>, vector<2x64xf32>
    tpu.vector_store %arg5[%c0_2, %c0_3], %2 {strides = array<i32>} : memref<2x64xf32, #tpu.memory_space<vmem>>, vector<2x64xf32>,
    %c0_4 = arith.constant 0 : index
    %c0_5 = arith.constant 0 : index
    %4 = vector.load %arg1[%c0_4, %c0_5] : memref<64x256xf32, #tpu.memory_space<vmem>>, vector<64x256xf32>
    %c0_i32 = arith.constant 0 : i32
    %c0_6 = arith.constant 0 : index
    %c0_7 = arith.constant 0 : index
    %5 = vector.load %arg4[%c0_6, %c0_7] : memref<2x64xf32, #tpu.memory_space<vmem>>, vector<2x64xf32>
    %c0_8 = arith.constant 0 : index
    %c0_9 = arith.constant 0 : index
    %6 = vector.load %arg5[%c0_8, %c0_9] : memref<2x64xf32, #tpu.memory_space<vmem>>, vector<2x64xf32>
    %7 = arith.index_cast %c0_i32 : i32 to index
    %c0_10 = arith.constant 0 : index
    %c0_11 = arith.constant 0 : index
    %8 = vector.load %arg0[%7, %c0_10, %c0_11] : memref<8x2x256xf32, #tpu.memory_space<vmem>>, vector<1x2x256xf32>
    %9 = vector.shape_cast %8 : vector<1x2x256xf32> to vector<2x256xf32>
    %cst_12 = arith.constant dense<0.000000e+00> : vector<2x256xf32>
    %10 = tpu.matmul %5, %4, %cst_12 {dimension_numbers = #tpu.dot_dimension_numbers<[1], [0], [0], [1], [0, 0, 1, 1], [], []>} : vector<2x64xf32>, vector<64x256xf32>, vector<2x256xf32> -> vector<2x256xf32>
    %11 = arith.addf %9, %10 : vector<2x256xf32>
    %12 = vector.extract_strided_slice %11 {offsets = [0, 0], sizes = [2, 64], strides = [1, 1]} : vector<2x256xf32> to vector<2x64xf32>
    %13 = arith.negf %12 : vector<2x64xf32>
    %14 = math.exp %13 : vector<2x64xf32>
    %cst_13 = arith.constant 1.000000e+00 : f32
    %15 = vector.broadcast %cst_13 : f32 to vector<2x64xf32>
    %16 = arith.addf %15, %14 : vector<2x64xf32>
    %17 = arith.divf %15, %16 : vector<2x64xf32>
    %18 = vector.extract_strided_slice %11 {offsets = [0, 64], sizes = [2, 64], strides = [1, 1]} : vector<2x256xf32> to vector<2x64xf32>
    %19 = arith.negf %18 : vector<2x64xf32>
    %20 = math.exp %19 : vector<2x64xf32>
    %cst_14 = arith.constant 1.000000e+00 : f32
    %21 = vector.broadcast %cst_14 : f32 to vector<2x64xf32>
    %22 = arith.addf %21, %20 : vector<2x64xf32>
    %23 = arith.divf %21, %22 : vector<2x64xf32>
    %24 = vector.extract_strided_slice %11 {offsets = [0, 128], sizes = [2, 64], strides = [1, 1]} : vector<2x256xf32> to vector<2x64xf32>
    %25 = math.tanh %24 : vector<2x64xf32>
    %26 = vector.extract_strided_slice %11 {offsets = [0, 192], sizes = [2, 64], strides = [1, 1]} : vector<2x256xf32> to vector<2x64xf32>
    %27 = arith.negf %26 : vector<2x64xf32>
    %28 = math.exp %27 : vector<2x64xf32>
    %cst_15 = arith.constant 1.000000e+00 : f32
    %29 = vector.broadcast %cst_15 : f32 to vector<2x64xf32>
    %30 = arith.addf %29, %28 : vector<2x64xf32>
    %31 = arith.divf %29, %30 : vector<2x64xf32>
    %32 = arith.mulf %23, %6 : vector<2x64xf32>
    %33 = arith.mulf %17, %25 : vector<2x64xf32>
    %34 = arith.addf %32, %33 : vector<2x64xf32>
    %35 = math.tanh %34 : vector<2x64xf32>
    %36 = arith.mulf %31, %35 : vector<2x64xf32>
    %c0_16 = arith.constant 0 : index
    %c0_17 = arith.constant 0 : index
    %37 = vector.load %arg5[%c0_16, %c0_17] : memref<2x64xf32, #tpu.memory_space<vmem>>, vector<2x64xf32>
    tpu.vector_store %arg5[%c0_16, %c0_17], %34 {strides = array<i32>} : memref<2x64xf32, #tpu.memory_space<vmem>>, vector<2x64xf32>,
    %c0_18 = arith.constant 0 : index
    %c0_19 = arith.constant 0 : index
    %38 = vector.load %arg4[%c0_18, %c0_19] : memref<2x64xf32, #tpu.memory_space<vmem>>, vector<2x64xf32>
    tpu.vector_store %arg4[%c0_18, %c0_19], %36 {strides = array<i32>} : memref<2x64xf32, #tpu.memory_space<vmem>>, vector<2x64xf32>,
    %39 = vector.extract_strided_slice %36 {offsets = [0, 0], sizes = [2, 32], strides = [1, 1]} : vector<2x64xf32> to vector<2x32xf32>
    %40 = arith.index_cast %c0_i32 : i32 to index
    %c0_20 = arith.constant 0 : index
    %c0_21 = arith.constant 0 : index
    %41 = vector.load %arg2[%40, %c0_20, %c0_21] : memref<8x2x32xf32, #tpu.memory_space<vmem>>, vector<1x2x32xf32>
    %42 = vector.shape_cast %41 : vector<1x2x32xf32> to vector<2x32xf32>
    %43 = vector.shape_cast %39 : vector<2x32xf32> to vector<1x2x32xf32>
    tpu.vector_store %arg2[%40, %c0_20, %c0_21], %43 {strides = array<i32>} : memref<8x2x32xf32, #tpu.memory_space<vmem>>, vector<1x2x32xf32>,
    %44 = vector.extract_strided_slice %36 {offsets = [0, 32], sizes = [2, 32], strides = [1, 1]} : vector<2x64xf32> to vector<2x32xf32>
    %c7_i32 = arith.constant 7 : i32
    %45 = arith.subi %c7_i32, %c0_i32 : i32
    %46 = arith.index_cast %45 : i32 to index
    %c0_22 = arith.constant 0 : index
    %c0_23 = arith.constant 0 : index
    %47 = vector.load %arg3[%46, %c0_22, %c0_23] : memref<8x2x32xf32, #tpu.memory_space<vmem>>, vector<1x2x32xf32>
    %48 = vector.shape_cast %47 : vector<1x2x32xf32> to vector<2x32xf32>
    %49 = vector.shape_cast %44 : vector<2x32xf32> to vector<1x2x32xf32>
    tpu.vector_store %arg3[%46, %c0_22, %c0_23], %49 {strides = array<i32>} : memref<8x2x32xf32, #tpu.memory_space<vmem>>, vector<1x2x32xf32>,
    %c1_i32 = arith.constant 1 : i32
    %c0_24 = arith.constant 0 : index
    %c0_25 = arith.constant 0 : index
    %50 = vector.load %arg4[%c0_24, %c0_25] : memref<2x64xf32, #tpu.memory_space<vmem>>, vector<2x64xf32>
    %c0_26 = arith.constant 0 : index
    %c0_27 = arith.constant 0 : index
    %51 = vector.load %arg5[%c0_26, %c0_27] : memref<2x64xf32, #tpu.memory_space<vmem>>, vector<2x64xf32>
    %52 = arith.index_cast %c1_i32 : i32 to index
    %c0_28 = arith.constant 0 : index
    %c0_29 = arith.constant 0 : index
    %53 = vector.load %arg0[%52, %c0_28, %c0_29] : memref<8x2x256xf32, #tpu.memory_space<vmem>>, vector<1x2x256xf32>
    %54 = vector.shape_cast %53 : vector<1x2x256xf32> to vector<2x256xf32>
    %cst_30 = arith.constant dense<0.000000e+00> : vector<2x256xf32>
    %55 = tpu.matmul %50, %4, %cst_30 {dimension_numbers = #tpu.dot_dimension_numbers<[1], [0], [0], [1], [0, 0, 1, 1], [], []>} : vector<2x64xf32>, vector<64x256xf32>, vector<2x256xf32> -> vector<2x256xf32>
    %56 = arith.addf %54, %55 : vector<2x256xf32>
    %57 = vector.extract_strided_slice %56 {offsets = [0, 0], sizes = [2, 64], strides = [1, 1]} : vector<2x256xf32> to vector<2x64xf32>
    %58 = arith.negf %57 : vector<2x64xf32>
    %59 = math.exp %58 : vector<2x64xf32>
    %cst_31 = arith.constant 1.000000e+00 : f32
    %60 = vector.broadcast %cst_31 : f32 to vector<2x64xf32>
    %61 = arith.addf %60, %59 : vector<2x64xf32>
    %62 = arith.divf %60, %61 : vector<2x64xf32>
    %63 = vector.extract_strided_slice %56 {offsets = [0, 64], sizes = [2, 64], strides = [1, 1]} : vector<2x256xf32> to vector<2x64xf32>
    %64 = arith.negf %63 : vector<2x64xf32>
    %65 = math.exp %64 : vector<2x64xf32>
    %cst_32 = arith.constant 1.000000e+00 : f32
    %66 = vector.broadcast %cst_32 : f32 to vector<2x64xf32>
    %67 = arith.addf %66, %65 : vector<2x64xf32>
    %68 = arith.divf %66, %67 : vector<2x64xf32>
    %69 = vector.extract_strided_slice %56 {offsets = [0, 128], sizes = [2, 64], strides = [1, 1]} : vector<2x256xf32> to vector<2x64xf32>
    %70 = math.tanh %69 : vector<2x64xf32>
    %71 = vector.extract_strided_slice %56 {offsets = [0, 192], sizes = [2, 64], strides = [1, 1]} : vector<2x256xf32> to vector<2x64xf32>
    %72 = arith.negf %71 : vector<2x64xf32>
    %73 = math.exp %72 : vector<2x64xf32>
    %cst_33 = arith.constant 1.000000e+00 : f32
    %74 = vector.broadcast %cst_33 : f32 to vector<2x64xf32>
    %75 = arith.addf %74, %73 : vector<2x64xf32>
    %76 = arith.divf %74, %75 : vector<2x64xf32>
    %77 = arith.mulf %68, %51 : vector<2x64xf32>
    %78 = arith.mulf %62, %70 : vector<2x64xf32>
    %79 = arith.addf %77, %78 : vector<2x64xf32>
    %80 = math.tanh %79 : vector<2x64xf32>
    %81 = arith.mulf %76, %80 : vector<2x64xf32>
    %c0_34 = arith.constant 0 : index
    %c0_35 = arith.constant 0 : index
    %82 = vector.load %arg5[%c0_34, %c0_35] : memref<2x64xf32, #tpu.memory_space<vmem>>, vector<2x64xf32>
    tpu.vector_store %arg5[%c0_34, %c0_35], %79 {strides = array<i32>} : memref<2x64xf32, #tpu.memory_space<vmem>>, vector<2x64xf32>,
    %c0_36 = arith.constant 0 : index
    %c0_37 = arith.constant 0 : index
    %83 = vector.load %arg4[%c0_36, %c0_37] : memref<2x64xf32, #tpu.memory_space<vmem>>, vector<2x64xf32>
    tpu.vector_store %arg4[%c0_36, %c0_37], %81 {strides = array<i32>} : memref<2x64xf32, #tpu.memory_space<vmem>>, vector<2x64xf32>,
    %84 = vector.extract_strided_slice %81 {offsets = [0, 0], sizes = [2, 32], strides = [1, 1]} : vector<2x64xf32> to vector<2x32xf32>
    %85 = arith.index_cast %c1_i32 : i32 to index
    %c0_38 = arith.constant 0 : index
    %c0_39 = arith.constant 0 : index
    %86 = vector.load %arg2[%85, %c0_38, %c0_39] : memref<8x2x32xf32, #tpu.memory_space<vmem>>, vector<1x2x32xf32>
    %87 = vector.shape_cast %86 : vector<1x2x32xf32> to vector<2x32xf32>
    %88 = vector.shape_cast %84 : vector<2x32xf32> to vector<1x2x32xf32>
    tpu.vector_store %arg2[%85, %c0_38, %c0_39], %88 {strides = array<i32>} : memref<8x2x32xf32, #tpu.memory_space<vmem>>, vector<1x2x32xf32>,
    %89 = vector.extract_strided_slice %81 {offsets = [0, 32], sizes = [2, 32], strides = [1, 1]} : vector<2x64xf32> to vector<2x32xf32>
    %c7_i32_40 = arith.constant 7 : i32
    %90 = arith.subi %c7_i32_40, %c1_i32 : i32
    %91 = arith.index_cast %90 : i32 to index
    %c0_41 = arith.constant 0 : index
    %c0_42 = arith.constant 0 : index
    %92 = vector.load %arg3[%91, %c0_41, %c0_42] : memref<8x2x32xf32, #tpu.memory_space<vmem>>, vector<1x2x32xf32>
    %93 = vector.shape_cast %92 : vector<1x2x32xf32> to vector<2x32xf32>
    %94 = vector.shape_cast %89 : vector<2x32xf32> to vector<1x2x32xf32>
    tpu.vector_store %arg3[%91, %c0_41, %c0_42], %94 {strides = array<i32>} : memref<8x2x32xf32, #tpu.memory_space<vmem>>, vector<1x2x32xf32>,
    %c2_i32 = arith.constant 2 : i32
    %c0_43 = arith.constant 0 : index
    %c0_44 = arith.constant 0 : index
    %95 = vector.load %arg4[%c0_43, %c0_44] : memref<2x64xf32, #tpu.memory_space<vmem>>, vector<2x64xf32>
    %c0_45 = arith.constant 0 : index
    %c0_46 = arith.constant 0 : index
    %96 = vector.load %arg5[%c0_45, %c0_46] : memref<2x64xf32, #tpu.memory_space<vmem>>, vector<2x64xf32>
    %97 = arith.index_cast %c2_i32 : i32 to index
    %c0_47 = arith.constant 0 : index
    %c0_48 = arith.constant 0 : index
    %98 = vector.load %arg0[%97, %c0_47, %c0_48] : memref<8x2x256xf32, #tpu.memory_space<vmem>>, vector<1x2x256xf32>
    %99 = vector.shape_cast %98 : vector<1x2x256xf32> to vector<2x256xf32>
    %cst_49 = arith.constant dense<0.000000e+00> : vector<2x256xf32>
    %100 = tpu.matmul %95, %4, %cst_49 {dimension_numbers = #tpu.dot_dimension_numbers<[1], [0], [0], [1], [0, 0, 1, 1], [], []>} : vector<2x64xf32>, vector<64x256xf32>, vector<2x256xf32> -> vector<2x256xf32>
    %101 = arith.addf %99, %100 : vector<2x256xf32>
    %102 = vector.extract_strided_slice %101 {offsets = [0, 0], sizes = [2, 64], strides = [1, 1]} : vector<2x256xf32> to vector<2x64xf32>
    %103 = arith.negf %102 : vector<2x64xf32>
    %104 = math.exp %103 : vector<2x64xf32>
    %cst_50 = arith.constant 1.000000e+00 : f32
    %105 = vector.broadcast %cst_50 : f32 to vector<2x64xf32>
    %106 = arith.addf %105, %104 : vector<2x64xf32>
    %107 = arith.divf %105, %106 : vector<2x64xf32>
    %108 = vector.extract_strided_slice %101 {offsets = [0, 64], sizes = [2, 64], strides = [1, 1]} : vector<2x256xf32> to vector<2x64xf32>
    %109 = arith.negf %108 : vector<2x64xf32>
    %110 = math.exp %109 : vector<2x64xf32>
    %cst_51 = arith.constant 1.000000e+00 : f32
    %111 = vector.broadcast %cst_51 : f32 to vector<2x64xf32>
    %112 = arith.addf %111, %110 : vector<2x64xf32>
    %113 = arith.divf %111, %112 : vector<2x64xf32>
    %114 = vector.extract_strided_slice %101 {offsets = [0, 128], sizes = [2, 64], strides = [1, 1]} : vector<2x256xf32> to vector<2x64xf32>
    %115 = math.tanh %114 : vector<2x64xf32>
    %116 = vector.extract_strided_slice %101 {offsets = [0, 192], sizes = [2, 64], strides = [1, 1]} : vector<2x256xf32> to vector<2x64xf32>
    %117 = arith.negf %116 : vector<2x64xf32>
    %118 = math.exp %117 : vector<2x64xf32>
    %cst_52 = arith.constant 1.000000e+00 : f32
    %119 = vector.broadcast %cst_52 : f32 to vector<2x64xf32>
    %120 = arith.addf %119, %118 : vector<2x64xf32>
    %121 = arith.divf %119, %120 : vector<2x64xf32>
    %122 = arith.mulf %113, %96 : vector<2x64xf32>
    %123 = arith.mulf %107, %115 : vector<2x64xf32>
    %124 = arith.addf %122, %123 : vector<2x64xf32>
    %125 = math.tanh %124 : vector<2x64xf32>
    %126 = arith.mulf %121, %125 : vector<2x64xf32>
    %c0_53 = arith.constant 0 : index
    %c0_54 = arith.constant 0 : index
    %127 = vector.load %arg5[%c0_53, %c0_54] : memref<2x64xf32, #tpu.memory_space<vmem>>, vector<2x64xf32>
    tpu.vector_store %arg5[%c0_53, %c0_54], %124 {strides = array<i32>} : memref<2x64xf32, #tpu.memory_space<vmem>>, vector<2x64xf32>,
    %c0_55 = arith.constant 0 : index
    %c0_56 = arith.constant 0 : index
    %128 = vector.load %arg4[%c0_55, %c0_56] : memref<2x64xf32, #tpu.memory_space<vmem>>, vector<2x64xf32>
    tpu.vector_store %arg4[%c0_55, %c0_56], %126 {strides = array<i32>} : memref<2x64xf32, #tpu.memory_space<vmem>>, vector<2x64xf32>,
    %129 = vector.extract_strided_slice %126 {offsets = [0, 0], sizes = [2, 32], strides = [1, 1]} : vector<2x64xf32> to vector<2x32xf32>
    %130 = arith.index_cast %c2_i32 : i32 to index
    %c0_57 = arith.constant 0 : index
    %c0_58 = arith.constant 0 : index
    %131 = vector.load %arg2[%130, %c0_57, %c0_58] : memref<8x2x32xf32, #tpu.memory_space<vmem>>, vector<1x2x32xf32>
    %132 = vector.shape_cast %131 : vector<1x2x32xf32> to vector<2x32xf32>
    %133 = vector.shape_cast %129 : vector<2x32xf32> to vector<1x2x32xf32>
    tpu.vector_store %arg2[%130, %c0_57, %c0_58], %133 {strides = array<i32>} : memref<8x2x32xf32, #tpu.memory_space<vmem>>, vector<1x2x32xf32>,
    %134 = vector.extract_strided_slice %126 {offsets = [0, 32], sizes = [2, 32], strides = [1, 1]} : vector<2x64xf32> to vector<2x32xf32>
    %c7_i32_59 = arith.constant 7 : i32
    %135 = arith.subi %c7_i32_59, %c2_i32 : i32
    %136 = arith.index_cast %135 : i32 to index
    %c0_60 = arith.constant 0 : index
    %c0_61 = arith.constant 0 : index
    %137 = vector.load %arg3[%136, %c0_60, %c0_61] : memref<8x2x32xf32, #tpu.memory_space<vmem>>, vector<1x2x32xf32>
    %138 = vector.shape_cast %137 : vector<1x2x32xf32> to vector<2x32xf32>
    %139 = vector.shape_cast %134 : vector<2x32xf32> to vector<1x2x32xf32>
    tpu.vector_store %arg3[%136, %c0_60, %c0_61], %139 {strides = array<i32>} : memref<8x2x32xf32, #tpu.memory_space<vmem>>, vector<1x2x32xf32>,
    %c3_i32 = arith.constant 3 : i32
    %c0_62 = arith.constant 0 : index
    %c0_63 = arith.constant 0 : index
    %140 = vector.load %arg4[%c0_62, %c0_63] : memref<2x64xf32, #tpu.memory_space<vmem>>, vector<2x64xf32>
    %c0_64 = arith.constant 0 : index
    %c0_65 = arith.constant 0 : index
    %141 = vector.load %arg5[%c0_64, %c0_65] : memref<2x64xf32, #tpu.memory_space<vmem>>, vector<2x64xf32>
    %142 = arith.index_cast %c3_i32 : i32 to index
    %c0_66 = arith.constant 0 : index
    %c0_67 = arith.constant 0 : index
    %143 = vector.load %arg0[%142, %c0_66, %c0_67] : memref<8x2x256xf32, #tpu.memory_space<vmem>>, vector<1x2x256xf32>
    %144 = vector.shape_cast %143 : vector<1x2x256xf32> to vector<2x256xf32>
    %cst_68 = arith.constant dense<0.000000e+00> : vector<2x256xf32>
    %145 = tpu.matmul %140, %4, %cst_68 {dimension_numbers = #tpu.dot_dimension_numbers<[1], [0], [0], [1], [0, 0, 1, 1], [], []>} : vector<2x64xf32>, vector<64x256xf32>, vector<2x256xf32> -> vector<2x256xf32>
    %146 = arith.addf %144, %145 : vector<2x256xf32>
    %147 = vector.extract_strided_slice %146 {offsets = [0, 0], sizes = [2, 64], strides = [1, 1]} : vector<2x256xf32> to vector<2x64xf32>
    %148 = arith.negf %147 : vector<2x64xf32>
    %149 = math.exp %148 : vector<2x64xf32>
    %cst_69 = arith.constant 1.000000e+00 : f32
    %150 = vector.broadcast %cst_69 : f32 to vector<2x64xf32>
    %151 = arith.addf %150, %149 : vector<2x64xf32>
    %152 = arith.divf %150, %151 : vector<2x64xf32>
    %153 = vector.extract_strided_slice %146 {offsets = [0, 64], sizes = [2, 64], strides = [1, 1]} : vector<2x256xf32> to vector<2x64xf32>
    %154 = arith.negf %153 : vector<2x64xf32>
    %155 = math.exp %154 : vector<2x64xf32>
    %cst_70 = arith.constant 1.000000e+00 : f32
    %156 = vector.broadcast %cst_70 : f32 to vector<2x64xf32>
    %157 = arith.addf %156, %155 : vector<2x64xf32>
    %158 = arith.divf %156, %157 : vector<2x64xf32>
    %159 = vector.extract_strided_slice %146 {offsets = [0, 128], sizes = [2, 64], strides = [1, 1]} : vector<2x256xf32> to vector<2x64xf32>
    %160 = math.tanh %159 : vector<2x64xf32>
    %161 = vector.extract_strided_slice %146 {offsets = [0, 192], sizes = [2, 64], strides = [1, 1]} : vector<2x256xf32> to vector<2x64xf32>
    %162 = arith.negf %161 : vector<2x64xf32>
    %163 = math.exp %162 : vector<2x64xf32>
    %cst_71 = arith.constant 1.000000e+00 : f32
    %164 = vector.broadcast %cst_71 : f32 to vector<2x64xf32>
    %165 = arith.addf %164, %163 : vector<2x64xf32>
    %166 = arith.divf %164, %165 : vector<2x64xf32>
    %167 = arith.mulf %158, %141 : vector<2x64xf32>
    %168 = arith.mulf %152, %160 : vector<2x64xf32>
    %169 = arith.addf %167, %168 : vector<2x64xf32>
    %170 = math.tanh %169 : vector<2x64xf32>
    %171 = arith.mulf %166, %170 : vector<2x64xf32>
    %c0_72 = arith.constant 0 : index
    %c0_73 = arith.constant 0 : index
    %172 = vector.load %arg5[%c0_72, %c0_73] : memref<2x64xf32, #tpu.memory_space<vmem>>, vector<2x64xf32>
    tpu.vector_store %arg5[%c0_72, %c0_73], %169 {strides = array<i32>} : memref<2x64xf32, #tpu.memory_space<vmem>>, vector<2x64xf32>,
    %c0_74 = arith.constant 0 : index
    %c0_75 = arith.constant 0 : index
    %173 = vector.load %arg4[%c0_74, %c0_75] : memref<2x64xf32, #tpu.memory_space<vmem>>, vector<2x64xf32>
    tpu.vector_store %arg4[%c0_74, %c0_75], %171 {strides = array<i32>} : memref<2x64xf32, #tpu.memory_space<vmem>>, vector<2x64xf32>,
    %174 = vector.extract_strided_slice %171 {offsets = [0, 0], sizes = [2, 32], strides = [1, 1]} : vector<2x64xf32> to vector<2x32xf32>
    %175 = arith.index_cast %c3_i32 : i32 to index
    %c0_76 = arith.constant 0 : index
    %c0_77 = arith.constant 0 : index
    %176 = vector.load %arg2[%175, %c0_76, %c0_77] : memref<8x2x32xf32, #tpu.memory_space<vmem>>, vector<1x2x32xf32>
    %177 = vector.shape_cast %176 : vector<1x2x32xf32> to vector<2x32xf32>
    %178 = vector.shape_cast %174 : vector<2x32xf32> to vector<1x2x32xf32>
    tpu.vector_store %arg2[%175, %c0_76, %c0_77], %178 {strides = array<i32>} : memref<8x2x32xf32, #tpu.memory_space<vmem>>, vector<1x2x32xf32>,
    %179 = vector.extract_strided_slice %171 {offsets = [0, 32], sizes = [2, 32], strides = [1, 1]} : vector<2x64xf32> to vector<2x32xf32>
    %c7_i32_78 = arith.constant 7 : i32
    %180 = arith.subi %c7_i32_78, %c3_i32 : i32
    %181 = arith.index_cast %180 : i32 to index
    %c0_79 = arith.constant 0 : index
    %c0_80 = arith.constant 0 : index
    %182 = vector.load %arg3[%181, %c0_79, %c0_80] : memref<8x2x32xf32, #tpu.memory_space<vmem>>, vector<1x2x32xf32>
    %183 = vector.shape_cast %182 : vector<1x2x32xf32> to vector<2x32xf32>
    %184 = vector.shape_cast %179 : vector<2x32xf32> to vector<1x2x32xf32>
    tpu.vector_store %arg3[%181, %c0_79, %c0_80], %184 {strides = array<i32>} : memref<8x2x32xf32, #tpu.memory_space<vmem>>, vector<1x2x32xf32>,
    %c4_i32 = arith.constant 4 : i32
    %c0_81 = arith.constant 0 : index
    %c0_82 = arith.constant 0 : index
    %185 = vector.load %arg4[%c0_81, %c0_82] : memref<2x64xf32, #tpu.memory_space<vmem>>, vector<2x64xf32>
    %c0_83 = arith.constant 0 : index
    %c0_84 = arith.constant 0 : index
    %186 = vector.load %arg5[%c0_83, %c0_84] : memref<2x64xf32, #tpu.memory_space<vmem>>, vector<2x64xf32>
    %187 = arith.index_cast %c4_i32 : i32 to index
    %c0_85 = arith.constant 0 : index
    %c0_86 = arith.constant 0 : index
    %188 = vector.load %arg0[%187, %c0_85, %c0_86] : memref<8x2x256xf32, #tpu.memory_space<vmem>>, vector<1x2x256xf32>
    %189 = vector.shape_cast %188 : vector<1x2x256xf32> to vector<2x256xf32>
    %cst_87 = arith.constant dense<0.000000e+00> : vector<2x256xf32>
    %190 = tpu.matmul %185, %4, %cst_87 {dimension_numbers = #tpu.dot_dimension_numbers<[1], [0], [0], [1], [0, 0, 1, 1], [], []>} : vector<2x64xf32>, vector<64x256xf32>, vector<2x256xf32> -> vector<2x256xf32>
    %191 = arith.addf %189, %190 : vector<2x256xf32>
    %192 = vector.extract_strided_slice %191 {offsets = [0, 0], sizes = [2, 64], strides = [1, 1]} : vector<2x256xf32> to vector<2x64xf32>
    %193 = arith.negf %192 : vector<2x64xf32>
    %194 = math.exp %193 : vector<2x64xf32>
    %cst_88 = arith.constant 1.000000e+00 : f32
    %195 = vector.broadcast %cst_88 : f32 to vector<2x64xf32>
    %196 = arith.addf %195, %194 : vector<2x64xf32>
    %197 = arith.divf %195, %196 : vector<2x64xf32>
    %198 = vector.extract_strided_slice %191 {offsets = [0, 64], sizes = [2, 64], strides = [1, 1]} : vector<2x256xf32> to vector<2x64xf32>
    %199 = arith.negf %198 : vector<2x64xf32>
    %200 = math.exp %199 : vector<2x64xf32>
    %cst_89 = arith.constant 1.000000e+00 : f32
    %201 = vector.broadcast %cst_89 : f32 to vector<2x64xf32>
    %202 = arith.addf %201, %200 : vector<2x64xf32>
    %203 = arith.divf %201, %202 : vector<2x64xf32>
    %204 = vector.extract_strided_slice %191 {offsets = [0, 128], sizes = [2, 64], strides = [1, 1]} : vector<2x256xf32> to vector<2x64xf32>
    %205 = math.tanh %204 : vector<2x64xf32>
    %206 = vector.extract_strided_slice %191 {offsets = [0, 192], sizes = [2, 64], strides = [1, 1]} : vector<2x256xf32> to vector<2x64xf32>
    %207 = arith.negf %206 : vector<2x64xf32>
    %208 = math.exp %207 : vector<2x64xf32>
    %cst_90 = arith.constant 1.000000e+00 : f32
    %209 = vector.broadcast %cst_90 : f32 to vector<2x64xf32>
    %210 = arith.addf %209, %208 : vector<2x64xf32>
    %211 = arith.divf %209, %210 : vector<2x64xf32>
    %212 = arith.mulf %203, %186 : vector<2x64xf32>
    %213 = arith.mulf %197, %205 : vector<2x64xf32>
    %214 = arith.addf %212, %213 : vector<2x64xf32>
    %215 = math.tanh %214 : vector<2x64xf32>
    %216 = arith.mulf %211, %215 : vector<2x64xf32>
    %c0_91 = arith.constant 0 : index
    %c0_92 = arith.constant 0 : index
    %217 = vector.load %arg5[%c0_91, %c0_92] : memref<2x64xf32, #tpu.memory_space<vmem>>, vector<2x64xf32>
    tpu.vector_store %arg5[%c0_91, %c0_92], %214 {strides = array<i32>} : memref<2x64xf32, #tpu.memory_space<vmem>>, vector<2x64xf32>,
    %c0_93 = arith.constant 0 : index
    %c0_94 = arith.constant 0 : index
    %218 = vector.load %arg4[%c0_93, %c0_94] : memref<2x64xf32, #tpu.memory_space<vmem>>, vector<2x64xf32>
    tpu.vector_store %arg4[%c0_93, %c0_94], %216 {strides = array<i32>} : memref<2x64xf32, #tpu.memory_space<vmem>>, vector<2x64xf32>,
    %219 = vector.extract_strided_slice %216 {offsets = [0, 0], sizes = [2, 32], strides = [1, 1]} : vector<2x64xf32> to vector<2x32xf32>
    %220 = arith.index_cast %c4_i32 : i32 to index
    %c0_95 = arith.constant 0 : index
    %c0_96 = arith.constant 0 : index
    %221 = vector.load %arg2[%220, %c0_95, %c0_96] : memref<8x2x32xf32, #tpu.memory_space<vmem>>, vector<1x2x32xf32>
    %222 = vector.shape_cast %221 : vector<1x2x32xf32> to vector<2x32xf32>
    %223 = vector.shape_cast %219 : vector<2x32xf32> to vector<1x2x32xf32>
    tpu.vector_store %arg2[%220, %c0_95, %c0_96], %223 {strides = array<i32>} : memref<8x2x32xf32, #tpu.memory_space<vmem>>, vector<1x2x32xf32>,
    %224 = vector.extract_strided_slice %216 {offsets = [0, 32], sizes = [2, 32], strides = [1, 1]} : vector<2x64xf32> to vector<2x32xf32>
    %c7_i32_97 = arith.constant 7 : i32
    %225 = arith.subi %c7_i32_97, %c4_i32 : i32
    %226 = arith.index_cast %225 : i32 to index
    %c0_98 = arith.constant 0 : index
    %c0_99 = arith.constant 0 : index
    %227 = vector.load %arg3[%226, %c0_98, %c0_99] : memref<8x2x32xf32, #tpu.memory_space<vmem>>, vector<1x2x32xf32>
    %228 = vector.shape_cast %227 : vector<1x2x32xf32> to vector<2x32xf32>
    %229 = vector.shape_cast %224 : vector<2x32xf32> to vector<1x2x32xf32>
    tpu.vector_store %arg3[%226, %c0_98, %c0_99], %229 {strides = array<i32>} : memref<8x2x32xf32, #tpu.memory_space<vmem>>, vector<1x2x32xf32>,
    %c5_i32 = arith.constant 5 : i32
    %c0_100 = arith.constant 0 : index
    %c0_101 = arith.constant 0 : index
    %230 = vector.load %arg4[%c0_100, %c0_101] : memref<2x64xf32, #tpu.memory_space<vmem>>, vector<2x64xf32>
    %c0_102 = arith.constant 0 : index
    %c0_103 = arith.constant 0 : index
    %231 = vector.load %arg5[%c0_102, %c0_103] : memref<2x64xf32, #tpu.memory_space<vmem>>, vector<2x64xf32>
    %232 = arith.index_cast %c5_i32 : i32 to index
    %c0_104 = arith.constant 0 : index
    %c0_105 = arith.constant 0 : index
    %233 = vector.load %arg0[%232, %c0_104, %c0_105] : memref<8x2x256xf32, #tpu.memory_space<vmem>>, vector<1x2x256xf32>
    %234 = vector.shape_cast %233 : vector<1x2x256xf32> to vector<2x256xf32>
    %cst_106 = arith.constant dense<0.000000e+00> : vector<2x256xf32>
    %235 = tpu.matmul %230, %4, %cst_106 {dimension_numbers = #tpu.dot_dimension_numbers<[1], [0], [0], [1], [0, 0, 1, 1], [], []>} : vector<2x64xf32>, vector<64x256xf32>, vector<2x256xf32> -> vector<2x256xf32>
    %236 = arith.addf %234, %235 : vector<2x256xf32>
    %237 = vector.extract_strided_slice %236 {offsets = [0, 0], sizes = [2, 64], strides = [1, 1]} : vector<2x256xf32> to vector<2x64xf32>
    %238 = arith.negf %237 : vector<2x64xf32>
    %239 = math.exp %238 : vector<2x64xf32>
    %cst_107 = arith.constant 1.000000e+00 : f32
    %240 = vector.broadcast %cst_107 : f32 to vector<2x64xf32>
    %241 = arith.addf %240, %239 : vector<2x64xf32>
    %242 = arith.divf %240, %241 : vector<2x64xf32>
    %243 = vector.extract_strided_slice %236 {offsets = [0, 64], sizes = [2, 64], strides = [1, 1]} : vector<2x256xf32> to vector<2x64xf32>
    %244 = arith.negf %243 : vector<2x64xf32>
    %245 = math.exp %244 : vector<2x64xf32>
    %cst_108 = arith.constant 1.000000e+00 : f32
    %246 = vector.broadcast %cst_108 : f32 to vector<2x64xf32>
    %247 = arith.addf %246, %245 : vector<2x64xf32>
    %248 = arith.divf %246, %247 : vector<2x64xf32>
    %249 = vector.extract_strided_slice %236 {offsets = [0, 128], sizes = [2, 64], strides = [1, 1]} : vector<2x256xf32> to vector<2x64xf32>
    %250 = math.tanh %249 : vector<2x64xf32>
    %251 = vector.extract_strided_slice %236 {offsets = [0, 192], sizes = [2, 64], strides = [1, 1]} : vector<2x256xf32> to vector<2x64xf32>
    %252 = arith.negf %251 : vector<2x64xf32>
    %253 = math.exp %252 : vector<2x64xf32>
    %cst_109 = arith.constant 1.000000e+00 : f32
    %254 = vector.broadcast %cst_109 : f32 to vector<2x64xf32>
    %255 = arith.addf %254, %253 : vector<2x64xf32>
    %256 = arith.divf %254, %255 : vector<2x64xf32>
    %257 = arith.mulf %248, %231 : vector<2x64xf32>
    %258 = arith.mulf %242, %250 : vector<2x64xf32>
    %259 = arith.addf %257, %258 : vector<2x64xf32>
    %260 = math.tanh %259 : vector<2x64xf32>
    %261 = arith.mulf %256, %260 : vector<2x64xf32>
    %c0_110 = arith.constant 0 : index
    %c0_111 = arith.constant 0 : index
    %262 = vector.load %arg5[%c0_110, %c0_111] : memref<2x64xf32, #tpu.memory_space<vmem>>, vector<2x64xf32>
    tpu.vector_store %arg5[%c0_110, %c0_111], %259 {strides = array<i32>} : memref<2x64xf32, #tpu.memory_space<vmem>>, vector<2x64xf32>,
    %c0_112 = arith.constant 0 : index
    %c0_113 = arith.constant 0 : index
    %263 = vector.load %arg4[%c0_112, %c0_113] : memref<2x64xf32, #tpu.memory_space<vmem>>, vector<2x64xf32>
    tpu.vector_store %arg4[%c0_112, %c0_113], %261 {strides = array<i32>} : memref<2x64xf32, #tpu.memory_space<vmem>>, vector<2x64xf32>,
    %264 = vector.extract_strided_slice %261 {offsets = [0, 0], sizes = [2, 32], strides = [1, 1]} : vector<2x64xf32> to vector<2x32xf32>
    %265 = arith.index_cast %c5_i32 : i32 to index
    %c0_114 = arith.constant 0 : index
    %c0_115 = arith.constant 0 : index
    %266 = vector.load %arg2[%265, %c0_114, %c0_115] : memref<8x2x32xf32, #tpu.memory_space<vmem>>, vector<1x2x32xf32>
    %267 = vector.shape_cast %266 : vector<1x2x32xf32> to vector<2x32xf32>
    %268 = vector.shape_cast %264 : vector<2x32xf32> to vector<1x2x32xf32>
    tpu.vector_store %arg2[%265, %c0_114, %c0_115], %268 {strides = array<i32>} : memref<8x2x32xf32, #tpu.memory_space<vmem>>, vector<1x2x32xf32>,
    %269 = vector.extract_strided_slice %261 {offsets = [0, 32], sizes = [2, 32], strides = [1, 1]} : vector<2x64xf32> to vector<2x32xf32>
    %c7_i32_116 = arith.constant 7 : i32
    %270 = arith.subi %c7_i32_116, %c5_i32 : i32
    %271 = arith.index_cast %270 : i32 to index
    %c0_117 = arith.constant 0 : index
    %c0_118 = arith.constant 0 : index
    %272 = vector.load %arg3[%271, %c0_117, %c0_118] : memref<8x2x32xf32, #tpu.memory_space<vmem>>, vector<1x2x32xf32>
    %273 = vector.shape_cast %272 : vector<1x2x32xf32> to vector<2x32xf32>
    %274 = vector.shape_cast %269 : vector<2x32xf32> to vector<1x2x32xf32>
    tpu.vector_store %arg3[%271, %c0_117, %c0_118], %274 {strides = array<i32>} : memref<8x2x32xf32, #tpu.memory_space<vmem>>, vector<1x2x32xf32>,
    %c6_i32 = arith.constant 6 : i32
    %c0_119 = arith.constant 0 : index
    %c0_120 = arith.constant 0 : index
    %275 = vector.load %arg4[%c0_119, %c0_120] : memref<2x64xf32, #tpu.memory_space<vmem>>, vector<2x64xf32>
    %c0_121 = arith.constant 0 : index
    %c0_122 = arith.constant 0 : index
    %276 = vector.load %arg5[%c0_121, %c0_122] : memref<2x64xf32, #tpu.memory_space<vmem>>, vector<2x64xf32>
    %277 = arith.index_cast %c6_i32 : i32 to index
    %c0_123 = arith.constant 0 : index
    %c0_124 = arith.constant 0 : index
    %278 = vector.load %arg0[%277, %c0_123, %c0_124] : memref<8x2x256xf32, #tpu.memory_space<vmem>>, vector<1x2x256xf32>
    %279 = vector.shape_cast %278 : vector<1x2x256xf32> to vector<2x256xf32>
    %cst_125 = arith.constant dense<0.000000e+00> : vector<2x256xf32>
    %280 = tpu.matmul %275, %4, %cst_125 {dimension_numbers = #tpu.dot_dimension_numbers<[1], [0], [0], [1], [0, 0, 1, 1], [], []>} : vector<2x64xf32>, vector<64x256xf32>, vector<2x256xf32> -> vector<2x256xf32>
    %281 = arith.addf %279, %280 : vector<2x256xf32>
    %282 = vector.extract_strided_slice %281 {offsets = [0, 0], sizes = [2, 64], strides = [1, 1]} : vector<2x256xf32> to vector<2x64xf32>
    %283 = arith.negf %282 : vector<2x64xf32>
    %284 = math.exp %283 : vector<2x64xf32>
    %cst_126 = arith.constant 1.000000e+00 : f32
    %285 = vector.broadcast %cst_126 : f32 to vector<2x64xf32>
    %286 = arith.addf %285, %284 : vector<2x64xf32>
    %287 = arith.divf %285, %286 : vector<2x64xf32>
    %288 = vector.extract_strided_slice %281 {offsets = [0, 64], sizes = [2, 64], strides = [1, 1]} : vector<2x256xf32> to vector<2x64xf32>
    %289 = arith.negf %288 : vector<2x64xf32>
    %290 = math.exp %289 : vector<2x64xf32>
    %cst_127 = arith.constant 1.000000e+00 : f32
    %291 = vector.broadcast %cst_127 : f32 to vector<2x64xf32>
    %292 = arith.addf %291, %290 : vector<2x64xf32>
    %293 = arith.divf %291, %292 : vector<2x64xf32>
    %294 = vector.extract_strided_slice %281 {offsets = [0, 128], sizes = [2, 64], strides = [1, 1]} : vector<2x256xf32> to vector<2x64xf32>
    %295 = math.tanh %294 : vector<2x64xf32>
    %296 = vector.extract_strided_slice %281 {offsets = [0, 192], sizes = [2, 64], strides = [1, 1]} : vector<2x256xf32> to vector<2x64xf32>
    %297 = arith.negf %296 : vector<2x64xf32>
    %298 = math.exp %297 : vector<2x64xf32>
    %cst_128 = arith.constant 1.000000e+00 : f32
    %299 = vector.broadcast %cst_128 : f32 to vector<2x64xf32>
    %300 = arith.addf %299, %298 : vector<2x64xf32>
    %301 = arith.divf %299, %300 : vector<2x64xf32>
    %302 = arith.mulf %293, %276 : vector<2x64xf32>
    %303 = arith.mulf %287, %295 : vector<2x64xf32>
    %304 = arith.addf %302, %303 : vector<2x64xf32>
    %305 = math.tanh %304 : vector<2x64xf32>
    %306 = arith.mulf %301, %305 : vector<2x64xf32>
    %c0_129 = arith.constant 0 : index
    %c0_130 = arith.constant 0 : index
    %307 = vector.load %arg5[%c0_129, %c0_130] : memref<2x64xf32, #tpu.memory_space<vmem>>, vector<2x64xf32>
    tpu.vector_store %arg5[%c0_129, %c0_130], %304 {strides = array<i32>} : memref<2x64xf32, #tpu.memory_space<vmem>>, vector<2x64xf32>,
    %c0_131 = arith.constant 0 : index
    %c0_132 = arith.constant 0 : index
    %308 = vector.load %arg4[%c0_131, %c0_132] : memref<2x64xf32, #tpu.memory_space<vmem>>, vector<2x64xf32>
    tpu.vector_store %arg4[%c0_131, %c0_132], %306 {strides = array<i32>} : memref<2x64xf32, #tpu.memory_space<vmem>>, vector<2x64xf32>,
    %309 = vector.extract_strided_slice %306 {offsets = [0, 0], sizes = [2, 32], strides = [1, 1]} : vector<2x64xf32> to vector<2x32xf32>
    %310 = arith.index_cast %c6_i32 : i32 to index
    %c0_133 = arith.constant 0 : index
    %c0_134 = arith.constant 0 : index
    %311 = vector.load %arg2[%310, %c0_133, %c0_134] : memref<8x2x32xf32, #tpu.memory_space<vmem>>, vector<1x2x32xf32>
    %312 = vector.shape_cast %311 : vector<1x2x32xf32> to vector<2x32xf32>
    %313 = vector.shape_cast %309 : vector<2x32xf32> to vector<1x2x32xf32>
    tpu.vector_store %arg2[%310, %c0_133, %c0_134], %313 {strides = array<i32>} : memref<8x2x32xf32, #tpu.memory_space<vmem>>, vector<1x2x32xf32>,
    %314 = vector.extract_strided_slice %306 {offsets = [0, 32], sizes = [2, 32], strides = [1, 1]} : vector<2x64xf32> to vector<2x32xf32>
    %c7_i32_135 = arith.constant 7 : i32
    %315 = arith.subi %c7_i32_135, %c6_i32 : i32
    %316 = arith.index_cast %315 : i32 to index
    %c0_136 = arith.constant 0 : index
    %c0_137 = arith.constant 0 : index
    %317 = vector.load %arg3[%316, %c0_136, %c0_137] : memref<8x2x32xf32, #tpu.memory_space<vmem>>, vector<1x2x32xf32>
    %318 = vector.shape_cast %317 : vector<1x2x32xf32> to vector<2x32xf32>
    %319 = vector.shape_cast %314 : vector<2x32xf32> to vector<1x2x32xf32>
    tpu.vector_store %arg3[%316, %c0_136, %c0_137], %319 {strides = array<i32>} : memref<8x2x32xf32, #tpu.memory_space<vmem>>, vector<1x2x32xf32>,
    %c7_i32_138 = arith.constant 7 : i32
    %c0_139 = arith.constant 0 : index
    %c0_140 = arith.constant 0 : index
    %320 = vector.load %arg4[%c0_139, %c0_140] : memref<2x64xf32, #tpu.memory_space<vmem>>, vector<2x64xf32>
    %c0_141 = arith.constant 0 : index
    %c0_142 = arith.constant 0 : index
    %321 = vector.load %arg5[%c0_141, %c0_142] : memref<2x64xf32, #tpu.memory_space<vmem>>, vector<2x64xf32>
    %322 = arith.index_cast %c7_i32_138 : i32 to index
    %c0_143 = arith.constant 0 : index
    %c0_144 = arith.constant 0 : index
    %323 = vector.load %arg0[%322, %c0_143, %c0_144] : memref<8x2x256xf32, #tpu.memory_space<vmem>>, vector<1x2x256xf32>
    %324 = vector.shape_cast %323 : vector<1x2x256xf32> to vector<2x256xf32>
    %cst_145 = arith.constant dense<0.000000e+00> : vector<2x256xf32>
    %325 = tpu.matmul %320, %4, %cst_145 {dimension_numbers = #tpu.dot_dimension_numbers<[1], [0], [0], [1], [0, 0, 1, 1], [], []>} : vector<2x64xf32>, vector<64x256xf32>, vector<2x256xf32> -> vector<2x256xf32>
    %326 = arith.addf %324, %325 : vector<2x256xf32>
    %327 = vector.extract_strided_slice %326 {offsets = [0, 0], sizes = [2, 64], strides = [1, 1]} : vector<2x256xf32> to vector<2x64xf32>
    %328 = arith.negf %327 : vector<2x64xf32>
    %329 = math.exp %328 : vector<2x64xf32>
    %cst_146 = arith.constant 1.000000e+00 : f32
    %330 = vector.broadcast %cst_146 : f32 to vector<2x64xf32>
    %331 = arith.addf %330, %329 : vector<2x64xf32>
    %332 = arith.divf %330, %331 : vector<2x64xf32>
    %333 = vector.extract_strided_slice %326 {offsets = [0, 64], sizes = [2, 64], strides = [1, 1]} : vector<2x256xf32> to vector<2x64xf32>
    %334 = arith.negf %333 : vector<2x64xf32>
    %335 = math.exp %334 : vector<2x64xf32>
    %cst_147 = arith.constant 1.000000e+00 : f32
    %336 = vector.broadcast %cst_147 : f32 to vector<2x64xf32>
    %337 = arith.addf %336, %335 : vector<2x64xf32>
    %338 = arith.divf %336, %337 : vector<2x64xf32>
    %339 = vector.extract_strided_slice %326 {offsets = [0, 128], sizes = [2, 64], strides = [1, 1]} : vector<2x256xf32> to vector<2x64xf32>
    %340 = math.tanh %339 : vector<2x64xf32>
    %341 = vector.extract_strided_slice %326 {offsets = [0, 192], sizes = [2, 64], strides = [1, 1]} : vector<2x256xf32> to vector<2x64xf32>
    %342 = arith.negf %341 : vector<2x64xf32>
    %343 = math.exp %342 : vector<2x64xf32>
    %cst_148 = arith.constant 1.000000e+00 : f32
    %344 = vector.broadcast %cst_148 : f32 to vector<2x64xf32>
    %345 = arith.addf %344, %343 : vector<2x64xf32>
    %346 = arith.divf %344, %345 : vector<2x64xf32>
    %347 = arith.mulf %338, %321 : vector<2x64xf32>
    %348 = arith.mulf %332, %340 : vector<2x64xf32>
    %349 = arith.addf %347, %348 : vector<2x64xf32>
    %350 = math.tanh %349 : vector<2x64xf32>
    %351 = arith.mulf %346, %350 : vector<2x64xf32>
    %c0_149 = arith.constant 0 : index
    %c0_150 = arith.constant 0 : index
    %352 = vector.load %arg5[%c0_149, %c0_150] : memref<2x64xf32, #tpu.memory_space<vmem>>, vector<2x64xf32>
    tpu.vector_store %arg5[%c0_149, %c0_150], %349 {strides = array<i32>} : memref<2x64xf32, #tpu.memory_space<vmem>>, vector<2x64xf32>,
    %c0_151 = arith.constant 0 : index
    %c0_152 = arith.constant 0 : index
    %353 = vector.load %arg4[%c0_151, %c0_152] : memref<2x64xf32, #tpu.memory_space<vmem>>, vector<2x64xf32>
    tpu.vector_store %arg4[%c0_151, %c0_152], %351 {strides = array<i32>} : memref<2x64xf32, #tpu.memory_space<vmem>>, vector<2x64xf32>,
    %354 = vector.extract_strided_slice %351 {offsets = [0, 0], sizes = [2, 32], strides = [1, 1]} : vector<2x64xf32> to vector<2x32xf32>
    %355 = arith.index_cast %c7_i32_138 : i32 to index
    %c0_153 = arith.constant 0 : index
    %c0_154 = arith.constant 0 : index
    %356 = vector.load %arg2[%355, %c0_153, %c0_154] : memref<8x2x32xf32, #tpu.memory_space<vmem>>, vector<1x2x32xf32>
    %357 = vector.shape_cast %356 : vector<1x2x32xf32> to vector<2x32xf32>
    %358 = vector.shape_cast %354 : vector<2x32xf32> to vector<1x2x32xf32>
    tpu.vector_store %arg2[%355, %c0_153, %c0_154], %358 {strides = array<i32>} : memref<8x2x32xf32, #tpu.memory_space<vmem>>, vector<1x2x32xf32>,
    %359 = vector.extract_strided_slice %351 {offsets = [0, 32], sizes = [2, 32], strides = [1, 1]} : vector<2x64xf32> to vector<2x32xf32>
    %c7_i32_155 = arith.constant 7 : i32
    %360 = arith.subi %c7_i32_155, %c7_i32_138 : i32
    %361 = arith.index_cast %360 : i32 to index
    %c0_156 = arith.constant 0 : index
    %c0_157 = arith.constant 0 : index
    %362 = vector.load %arg3[%361, %c0_156, %c0_157] : memref<8x2x32xf32, #tpu.memory_space<vmem>>, vector<1x2x32xf32>
    %363 = vector.shape_cast %362 : vector<1x2x32xf32> to vector<2x32xf32>
    %364 = vector.shape_cast %359 : vector<2x32xf32> to vector<1x2x32xf32>
    tpu.vector_store %arg3[%361, %c0_156, %c0_157], %364 {strides = array<i32>} : memref<8x2x32xf32, #tpu.memory_space<vmem>>, vector<1x2x32xf32>,
    %c8_i32 = arith.constant 8 : i32
    return
  }
}

module attributes {stable_mosaic.version = 11 : i64} {
  func.func @_bilstm_layer_fc_kernel(%arg0: memref<8x2x256xf32, #tpu.memory_space<vmem>>, %arg1: memref<64x256xf32, #tpu.memory_space<vmem>>, %arg2: memref<64x5xf32, #tpu.memory_space<vmem>>, %arg3: memref<1x5xf32, #tpu.memory_space<vmem>>, %arg4: memref<8x2x32xf32, #tpu.memory_space<vmem>>, %arg5: memref<8x2x32xf32, #tpu.memory_space<vmem>>, %arg6: memref<2x5xf32, #tpu.memory_space<vmem>>, %arg7: memref<2x64xf32, #tpu.memory_space<vmem>>, %arg8: memref<2x64xf32, #tpu.memory_space<vmem>>) attributes {dimension_semantics = [], scalar_prefetch = 0 : i64, scratch_operands = 2 : i64, tpu.core_type = #tpu.core_type<tc>} {
    %cst = arith.constant 0.000000e+00 : f32
    %0 = vector.broadcast %cst : f32 to vector<2x64xf32>
    %c0 = arith.constant 0 : index
    %c0_0 = arith.constant 0 : index
    %1 = vector.load %arg7[%c0, %c0_0] : memref<2x64xf32, #tpu.memory_space<vmem>>, vector<2x64xf32>
    tpu.vector_store %arg7[%c0, %c0_0], %0 {strides = array<i32>} : memref<2x64xf32, #tpu.memory_space<vmem>>, vector<2x64xf32>,
    %cst_1 = arith.constant 0.000000e+00 : f32
    %2 = vector.broadcast %cst_1 : f32 to vector<2x64xf32>
    %c0_2 = arith.constant 0 : index
    %c0_3 = arith.constant 0 : index
    %3 = vector.load %arg8[%c0_2, %c0_3] : memref<2x64xf32, #tpu.memory_space<vmem>>, vector<2x64xf32>
    tpu.vector_store %arg8[%c0_2, %c0_3], %2 {strides = array<i32>} : memref<2x64xf32, #tpu.memory_space<vmem>>, vector<2x64xf32>,
    %c0_4 = arith.constant 0 : index
    %c0_5 = arith.constant 0 : index
    %4 = vector.load %arg1[%c0_4, %c0_5] : memref<64x256xf32, #tpu.memory_space<vmem>>, vector<64x256xf32>
    %c0_i32 = arith.constant 0 : i32
    %c0_6 = arith.constant 0 : index
    %c0_7 = arith.constant 0 : index
    %5 = vector.load %arg7[%c0_6, %c0_7] : memref<2x64xf32, #tpu.memory_space<vmem>>, vector<2x64xf32>
    %c0_8 = arith.constant 0 : index
    %c0_9 = arith.constant 0 : index
    %6 = vector.load %arg8[%c0_8, %c0_9] : memref<2x64xf32, #tpu.memory_space<vmem>>, vector<2x64xf32>
    %7 = arith.index_cast %c0_i32 : i32 to index
    %c0_10 = arith.constant 0 : index
    %c0_11 = arith.constant 0 : index
    %8 = vector.load %arg0[%7, %c0_10, %c0_11] : memref<8x2x256xf32, #tpu.memory_space<vmem>>, vector<1x2x256xf32>
    %9 = vector.shape_cast %8 : vector<1x2x256xf32> to vector<2x256xf32>
    %cst_12 = arith.constant dense<0.000000e+00> : vector<2x256xf32>
    %10 = tpu.matmul %5, %4, %cst_12 {dimension_numbers = #tpu.dot_dimension_numbers<[1], [0], [0], [1], [0, 0, 1, 1], [], []>} : vector<2x64xf32>, vector<64x256xf32>, vector<2x256xf32> -> vector<2x256xf32>
    %11 = arith.addf %9, %10 : vector<2x256xf32>
    %12 = vector.extract_strided_slice %11 {offsets = [0, 0], sizes = [2, 64], strides = [1, 1]} : vector<2x256xf32> to vector<2x64xf32>
    %13 = arith.negf %12 : vector<2x64xf32>
    %14 = math.exp %13 : vector<2x64xf32>
    %cst_13 = arith.constant 1.000000e+00 : f32
    %15 = vector.broadcast %cst_13 : f32 to vector<2x64xf32>
    %16 = arith.addf %15, %14 : vector<2x64xf32>
    %17 = arith.divf %15, %16 : vector<2x64xf32>
    %18 = vector.extract_strided_slice %11 {offsets = [0, 64], sizes = [2, 64], strides = [1, 1]} : vector<2x256xf32> to vector<2x64xf32>
    %19 = arith.negf %18 : vector<2x64xf32>
    %20 = math.exp %19 : vector<2x64xf32>
    %cst_14 = arith.constant 1.000000e+00 : f32
    %21 = vector.broadcast %cst_14 : f32 to vector<2x64xf32>
    %22 = arith.addf %21, %20 : vector<2x64xf32>
    %23 = arith.divf %21, %22 : vector<2x64xf32>
    %24 = vector.extract_strided_slice %11 {offsets = [0, 128], sizes = [2, 64], strides = [1, 1]} : vector<2x256xf32> to vector<2x64xf32>
    %25 = math.tanh %24 : vector<2x64xf32>
    %26 = vector.extract_strided_slice %11 {offsets = [0, 192], sizes = [2, 64], strides = [1, 1]} : vector<2x256xf32> to vector<2x64xf32>
    %27 = arith.negf %26 : vector<2x64xf32>
    %28 = math.exp %27 : vector<2x64xf32>
    %cst_15 = arith.constant 1.000000e+00 : f32
    %29 = vector.broadcast %cst_15 : f32 to vector<2x64xf32>
    %30 = arith.addf %29, %28 : vector<2x64xf32>
    %31 = arith.divf %29, %30 : vector<2x64xf32>
    %32 = arith.mulf %23, %6 : vector<2x64xf32>
    %33 = arith.mulf %17, %25 : vector<2x64xf32>
    %34 = arith.addf %32, %33 : vector<2x64xf32>
    %35 = math.tanh %34 : vector<2x64xf32>
    %36 = arith.mulf %31, %35 : vector<2x64xf32>
    %c0_16 = arith.constant 0 : index
    %c0_17 = arith.constant 0 : index
    %37 = vector.load %arg8[%c0_16, %c0_17] : memref<2x64xf32, #tpu.memory_space<vmem>>, vector<2x64xf32>
    tpu.vector_store %arg8[%c0_16, %c0_17], %34 {strides = array<i32>} : memref<2x64xf32, #tpu.memory_space<vmem>>, vector<2x64xf32>,
    %c0_18 = arith.constant 0 : index
    %c0_19 = arith.constant 0 : index
    %38 = vector.load %arg7[%c0_18, %c0_19] : memref<2x64xf32, #tpu.memory_space<vmem>>, vector<2x64xf32>
    tpu.vector_store %arg7[%c0_18, %c0_19], %36 {strides = array<i32>} : memref<2x64xf32, #tpu.memory_space<vmem>>, vector<2x64xf32>,
    %39 = vector.extract_strided_slice %36 {offsets = [0, 0], sizes = [2, 32], strides = [1, 1]} : vector<2x64xf32> to vector<2x32xf32>
    %40 = arith.index_cast %c0_i32 : i32 to index
    %c0_20 = arith.constant 0 : index
    %c0_21 = arith.constant 0 : index
    %41 = vector.load %arg4[%40, %c0_20, %c0_21] : memref<8x2x32xf32, #tpu.memory_space<vmem>>, vector<1x2x32xf32>
    %42 = vector.shape_cast %41 : vector<1x2x32xf32> to vector<2x32xf32>
    %43 = vector.shape_cast %39 : vector<2x32xf32> to vector<1x2x32xf32>
    tpu.vector_store %arg4[%40, %c0_20, %c0_21], %43 {strides = array<i32>} : memref<8x2x32xf32, #tpu.memory_space<vmem>>, vector<1x2x32xf32>,
    %44 = vector.extract_strided_slice %36 {offsets = [0, 32], sizes = [2, 32], strides = [1, 1]} : vector<2x64xf32> to vector<2x32xf32>
    %c7_i32 = arith.constant 7 : i32
    %45 = arith.subi %c7_i32, %c0_i32 : i32
    %46 = arith.index_cast %45 : i32 to index
    %c0_22 = arith.constant 0 : index
    %c0_23 = arith.constant 0 : index
    %47 = vector.load %arg5[%46, %c0_22, %c0_23] : memref<8x2x32xf32, #tpu.memory_space<vmem>>, vector<1x2x32xf32>
    %48 = vector.shape_cast %47 : vector<1x2x32xf32> to vector<2x32xf32>
    %49 = vector.shape_cast %44 : vector<2x32xf32> to vector<1x2x32xf32>
    tpu.vector_store %arg5[%46, %c0_22, %c0_23], %49 {strides = array<i32>} : memref<8x2x32xf32, #tpu.memory_space<vmem>>, vector<1x2x32xf32>,
    %c1_i32 = arith.constant 1 : i32
    %c0_24 = arith.constant 0 : index
    %c0_25 = arith.constant 0 : index
    %50 = vector.load %arg7[%c0_24, %c0_25] : memref<2x64xf32, #tpu.memory_space<vmem>>, vector<2x64xf32>
    %c0_26 = arith.constant 0 : index
    %c0_27 = arith.constant 0 : index
    %51 = vector.load %arg8[%c0_26, %c0_27] : memref<2x64xf32, #tpu.memory_space<vmem>>, vector<2x64xf32>
    %52 = arith.index_cast %c1_i32 : i32 to index
    %c0_28 = arith.constant 0 : index
    %c0_29 = arith.constant 0 : index
    %53 = vector.load %arg0[%52, %c0_28, %c0_29] : memref<8x2x256xf32, #tpu.memory_space<vmem>>, vector<1x2x256xf32>
    %54 = vector.shape_cast %53 : vector<1x2x256xf32> to vector<2x256xf32>
    %cst_30 = arith.constant dense<0.000000e+00> : vector<2x256xf32>
    %55 = tpu.matmul %50, %4, %cst_30 {dimension_numbers = #tpu.dot_dimension_numbers<[1], [0], [0], [1], [0, 0, 1, 1], [], []>} : vector<2x64xf32>, vector<64x256xf32>, vector<2x256xf32> -> vector<2x256xf32>
    %56 = arith.addf %54, %55 : vector<2x256xf32>
    %57 = vector.extract_strided_slice %56 {offsets = [0, 0], sizes = [2, 64], strides = [1, 1]} : vector<2x256xf32> to vector<2x64xf32>
    %58 = arith.negf %57 : vector<2x64xf32>
    %59 = math.exp %58 : vector<2x64xf32>
    %cst_31 = arith.constant 1.000000e+00 : f32
    %60 = vector.broadcast %cst_31 : f32 to vector<2x64xf32>
    %61 = arith.addf %60, %59 : vector<2x64xf32>
    %62 = arith.divf %60, %61 : vector<2x64xf32>
    %63 = vector.extract_strided_slice %56 {offsets = [0, 64], sizes = [2, 64], strides = [1, 1]} : vector<2x256xf32> to vector<2x64xf32>
    %64 = arith.negf %63 : vector<2x64xf32>
    %65 = math.exp %64 : vector<2x64xf32>
    %cst_32 = arith.constant 1.000000e+00 : f32
    %66 = vector.broadcast %cst_32 : f32 to vector<2x64xf32>
    %67 = arith.addf %66, %65 : vector<2x64xf32>
    %68 = arith.divf %66, %67 : vector<2x64xf32>
    %69 = vector.extract_strided_slice %56 {offsets = [0, 128], sizes = [2, 64], strides = [1, 1]} : vector<2x256xf32> to vector<2x64xf32>
    %70 = math.tanh %69 : vector<2x64xf32>
    %71 = vector.extract_strided_slice %56 {offsets = [0, 192], sizes = [2, 64], strides = [1, 1]} : vector<2x256xf32> to vector<2x64xf32>
    %72 = arith.negf %71 : vector<2x64xf32>
    %73 = math.exp %72 : vector<2x64xf32>
    %cst_33 = arith.constant 1.000000e+00 : f32
    %74 = vector.broadcast %cst_33 : f32 to vector<2x64xf32>
    %75 = arith.addf %74, %73 : vector<2x64xf32>
    %76 = arith.divf %74, %75 : vector<2x64xf32>
    %77 = arith.mulf %68, %51 : vector<2x64xf32>
    %78 = arith.mulf %62, %70 : vector<2x64xf32>
    %79 = arith.addf %77, %78 : vector<2x64xf32>
    %80 = math.tanh %79 : vector<2x64xf32>
    %81 = arith.mulf %76, %80 : vector<2x64xf32>
    %c0_34 = arith.constant 0 : index
    %c0_35 = arith.constant 0 : index
    %82 = vector.load %arg8[%c0_34, %c0_35] : memref<2x64xf32, #tpu.memory_space<vmem>>, vector<2x64xf32>
    tpu.vector_store %arg8[%c0_34, %c0_35], %79 {strides = array<i32>} : memref<2x64xf32, #tpu.memory_space<vmem>>, vector<2x64xf32>,
    %c0_36 = arith.constant 0 : index
    %c0_37 = arith.constant 0 : index
    %83 = vector.load %arg7[%c0_36, %c0_37] : memref<2x64xf32, #tpu.memory_space<vmem>>, vector<2x64xf32>
    tpu.vector_store %arg7[%c0_36, %c0_37], %81 {strides = array<i32>} : memref<2x64xf32, #tpu.memory_space<vmem>>, vector<2x64xf32>,
    %84 = vector.extract_strided_slice %81 {offsets = [0, 0], sizes = [2, 32], strides = [1, 1]} : vector<2x64xf32> to vector<2x32xf32>
    %85 = arith.index_cast %c1_i32 : i32 to index
    %c0_38 = arith.constant 0 : index
    %c0_39 = arith.constant 0 : index
    %86 = vector.load %arg4[%85, %c0_38, %c0_39] : memref<8x2x32xf32, #tpu.memory_space<vmem>>, vector<1x2x32xf32>
    %87 = vector.shape_cast %86 : vector<1x2x32xf32> to vector<2x32xf32>
    %88 = vector.shape_cast %84 : vector<2x32xf32> to vector<1x2x32xf32>
    tpu.vector_store %arg4[%85, %c0_38, %c0_39], %88 {strides = array<i32>} : memref<8x2x32xf32, #tpu.memory_space<vmem>>, vector<1x2x32xf32>,
    %89 = vector.extract_strided_slice %81 {offsets = [0, 32], sizes = [2, 32], strides = [1, 1]} : vector<2x64xf32> to vector<2x32xf32>
    %c7_i32_40 = arith.constant 7 : i32
    %90 = arith.subi %c7_i32_40, %c1_i32 : i32
    %91 = arith.index_cast %90 : i32 to index
    %c0_41 = arith.constant 0 : index
    %c0_42 = arith.constant 0 : index
    %92 = vector.load %arg5[%91, %c0_41, %c0_42] : memref<8x2x32xf32, #tpu.memory_space<vmem>>, vector<1x2x32xf32>
    %93 = vector.shape_cast %92 : vector<1x2x32xf32> to vector<2x32xf32>
    %94 = vector.shape_cast %89 : vector<2x32xf32> to vector<1x2x32xf32>
    tpu.vector_store %arg5[%91, %c0_41, %c0_42], %94 {strides = array<i32>} : memref<8x2x32xf32, #tpu.memory_space<vmem>>, vector<1x2x32xf32>,
    %c2_i32 = arith.constant 2 : i32
    %c0_43 = arith.constant 0 : index
    %c0_44 = arith.constant 0 : index
    %95 = vector.load %arg7[%c0_43, %c0_44] : memref<2x64xf32, #tpu.memory_space<vmem>>, vector<2x64xf32>
    %c0_45 = arith.constant 0 : index
    %c0_46 = arith.constant 0 : index
    %96 = vector.load %arg8[%c0_45, %c0_46] : memref<2x64xf32, #tpu.memory_space<vmem>>, vector<2x64xf32>
    %97 = arith.index_cast %c2_i32 : i32 to index
    %c0_47 = arith.constant 0 : index
    %c0_48 = arith.constant 0 : index
    %98 = vector.load %arg0[%97, %c0_47, %c0_48] : memref<8x2x256xf32, #tpu.memory_space<vmem>>, vector<1x2x256xf32>
    %99 = vector.shape_cast %98 : vector<1x2x256xf32> to vector<2x256xf32>
    %cst_49 = arith.constant dense<0.000000e+00> : vector<2x256xf32>
    %100 = tpu.matmul %95, %4, %cst_49 {dimension_numbers = #tpu.dot_dimension_numbers<[1], [0], [0], [1], [0, 0, 1, 1], [], []>} : vector<2x64xf32>, vector<64x256xf32>, vector<2x256xf32> -> vector<2x256xf32>
    %101 = arith.addf %99, %100 : vector<2x256xf32>
    %102 = vector.extract_strided_slice %101 {offsets = [0, 0], sizes = [2, 64], strides = [1, 1]} : vector<2x256xf32> to vector<2x64xf32>
    %103 = arith.negf %102 : vector<2x64xf32>
    %104 = math.exp %103 : vector<2x64xf32>
    %cst_50 = arith.constant 1.000000e+00 : f32
    %105 = vector.broadcast %cst_50 : f32 to vector<2x64xf32>
    %106 = arith.addf %105, %104 : vector<2x64xf32>
    %107 = arith.divf %105, %106 : vector<2x64xf32>
    %108 = vector.extract_strided_slice %101 {offsets = [0, 64], sizes = [2, 64], strides = [1, 1]} : vector<2x256xf32> to vector<2x64xf32>
    %109 = arith.negf %108 : vector<2x64xf32>
    %110 = math.exp %109 : vector<2x64xf32>
    %cst_51 = arith.constant 1.000000e+00 : f32
    %111 = vector.broadcast %cst_51 : f32 to vector<2x64xf32>
    %112 = arith.addf %111, %110 : vector<2x64xf32>
    %113 = arith.divf %111, %112 : vector<2x64xf32>
    %114 = vector.extract_strided_slice %101 {offsets = [0, 128], sizes = [2, 64], strides = [1, 1]} : vector<2x256xf32> to vector<2x64xf32>
    %115 = math.tanh %114 : vector<2x64xf32>
    %116 = vector.extract_strided_slice %101 {offsets = [0, 192], sizes = [2, 64], strides = [1, 1]} : vector<2x256xf32> to vector<2x64xf32>
    %117 = arith.negf %116 : vector<2x64xf32>
    %118 = math.exp %117 : vector<2x64xf32>
    %cst_52 = arith.constant 1.000000e+00 : f32
    %119 = vector.broadcast %cst_52 : f32 to vector<2x64xf32>
    %120 = arith.addf %119, %118 : vector<2x64xf32>
    %121 = arith.divf %119, %120 : vector<2x64xf32>
    %122 = arith.mulf %113, %96 : vector<2x64xf32>
    %123 = arith.mulf %107, %115 : vector<2x64xf32>
    %124 = arith.addf %122, %123 : vector<2x64xf32>
    %125 = math.tanh %124 : vector<2x64xf32>
    %126 = arith.mulf %121, %125 : vector<2x64xf32>
    %c0_53 = arith.constant 0 : index
    %c0_54 = arith.constant 0 : index
    %127 = vector.load %arg8[%c0_53, %c0_54] : memref<2x64xf32, #tpu.memory_space<vmem>>, vector<2x64xf32>
    tpu.vector_store %arg8[%c0_53, %c0_54], %124 {strides = array<i32>} : memref<2x64xf32, #tpu.memory_space<vmem>>, vector<2x64xf32>,
    %c0_55 = arith.constant 0 : index
    %c0_56 = arith.constant 0 : index
    %128 = vector.load %arg7[%c0_55, %c0_56] : memref<2x64xf32, #tpu.memory_space<vmem>>, vector<2x64xf32>
    tpu.vector_store %arg7[%c0_55, %c0_56], %126 {strides = array<i32>} : memref<2x64xf32, #tpu.memory_space<vmem>>, vector<2x64xf32>,
    %129 = vector.extract_strided_slice %126 {offsets = [0, 0], sizes = [2, 32], strides = [1, 1]} : vector<2x64xf32> to vector<2x32xf32>
    %130 = arith.index_cast %c2_i32 : i32 to index
    %c0_57 = arith.constant 0 : index
    %c0_58 = arith.constant 0 : index
    %131 = vector.load %arg4[%130, %c0_57, %c0_58] : memref<8x2x32xf32, #tpu.memory_space<vmem>>, vector<1x2x32xf32>
    %132 = vector.shape_cast %131 : vector<1x2x32xf32> to vector<2x32xf32>
    %133 = vector.shape_cast %129 : vector<2x32xf32> to vector<1x2x32xf32>
    tpu.vector_store %arg4[%130, %c0_57, %c0_58], %133 {strides = array<i32>} : memref<8x2x32xf32, #tpu.memory_space<vmem>>, vector<1x2x32xf32>,
    %134 = vector.extract_strided_slice %126 {offsets = [0, 32], sizes = [2, 32], strides = [1, 1]} : vector<2x64xf32> to vector<2x32xf32>
    %c7_i32_59 = arith.constant 7 : i32
    %135 = arith.subi %c7_i32_59, %c2_i32 : i32
    %136 = arith.index_cast %135 : i32 to index
    %c0_60 = arith.constant 0 : index
    %c0_61 = arith.constant 0 : index
    %137 = vector.load %arg5[%136, %c0_60, %c0_61] : memref<8x2x32xf32, #tpu.memory_space<vmem>>, vector<1x2x32xf32>
    %138 = vector.shape_cast %137 : vector<1x2x32xf32> to vector<2x32xf32>
    %139 = vector.shape_cast %134 : vector<2x32xf32> to vector<1x2x32xf32>
    tpu.vector_store %arg5[%136, %c0_60, %c0_61], %139 {strides = array<i32>} : memref<8x2x32xf32, #tpu.memory_space<vmem>>, vector<1x2x32xf32>,
    %c3_i32 = arith.constant 3 : i32
    %c0_62 = arith.constant 0 : index
    %c0_63 = arith.constant 0 : index
    %140 = vector.load %arg7[%c0_62, %c0_63] : memref<2x64xf32, #tpu.memory_space<vmem>>, vector<2x64xf32>
    %c0_64 = arith.constant 0 : index
    %c0_65 = arith.constant 0 : index
    %141 = vector.load %arg8[%c0_64, %c0_65] : memref<2x64xf32, #tpu.memory_space<vmem>>, vector<2x64xf32>
    %142 = arith.index_cast %c3_i32 : i32 to index
    %c0_66 = arith.constant 0 : index
    %c0_67 = arith.constant 0 : index
    %143 = vector.load %arg0[%142, %c0_66, %c0_67] : memref<8x2x256xf32, #tpu.memory_space<vmem>>, vector<1x2x256xf32>
    %144 = vector.shape_cast %143 : vector<1x2x256xf32> to vector<2x256xf32>
    %cst_68 = arith.constant dense<0.000000e+00> : vector<2x256xf32>
    %145 = tpu.matmul %140, %4, %cst_68 {dimension_numbers = #tpu.dot_dimension_numbers<[1], [0], [0], [1], [0, 0, 1, 1], [], []>} : vector<2x64xf32>, vector<64x256xf32>, vector<2x256xf32> -> vector<2x256xf32>
    %146 = arith.addf %144, %145 : vector<2x256xf32>
    %147 = vector.extract_strided_slice %146 {offsets = [0, 0], sizes = [2, 64], strides = [1, 1]} : vector<2x256xf32> to vector<2x64xf32>
    %148 = arith.negf %147 : vector<2x64xf32>
    %149 = math.exp %148 : vector<2x64xf32>
    %cst_69 = arith.constant 1.000000e+00 : f32
    %150 = vector.broadcast %cst_69 : f32 to vector<2x64xf32>
    %151 = arith.addf %150, %149 : vector<2x64xf32>
    %152 = arith.divf %150, %151 : vector<2x64xf32>
    %153 = vector.extract_strided_slice %146 {offsets = [0, 64], sizes = [2, 64], strides = [1, 1]} : vector<2x256xf32> to vector<2x64xf32>
    %154 = arith.negf %153 : vector<2x64xf32>
    %155 = math.exp %154 : vector<2x64xf32>
    %cst_70 = arith.constant 1.000000e+00 : f32
    %156 = vector.broadcast %cst_70 : f32 to vector<2x64xf32>
    %157 = arith.addf %156, %155 : vector<2x64xf32>
    %158 = arith.divf %156, %157 : vector<2x64xf32>
    %159 = vector.extract_strided_slice %146 {offsets = [0, 128], sizes = [2, 64], strides = [1, 1]} : vector<2x256xf32> to vector<2x64xf32>
    %160 = math.tanh %159 : vector<2x64xf32>
    %161 = vector.extract_strided_slice %146 {offsets = [0, 192], sizes = [2, 64], strides = [1, 1]} : vector<2x256xf32> to vector<2x64xf32>
    %162 = arith.negf %161 : vector<2x64xf32>
    %163 = math.exp %162 : vector<2x64xf32>
    %cst_71 = arith.constant 1.000000e+00 : f32
    %164 = vector.broadcast %cst_71 : f32 to vector<2x64xf32>
    %165 = arith.addf %164, %163 : vector<2x64xf32>
    %166 = arith.divf %164, %165 : vector<2x64xf32>
    %167 = arith.mulf %158, %141 : vector<2x64xf32>
    %168 = arith.mulf %152, %160 : vector<2x64xf32>
    %169 = arith.addf %167, %168 : vector<2x64xf32>
    %170 = math.tanh %169 : vector<2x64xf32>
    %171 = arith.mulf %166, %170 : vector<2x64xf32>
    %c0_72 = arith.constant 0 : index
    %c0_73 = arith.constant 0 : index
    %172 = vector.load %arg8[%c0_72, %c0_73] : memref<2x64xf32, #tpu.memory_space<vmem>>, vector<2x64xf32>
    tpu.vector_store %arg8[%c0_72, %c0_73], %169 {strides = array<i32>} : memref<2x64xf32, #tpu.memory_space<vmem>>, vector<2x64xf32>,
    %c0_74 = arith.constant 0 : index
    %c0_75 = arith.constant 0 : index
    %173 = vector.load %arg7[%c0_74, %c0_75] : memref<2x64xf32, #tpu.memory_space<vmem>>, vector<2x64xf32>
    tpu.vector_store %arg7[%c0_74, %c0_75], %171 {strides = array<i32>} : memref<2x64xf32, #tpu.memory_space<vmem>>, vector<2x64xf32>,
    %174 = vector.extract_strided_slice %171 {offsets = [0, 0], sizes = [2, 32], strides = [1, 1]} : vector<2x64xf32> to vector<2x32xf32>
    %175 = arith.index_cast %c3_i32 : i32 to index
    %c0_76 = arith.constant 0 : index
    %c0_77 = arith.constant 0 : index
    %176 = vector.load %arg4[%175, %c0_76, %c0_77] : memref<8x2x32xf32, #tpu.memory_space<vmem>>, vector<1x2x32xf32>
    %177 = vector.shape_cast %176 : vector<1x2x32xf32> to vector<2x32xf32>
    %178 = vector.shape_cast %174 : vector<2x32xf32> to vector<1x2x32xf32>
    tpu.vector_store %arg4[%175, %c0_76, %c0_77], %178 {strides = array<i32>} : memref<8x2x32xf32, #tpu.memory_space<vmem>>, vector<1x2x32xf32>,
    %179 = vector.extract_strided_slice %171 {offsets = [0, 32], sizes = [2, 32], strides = [1, 1]} : vector<2x64xf32> to vector<2x32xf32>
    %c7_i32_78 = arith.constant 7 : i32
    %180 = arith.subi %c7_i32_78, %c3_i32 : i32
    %181 = arith.index_cast %180 : i32 to index
    %c0_79 = arith.constant 0 : index
    %c0_80 = arith.constant 0 : index
    %182 = vector.load %arg5[%181, %c0_79, %c0_80] : memref<8x2x32xf32, #tpu.memory_space<vmem>>, vector<1x2x32xf32>
    %183 = vector.shape_cast %182 : vector<1x2x32xf32> to vector<2x32xf32>
    %184 = vector.shape_cast %179 : vector<2x32xf32> to vector<1x2x32xf32>
    tpu.vector_store %arg5[%181, %c0_79, %c0_80], %184 {strides = array<i32>} : memref<8x2x32xf32, #tpu.memory_space<vmem>>, vector<1x2x32xf32>,
    %c4_i32 = arith.constant 4 : i32
    %c0_81 = arith.constant 0 : index
    %c0_82 = arith.constant 0 : index
    %185 = vector.load %arg7[%c0_81, %c0_82] : memref<2x64xf32, #tpu.memory_space<vmem>>, vector<2x64xf32>
    %c0_83 = arith.constant 0 : index
    %c0_84 = arith.constant 0 : index
    %186 = vector.load %arg8[%c0_83, %c0_84] : memref<2x64xf32, #tpu.memory_space<vmem>>, vector<2x64xf32>
    %187 = arith.index_cast %c4_i32 : i32 to index
    %c0_85 = arith.constant 0 : index
    %c0_86 = arith.constant 0 : index
    %188 = vector.load %arg0[%187, %c0_85, %c0_86] : memref<8x2x256xf32, #tpu.memory_space<vmem>>, vector<1x2x256xf32>
    %189 = vector.shape_cast %188 : vector<1x2x256xf32> to vector<2x256xf32>
    %cst_87 = arith.constant dense<0.000000e+00> : vector<2x256xf32>
    %190 = tpu.matmul %185, %4, %cst_87 {dimension_numbers = #tpu.dot_dimension_numbers<[1], [0], [0], [1], [0, 0, 1, 1], [], []>} : vector<2x64xf32>, vector<64x256xf32>, vector<2x256xf32> -> vector<2x256xf32>
    %191 = arith.addf %189, %190 : vector<2x256xf32>
    %192 = vector.extract_strided_slice %191 {offsets = [0, 0], sizes = [2, 64], strides = [1, 1]} : vector<2x256xf32> to vector<2x64xf32>
    %193 = arith.negf %192 : vector<2x64xf32>
    %194 = math.exp %193 : vector<2x64xf32>
    %cst_88 = arith.constant 1.000000e+00 : f32
    %195 = vector.broadcast %cst_88 : f32 to vector<2x64xf32>
    %196 = arith.addf %195, %194 : vector<2x64xf32>
    %197 = arith.divf %195, %196 : vector<2x64xf32>
    %198 = vector.extract_strided_slice %191 {offsets = [0, 64], sizes = [2, 64], strides = [1, 1]} : vector<2x256xf32> to vector<2x64xf32>
    %199 = arith.negf %198 : vector<2x64xf32>
    %200 = math.exp %199 : vector<2x64xf32>
    %cst_89 = arith.constant 1.000000e+00 : f32
    %201 = vector.broadcast %cst_89 : f32 to vector<2x64xf32>
    %202 = arith.addf %201, %200 : vector<2x64xf32>
    %203 = arith.divf %201, %202 : vector<2x64xf32>
    %204 = vector.extract_strided_slice %191 {offsets = [0, 128], sizes = [2, 64], strides = [1, 1]} : vector<2x256xf32> to vector<2x64xf32>
    %205 = math.tanh %204 : vector<2x64xf32>
    %206 = vector.extract_strided_slice %191 {offsets = [0, 192], sizes = [2, 64], strides = [1, 1]} : vector<2x256xf32> to vector<2x64xf32>
    %207 = arith.negf %206 : vector<2x64xf32>
    %208 = math.exp %207 : vector<2x64xf32>
    %cst_90 = arith.constant 1.000000e+00 : f32
    %209 = vector.broadcast %cst_90 : f32 to vector<2x64xf32>
    %210 = arith.addf %209, %208 : vector<2x64xf32>
    %211 = arith.divf %209, %210 : vector<2x64xf32>
    %212 = arith.mulf %203, %186 : vector<2x64xf32>
    %213 = arith.mulf %197, %205 : vector<2x64xf32>
    %214 = arith.addf %212, %213 : vector<2x64xf32>
    %215 = math.tanh %214 : vector<2x64xf32>
    %216 = arith.mulf %211, %215 : vector<2x64xf32>
    %c0_91 = arith.constant 0 : index
    %c0_92 = arith.constant 0 : index
    %217 = vector.load %arg8[%c0_91, %c0_92] : memref<2x64xf32, #tpu.memory_space<vmem>>, vector<2x64xf32>
    tpu.vector_store %arg8[%c0_91, %c0_92], %214 {strides = array<i32>} : memref<2x64xf32, #tpu.memory_space<vmem>>, vector<2x64xf32>,
    %c0_93 = arith.constant 0 : index
    %c0_94 = arith.constant 0 : index
    %218 = vector.load %arg7[%c0_93, %c0_94] : memref<2x64xf32, #tpu.memory_space<vmem>>, vector<2x64xf32>
    tpu.vector_store %arg7[%c0_93, %c0_94], %216 {strides = array<i32>} : memref<2x64xf32, #tpu.memory_space<vmem>>, vector<2x64xf32>,
    %219 = vector.extract_strided_slice %216 {offsets = [0, 0], sizes = [2, 32], strides = [1, 1]} : vector<2x64xf32> to vector<2x32xf32>
    %220 = arith.index_cast %c4_i32 : i32 to index
    %c0_95 = arith.constant 0 : index
    %c0_96 = arith.constant 0 : index
    %221 = vector.load %arg4[%220, %c0_95, %c0_96] : memref<8x2x32xf32, #tpu.memory_space<vmem>>, vector<1x2x32xf32>
    %222 = vector.shape_cast %221 : vector<1x2x32xf32> to vector<2x32xf32>
    %223 = vector.shape_cast %219 : vector<2x32xf32> to vector<1x2x32xf32>
    tpu.vector_store %arg4[%220, %c0_95, %c0_96], %223 {strides = array<i32>} : memref<8x2x32xf32, #tpu.memory_space<vmem>>, vector<1x2x32xf32>,
    %224 = vector.extract_strided_slice %216 {offsets = [0, 32], sizes = [2, 32], strides = [1, 1]} : vector<2x64xf32> to vector<2x32xf32>
    %c7_i32_97 = arith.constant 7 : i32
    %225 = arith.subi %c7_i32_97, %c4_i32 : i32
    %226 = arith.index_cast %225 : i32 to index
    %c0_98 = arith.constant 0 : index
    %c0_99 = arith.constant 0 : index
    %227 = vector.load %arg5[%226, %c0_98, %c0_99] : memref<8x2x32xf32, #tpu.memory_space<vmem>>, vector<1x2x32xf32>
    %228 = vector.shape_cast %227 : vector<1x2x32xf32> to vector<2x32xf32>
    %229 = vector.shape_cast %224 : vector<2x32xf32> to vector<1x2x32xf32>
    tpu.vector_store %arg5[%226, %c0_98, %c0_99], %229 {strides = array<i32>} : memref<8x2x32xf32, #tpu.memory_space<vmem>>, vector<1x2x32xf32>,
    %c5_i32 = arith.constant 5 : i32
    %c0_100 = arith.constant 0 : index
    %c0_101 = arith.constant 0 : index
    %230 = vector.load %arg7[%c0_100, %c0_101] : memref<2x64xf32, #tpu.memory_space<vmem>>, vector<2x64xf32>
    %c0_102 = arith.constant 0 : index
    %c0_103 = arith.constant 0 : index
    %231 = vector.load %arg8[%c0_102, %c0_103] : memref<2x64xf32, #tpu.memory_space<vmem>>, vector<2x64xf32>
    %232 = arith.index_cast %c5_i32 : i32 to index
    %c0_104 = arith.constant 0 : index
    %c0_105 = arith.constant 0 : index
    %233 = vector.load %arg0[%232, %c0_104, %c0_105] : memref<8x2x256xf32, #tpu.memory_space<vmem>>, vector<1x2x256xf32>
    %234 = vector.shape_cast %233 : vector<1x2x256xf32> to vector<2x256xf32>
    %cst_106 = arith.constant dense<0.000000e+00> : vector<2x256xf32>
    %235 = tpu.matmul %230, %4, %cst_106 {dimension_numbers = #tpu.dot_dimension_numbers<[1], [0], [0], [1], [0, 0, 1, 1], [], []>} : vector<2x64xf32>, vector<64x256xf32>, vector<2x256xf32> -> vector<2x256xf32>
    %236 = arith.addf %234, %235 : vector<2x256xf32>
    %237 = vector.extract_strided_slice %236 {offsets = [0, 0], sizes = [2, 64], strides = [1, 1]} : vector<2x256xf32> to vector<2x64xf32>
    %238 = arith.negf %237 : vector<2x64xf32>
    %239 = math.exp %238 : vector<2x64xf32>
    %cst_107 = arith.constant 1.000000e+00 : f32
    %240 = vector.broadcast %cst_107 : f32 to vector<2x64xf32>
    %241 = arith.addf %240, %239 : vector<2x64xf32>
    %242 = arith.divf %240, %241 : vector<2x64xf32>
    %243 = vector.extract_strided_slice %236 {offsets = [0, 64], sizes = [2, 64], strides = [1, 1]} : vector<2x256xf32> to vector<2x64xf32>
    %244 = arith.negf %243 : vector<2x64xf32>
    %245 = math.exp %244 : vector<2x64xf32>
    %cst_108 = arith.constant 1.000000e+00 : f32
    %246 = vector.broadcast %cst_108 : f32 to vector<2x64xf32>
    %247 = arith.addf %246, %245 : vector<2x64xf32>
    %248 = arith.divf %246, %247 : vector<2x64xf32>
    %249 = vector.extract_strided_slice %236 {offsets = [0, 128], sizes = [2, 64], strides = [1, 1]} : vector<2x256xf32> to vector<2x64xf32>
    %250 = math.tanh %249 : vector<2x64xf32>
    %251 = vector.extract_strided_slice %236 {offsets = [0, 192], sizes = [2, 64], strides = [1, 1]} : vector<2x256xf32> to vector<2x64xf32>
    %252 = arith.negf %251 : vector<2x64xf32>
    %253 = math.exp %252 : vector<2x64xf32>
    %cst_109 = arith.constant 1.000000e+00 : f32
    %254 = vector.broadcast %cst_109 : f32 to vector<2x64xf32>
    %255 = arith.addf %254, %253 : vector<2x64xf32>
    %256 = arith.divf %254, %255 : vector<2x64xf32>
    %257 = arith.mulf %248, %231 : vector<2x64xf32>
    %258 = arith.mulf %242, %250 : vector<2x64xf32>
    %259 = arith.addf %257, %258 : vector<2x64xf32>
    %260 = math.tanh %259 : vector<2x64xf32>
    %261 = arith.mulf %256, %260 : vector<2x64xf32>
    %c0_110 = arith.constant 0 : index
    %c0_111 = arith.constant 0 : index
    %262 = vector.load %arg8[%c0_110, %c0_111] : memref<2x64xf32, #tpu.memory_space<vmem>>, vector<2x64xf32>
    tpu.vector_store %arg8[%c0_110, %c0_111], %259 {strides = array<i32>} : memref<2x64xf32, #tpu.memory_space<vmem>>, vector<2x64xf32>,
    %c0_112 = arith.constant 0 : index
    %c0_113 = arith.constant 0 : index
    %263 = vector.load %arg7[%c0_112, %c0_113] : memref<2x64xf32, #tpu.memory_space<vmem>>, vector<2x64xf32>
    tpu.vector_store %arg7[%c0_112, %c0_113], %261 {strides = array<i32>} : memref<2x64xf32, #tpu.memory_space<vmem>>, vector<2x64xf32>,
    %264 = vector.extract_strided_slice %261 {offsets = [0, 0], sizes = [2, 32], strides = [1, 1]} : vector<2x64xf32> to vector<2x32xf32>
    %265 = arith.index_cast %c5_i32 : i32 to index
    %c0_114 = arith.constant 0 : index
    %c0_115 = arith.constant 0 : index
    %266 = vector.load %arg4[%265, %c0_114, %c0_115] : memref<8x2x32xf32, #tpu.memory_space<vmem>>, vector<1x2x32xf32>
    %267 = vector.shape_cast %266 : vector<1x2x32xf32> to vector<2x32xf32>
    %268 = vector.shape_cast %264 : vector<2x32xf32> to vector<1x2x32xf32>
    tpu.vector_store %arg4[%265, %c0_114, %c0_115], %268 {strides = array<i32>} : memref<8x2x32xf32, #tpu.memory_space<vmem>>, vector<1x2x32xf32>,
    %269 = vector.extract_strided_slice %261 {offsets = [0, 32], sizes = [2, 32], strides = [1, 1]} : vector<2x64xf32> to vector<2x32xf32>
    %c7_i32_116 = arith.constant 7 : i32
    %270 = arith.subi %c7_i32_116, %c5_i32 : i32
    %271 = arith.index_cast %270 : i32 to index
    %c0_117 = arith.constant 0 : index
    %c0_118 = arith.constant 0 : index
    %272 = vector.load %arg5[%271, %c0_117, %c0_118] : memref<8x2x32xf32, #tpu.memory_space<vmem>>, vector<1x2x32xf32>
    %273 = vector.shape_cast %272 : vector<1x2x32xf32> to vector<2x32xf32>
    %274 = vector.shape_cast %269 : vector<2x32xf32> to vector<1x2x32xf32>
    tpu.vector_store %arg5[%271, %c0_117, %c0_118], %274 {strides = array<i32>} : memref<8x2x32xf32, #tpu.memory_space<vmem>>, vector<1x2x32xf32>,
    %c6_i32 = arith.constant 6 : i32
    %c0_119 = arith.constant 0 : index
    %c0_120 = arith.constant 0 : index
    %275 = vector.load %arg7[%c0_119, %c0_120] : memref<2x64xf32, #tpu.memory_space<vmem>>, vector<2x64xf32>
    %c0_121 = arith.constant 0 : index
    %c0_122 = arith.constant 0 : index
    %276 = vector.load %arg8[%c0_121, %c0_122] : memref<2x64xf32, #tpu.memory_space<vmem>>, vector<2x64xf32>
    %277 = arith.index_cast %c6_i32 : i32 to index
    %c0_123 = arith.constant 0 : index
    %c0_124 = arith.constant 0 : index
    %278 = vector.load %arg0[%277, %c0_123, %c0_124] : memref<8x2x256xf32, #tpu.memory_space<vmem>>, vector<1x2x256xf32>
    %279 = vector.shape_cast %278 : vector<1x2x256xf32> to vector<2x256xf32>
    %cst_125 = arith.constant dense<0.000000e+00> : vector<2x256xf32>
    %280 = tpu.matmul %275, %4, %cst_125 {dimension_numbers = #tpu.dot_dimension_numbers<[1], [0], [0], [1], [0, 0, 1, 1], [], []>} : vector<2x64xf32>, vector<64x256xf32>, vector<2x256xf32> -> vector<2x256xf32>
    %281 = arith.addf %279, %280 : vector<2x256xf32>
    %282 = vector.extract_strided_slice %281 {offsets = [0, 0], sizes = [2, 64], strides = [1, 1]} : vector<2x256xf32> to vector<2x64xf32>
    %283 = arith.negf %282 : vector<2x64xf32>
    %284 = math.exp %283 : vector<2x64xf32>
    %cst_126 = arith.constant 1.000000e+00 : f32
    %285 = vector.broadcast %cst_126 : f32 to vector<2x64xf32>
    %286 = arith.addf %285, %284 : vector<2x64xf32>
    %287 = arith.divf %285, %286 : vector<2x64xf32>
    %288 = vector.extract_strided_slice %281 {offsets = [0, 64], sizes = [2, 64], strides = [1, 1]} : vector<2x256xf32> to vector<2x64xf32>
    %289 = arith.negf %288 : vector<2x64xf32>
    %290 = math.exp %289 : vector<2x64xf32>
    %cst_127 = arith.constant 1.000000e+00 : f32
    %291 = vector.broadcast %cst_127 : f32 to vector<2x64xf32>
    %292 = arith.addf %291, %290 : vector<2x64xf32>
    %293 = arith.divf %291, %292 : vector<2x64xf32>
    %294 = vector.extract_strided_slice %281 {offsets = [0, 128], sizes = [2, 64], strides = [1, 1]} : vector<2x256xf32> to vector<2x64xf32>
    %295 = math.tanh %294 : vector<2x64xf32>
    %296 = vector.extract_strided_slice %281 {offsets = [0, 192], sizes = [2, 64], strides = [1, 1]} : vector<2x256xf32> to vector<2x64xf32>
    %297 = arith.negf %296 : vector<2x64xf32>
    %298 = math.exp %297 : vector<2x64xf32>
    %cst_128 = arith.constant 1.000000e+00 : f32
    %299 = vector.broadcast %cst_128 : f32 to vector<2x64xf32>
    %300 = arith.addf %299, %298 : vector<2x64xf32>
    %301 = arith.divf %299, %300 : vector<2x64xf32>
    %302 = arith.mulf %293, %276 : vector<2x64xf32>
    %303 = arith.mulf %287, %295 : vector<2x64xf32>
    %304 = arith.addf %302, %303 : vector<2x64xf32>
    %305 = math.tanh %304 : vector<2x64xf32>
    %306 = arith.mulf %301, %305 : vector<2x64xf32>
    %c0_129 = arith.constant 0 : index
    %c0_130 = arith.constant 0 : index
    %307 = vector.load %arg8[%c0_129, %c0_130] : memref<2x64xf32, #tpu.memory_space<vmem>>, vector<2x64xf32>
    tpu.vector_store %arg8[%c0_129, %c0_130], %304 {strides = array<i32>} : memref<2x64xf32, #tpu.memory_space<vmem>>, vector<2x64xf32>,
    %c0_131 = arith.constant 0 : index
    %c0_132 = arith.constant 0 : index
    %308 = vector.load %arg7[%c0_131, %c0_132] : memref<2x64xf32, #tpu.memory_space<vmem>>, vector<2x64xf32>
    tpu.vector_store %arg7[%c0_131, %c0_132], %306 {strides = array<i32>} : memref<2x64xf32, #tpu.memory_space<vmem>>, vector<2x64xf32>,
    %309 = vector.extract_strided_slice %306 {offsets = [0, 0], sizes = [2, 32], strides = [1, 1]} : vector<2x64xf32> to vector<2x32xf32>
    %310 = arith.index_cast %c6_i32 : i32 to index
    %c0_133 = arith.constant 0 : index
    %c0_134 = arith.constant 0 : index
    %311 = vector.load %arg4[%310, %c0_133, %c0_134] : memref<8x2x32xf32, #tpu.memory_space<vmem>>, vector<1x2x32xf32>
    %312 = vector.shape_cast %311 : vector<1x2x32xf32> to vector<2x32xf32>
    %313 = vector.shape_cast %309 : vector<2x32xf32> to vector<1x2x32xf32>
    tpu.vector_store %arg4[%310, %c0_133, %c0_134], %313 {strides = array<i32>} : memref<8x2x32xf32, #tpu.memory_space<vmem>>, vector<1x2x32xf32>,
    %314 = vector.extract_strided_slice %306 {offsets = [0, 32], sizes = [2, 32], strides = [1, 1]} : vector<2x64xf32> to vector<2x32xf32>
    %c7_i32_135 = arith.constant 7 : i32
    %315 = arith.subi %c7_i32_135, %c6_i32 : i32
    %316 = arith.index_cast %315 : i32 to index
    %c0_136 = arith.constant 0 : index
    %c0_137 = arith.constant 0 : index
    %317 = vector.load %arg5[%316, %c0_136, %c0_137] : memref<8x2x32xf32, #tpu.memory_space<vmem>>, vector<1x2x32xf32>
    %318 = vector.shape_cast %317 : vector<1x2x32xf32> to vector<2x32xf32>
    %319 = vector.shape_cast %314 : vector<2x32xf32> to vector<1x2x32xf32>
    tpu.vector_store %arg5[%316, %c0_136, %c0_137], %319 {strides = array<i32>} : memref<8x2x32xf32, #tpu.memory_space<vmem>>, vector<1x2x32xf32>,
    %c7_i32_138 = arith.constant 7 : i32
    %c0_139 = arith.constant 0 : index
    %c0_140 = arith.constant 0 : index
    %320 = vector.load %arg7[%c0_139, %c0_140] : memref<2x64xf32, #tpu.memory_space<vmem>>, vector<2x64xf32>
    %c0_141 = arith.constant 0 : index
    %c0_142 = arith.constant 0 : index
    %321 = vector.load %arg8[%c0_141, %c0_142] : memref<2x64xf32, #tpu.memory_space<vmem>>, vector<2x64xf32>
    %322 = arith.index_cast %c7_i32_138 : i32 to index
    %c0_143 = arith.constant 0 : index
    %c0_144 = arith.constant 0 : index
    %323 = vector.load %arg0[%322, %c0_143, %c0_144] : memref<8x2x256xf32, #tpu.memory_space<vmem>>, vector<1x2x256xf32>
    %324 = vector.shape_cast %323 : vector<1x2x256xf32> to vector<2x256xf32>
    %cst_145 = arith.constant dense<0.000000e+00> : vector<2x256xf32>
    %325 = tpu.matmul %320, %4, %cst_145 {dimension_numbers = #tpu.dot_dimension_numbers<[1], [0], [0], [1], [0, 0, 1, 1], [], []>} : vector<2x64xf32>, vector<64x256xf32>, vector<2x256xf32> -> vector<2x256xf32>
    %326 = arith.addf %324, %325 : vector<2x256xf32>
    %327 = vector.extract_strided_slice %326 {offsets = [0, 0], sizes = [2, 64], strides = [1, 1]} : vector<2x256xf32> to vector<2x64xf32>
    %328 = arith.negf %327 : vector<2x64xf32>
    %329 = math.exp %328 : vector<2x64xf32>
    %cst_146 = arith.constant 1.000000e+00 : f32
    %330 = vector.broadcast %cst_146 : f32 to vector<2x64xf32>
    %331 = arith.addf %330, %329 : vector<2x64xf32>
    %332 = arith.divf %330, %331 : vector<2x64xf32>
    %333 = vector.extract_strided_slice %326 {offsets = [0, 64], sizes = [2, 64], strides = [1, 1]} : vector<2x256xf32> to vector<2x64xf32>
    %334 = arith.negf %333 : vector<2x64xf32>
    %335 = math.exp %334 : vector<2x64xf32>
    %cst_147 = arith.constant 1.000000e+00 : f32
    %336 = vector.broadcast %cst_147 : f32 to vector<2x64xf32>
    %337 = arith.addf %336, %335 : vector<2x64xf32>
    %338 = arith.divf %336, %337 : vector<2x64xf32>
    %339 = vector.extract_strided_slice %326 {offsets = [0, 128], sizes = [2, 64], strides = [1, 1]} : vector<2x256xf32> to vector<2x64xf32>
    %340 = math.tanh %339 : vector<2x64xf32>
    %341 = vector.extract_strided_slice %326 {offsets = [0, 192], sizes = [2, 64], strides = [1, 1]} : vector<2x256xf32> to vector<2x64xf32>
    %342 = arith.negf %341 : vector<2x64xf32>
    %343 = math.exp %342 : vector<2x64xf32>
    %cst_148 = arith.constant 1.000000e+00 : f32
    %344 = vector.broadcast %cst_148 : f32 to vector<2x64xf32>
    %345 = arith.addf %344, %343 : vector<2x64xf32>
    %346 = arith.divf %344, %345 : vector<2x64xf32>
    %347 = arith.mulf %338, %321 : vector<2x64xf32>
    %348 = arith.mulf %332, %340 : vector<2x64xf32>
    %349 = arith.addf %347, %348 : vector<2x64xf32>
    %350 = math.tanh %349 : vector<2x64xf32>
    %351 = arith.mulf %346, %350 : vector<2x64xf32>
    %c0_149 = arith.constant 0 : index
    %c0_150 = arith.constant 0 : index
    %352 = vector.load %arg8[%c0_149, %c0_150] : memref<2x64xf32, #tpu.memory_space<vmem>>, vector<2x64xf32>
    tpu.vector_store %arg8[%c0_149, %c0_150], %349 {strides = array<i32>} : memref<2x64xf32, #tpu.memory_space<vmem>>, vector<2x64xf32>,
    %c0_151 = arith.constant 0 : index
    %c0_152 = arith.constant 0 : index
    %353 = vector.load %arg7[%c0_151, %c0_152] : memref<2x64xf32, #tpu.memory_space<vmem>>, vector<2x64xf32>
    tpu.vector_store %arg7[%c0_151, %c0_152], %351 {strides = array<i32>} : memref<2x64xf32, #tpu.memory_space<vmem>>, vector<2x64xf32>,
    %354 = vector.extract_strided_slice %351 {offsets = [0, 0], sizes = [2, 32], strides = [1, 1]} : vector<2x64xf32> to vector<2x32xf32>
    %355 = arith.index_cast %c7_i32_138 : i32 to index
    %c0_153 = arith.constant 0 : index
    %c0_154 = arith.constant 0 : index
    %356 = vector.load %arg4[%355, %c0_153, %c0_154] : memref<8x2x32xf32, #tpu.memory_space<vmem>>, vector<1x2x32xf32>
    %357 = vector.shape_cast %356 : vector<1x2x32xf32> to vector<2x32xf32>
    %358 = vector.shape_cast %354 : vector<2x32xf32> to vector<1x2x32xf32>
    tpu.vector_store %arg4[%355, %c0_153, %c0_154], %358 {strides = array<i32>} : memref<8x2x32xf32, #tpu.memory_space<vmem>>, vector<1x2x32xf32>,
    %359 = vector.extract_strided_slice %351 {offsets = [0, 32], sizes = [2, 32], strides = [1, 1]} : vector<2x64xf32> to vector<2x32xf32>
    %c7_i32_155 = arith.constant 7 : i32
    %360 = arith.subi %c7_i32_155, %c7_i32_138 : i32
    %361 = arith.index_cast %360 : i32 to index
    %c0_156 = arith.constant 0 : index
    %c0_157 = arith.constant 0 : index
    %362 = vector.load %arg5[%361, %c0_156, %c0_157] : memref<8x2x32xf32, #tpu.memory_space<vmem>>, vector<1x2x32xf32>
    %363 = vector.shape_cast %362 : vector<1x2x32xf32> to vector<2x32xf32>
    %364 = vector.shape_cast %359 : vector<2x32xf32> to vector<1x2x32xf32>
    tpu.vector_store %arg5[%361, %c0_156, %c0_157], %364 {strides = array<i32>} : memref<8x2x32xf32, #tpu.memory_space<vmem>>, vector<1x2x32xf32>,
    %c8_i32 = arith.constant 8 : i32
    %c7 = arith.constant 7 : index
    %c0_158 = arith.constant 0 : index
    %c0_159 = arith.constant 0 : index
    %365 = vector.load %arg4[%c7, %c0_158, %c0_159] : memref<8x2x32xf32, #tpu.memory_space<vmem>>, vector<1x2x32xf32>
    %366 = vector.shape_cast %365 : vector<1x2x32xf32> to vector<2x32xf32>
    %c7_160 = arith.constant 7 : index
    %c0_161 = arith.constant 0 : index
    %c0_162 = arith.constant 0 : index
    %367 = vector.load %arg5[%c7_160, %c0_161, %c0_162] : memref<8x2x32xf32, #tpu.memory_space<vmem>>, vector<1x2x32xf32>
    %368 = vector.shape_cast %367 : vector<1x2x32xf32> to vector<2x32xf32>
    %369 = tpu.concatenate %366, %368 in 1 : vector<2x32xf32>, vector<2x32xf32> -> vector<2x64xf32>
    %c0_163 = arith.constant 0 : index
    %c0_164 = arith.constant 0 : index
    %370 = vector.load %arg2[%c0_163, %c0_164] : memref<64x5xf32, #tpu.memory_space<vmem>>, vector<64x5xf32>
    %cst_165 = arith.constant dense<0.000000e+00> : vector<2x5xf32>
    %371 = tpu.matmul %369, %370, %cst_165 {dimension_numbers = #tpu.dot_dimension_numbers<[1], [0], [0], [1], [0, 0, 1, 1], [], []>} : vector<2x64xf32>, vector<64x5xf32>, vector<2x5xf32> -> vector<2x5xf32>
    %c0_166 = arith.constant 0 : index
    %c0_167 = arith.constant 0 : index
    %372 = vector.load %arg3[%c0_166, %c0_167] : memref<1x5xf32, #tpu.memory_space<vmem>>, vector<1x5xf32>
    %373 = vector.broadcast %372 : vector<1x5xf32> to vector<2x5xf32>
    %374 = arith.addf %371, %373 : vector<2x5xf32>
    %c0_168 = arith.constant 0 : index
    %c0_169 = arith.constant 0 : index
    %375 = vector.load %arg6[%c0_168, %c0_169] : memref<2x5xf32, #tpu.memory_space<vmem>>, vector<2x5xf32>
    tpu.vector_store %arg6[%c0_168, %c0_169], %374 {strides = array<i32>} : memref<2x5xf32, #tpu.memory_space<vmem>>, vector<2x5xf32>,
    return
  }
}

</mosaic_0001>

<bundles_post_ra>
// kernel: bilstm_forward.3
= control target key start
LH: loop header
LB: loop body
LE: loop exit
PB: predicated region body
PF: predicated region fallthrough
CT: control target
= control target key end

     0   :  { %12 = vsyncpa [#allocation5], 0  ;;  %vm22_vm0 = vcmask 517120   ;;  %v1865_v7 = vmov 0.0   ;;  %s2289_s0 = inlined_call_operand.vmem [shape: f32[8,2,256], index: 0, kind: input, shape index: {}]   ;;  %s2290_s1 = inlined_call_operand.vmem [shape: f32[64,256], index: 1, kind: input, shape index: {}]   ;;  %s2291_s2 = inlined_call_operand.vmem [shape: f32[64,5], index: 2, kind: input, shape index: {}]   ;;  %s2292_s3 = inlined_call_operand.vmem [shape: f32[1,5], index: 3, kind: input, shape index: {}]   ;;  %s2293_s4 = inlined_call_operand.hbm [shape: f32[8,2,32], index: 4, kind: output, shape index: {0}]   ;;  %s2294_s5 = inlined_call_operand.hbm [shape: f32[8,2,32], index: 5, kind: output, shape index: {1}]   ;;  %s2295_s6 = inlined_call_operand.hbm [shape: f32[2,5], index: 6, kind: output, shape index: {2}]  }
   0x1   :  { %v26_v0 = vld [vmem:[%s2290_s1 + $0x8] sm:$0xff]  ;;  %v28_v1 = vld [vmem:[%s2290_s1 + $0x18] sm:$0xff]  ;;  %v25_v2 = vld [vmem:[%s2290_s1] sm:$0xff]  ;;  %112 = vmatprep.mubr.f32.mxu0 %v1865_v7  ;;  %23 = vst.msk [vmem:[#allocation2] sm:$0x3] %vm22_vm0, %v1865_v7  ;;  %274 = vmatprep.mubr.f32.mxu1 %v1865_v7 }
   0x2   :  { %v1920_v3 = vpack.c.bf16 %v28_v1, %v26_v0  ;;  %v27_v4 = vld [vmem:[%s2290_s1 + $0x10] sm:$0xff]  ;;  %v30_v5 = vld [vmem:[%s2290_s1 + $0x28] sm:$0xff]  ;;  %v32_v6 = vld [vmem:[%s2290_s1 + $0x38] sm:$0xff]  ;;  %24 = vst.msk [vmem:[#allocation3] sm:$0x3] %vm22_vm0, %v1865_v7 }
   0x3   :  { %v1937_v8 = vpack.c.bf16 %v27_v4, %v25_v2  ;;  %v1939_v9 = vpack.c.bf16 %v32_v6, %v30_v5  ;;  %v29_v10 = vld [vmem:[%s2290_s1 + $0x20] sm:$0xff]  ;;  %v31_v11 = vld [vmem:[%s2290_s1 + $0x30] sm:$0xff]  ;;  %v34_v12 = vld [vmem:[%s2290_s1 + $0x48] sm:$0xff] }
   0x4   :  { %1549 = vmatprep.subr.bf16.mxu0 %v1920_v3  ;;  %v36_v13 = vld [vmem:[%s2290_s1 + $0x58] sm:$0xff]  ;;  %1565 = vmatprep.subr.bf16.mxu1 %v1920_v3  ;;  %v1956_v14 = vpack.c.bf16 %v31_v11, %v29_v10  ;;  %v33_v16 = vld [vmem:[%s2290_s1 + $0x40] sm:$0xff]  ;;  %v35_v17 = vld [vmem:[%s2290_s1 + $0x50] sm:$0xff] }
   0x5   :  { %1551 = vmatpush1.bf16.msra.mxu0 %v1937_v8  ;;  %1567 = vmatpush1.bf16.msra.mxu1 %v1937_v8  ;;  %v1960_v15 = vpack.c.bf16 %v36_v13, %v34_v12 }
   0x6   :  { %1553 = vmatprep.subr.bf16.mxu0 %v1939_v9  ;;  %1569 = vmatprep.subr.bf16.mxu1 %v1939_v9 }
   0x7   :  { %13 = vsyncpa [#allocation7], 0  ;;  %v38_v18 = vld [vmem:[%s2290_s1 + $0x68] sm:$0xff]  ;;  %v40_v19 = vld [vmem:[%s2290_s1 + $0x78] sm:$0xff]  ;;  %v1976_v20 = vpack.c.bf16 %v35_v17, %v33_v16  ;;  %s1866_s29 = smov 64   ;;  %vm44_vm1 = vcmask 523264   ;;  %v125_v29 = vlaneseq }
   0x8   :  { %v1980_v22 = vpack.c.bf16 %v40_v19, %v38_v18  ;;  %v37_v23 = vld [vmem:[%s2290_s1 + $0x60] sm:$0xff]  ;;  %v39_v24 = vld [vmem:[%s2290_s1 + $0x70] sm:$0xff]  ;;  %v1867_v27 = vmov 1983009808   ;;  %vm188_vm2 = vcmask 254976   ;;  %s1868_s19 = smov 96  }
   0x9   :  { %1555 = vmatpush1.bf16.msra.mxu0 %v1956_v14  ;;  %v1482_v21 = vld.sshfl [vmem:[#allocation3] sm:$0x3 pattern:$0x76325410]  ;;  %1571 = vmatpush1.bf16.msra.mxu1 %v1956_v14  ;;  %v1991_v25 = vpack.c.bf16 %v39_v24, %v37_v23  ;;  %v41_v26 = vld [vmem:[#allocation2] sm:$0x3]  ;;  %v123_v28 = vunpack.c.l.s4 %v1867_v27 }
   0xa   :  { %1557 = vmatprep.subr.bf16.mxu0 %v1960_v15  ;;  %159 = vrot.lane.b32.xlu0 %v1482_v21, %s1866_s29  ;;  %v126_v31 = vshrl.u32 %v125_v29, 7  ;;  %v43_v36 = vld [vmem:[%s2289_s0] sm:$0xf]  ;;  %v1483_v2 = vld [vmem:[%s2289_s0 + $0x4] sm:$0xf]  ;;  %s1869_s22 = smov 32  }
   0xb   :  { %1573 = vmatprep.subr.bf16.mxu1 %v1960_v15  ;;  %v124_v30 = vunpack.c.0.s8 %v123_v28  ;;  %vm1871_vm3 = vmmov 0   ;;  %vm1342_vm4 = vcmask 261120  }
   0xd   :  { %1559 = vmatpush1.bf16.msra.mxu0 %v1976_v20  ;;  %1575 = vmatpush1.bf16.msra.mxu1 %v1976_v20  ;;  %v2010_v33 = vsub.s32 %v124_v30, %v126_v31 }
   0xe   :  { %1561 = vmatprep.subr.bf16.mxu0 %v1980_v22  ;;  %1577 = vmatprep.subr.bf16.mxu1 %v1980_v22 }
  0x11   :  { %1563 = vmatpush1.bf16.msra.mxu0 %v1991_v25  ;;  %1579 = vmatpush1.bf16.msra.mxu1 %v1991_v25 }
  0x12   :  { %1581 = vmatprep.subr.bf16.mxu0 %v1920_v3  ;;  %1597 = vmatprep.subr.bf16.mxu1 %v1920_v3 }
  0x14   :  { %1479 = vmatmul.mubr.msk.f32.vlgmr.msra.gmra.mrb[0].mxu0 %vm44_vm1, %v41_v26 }
  0x15   :  { %1583 = vmatpush1.bf16.msra.mxu0 %v1937_v8  ;;  %436 = vmatprep.mubr.f32.mxu0 %v1865_v7 }
  0x16   :  { %1585 = vmatprep.subr.bf16.mxu0 %v1939_v9 }
  0x19   :  { %1587 = vmatpush1.bf16.msra.mxu0 %v1956_v14 }
  0x1a   :  { %1589 = vmatprep.subr.bf16.mxu0 %v1960_v15 }
  0x1d   :  { %1591 = vmatpush1.bf16.msra.mxu0 %v1976_v20 }
  0x1e   :  { %1593 = vmatprep.subr.bf16.mxu0 %v1980_v22 }
  0x21   :  { %1595 = vmatpush1.bf16.msra.mxu0 %v1991_v25 }
  0x22   :  { %1613 = vmatprep.subr.bf16.mxu0 %v1920_v3 }
  0x7c   :  { %v160_v46 = vpop.permute.xlu0 %159 }
  0xe7   :  { %v114_v32 = vpop.f32.mrb[0].mxu0 }
  0xe8   :  { %v116_v34 = vpop.f32.mrb[1].mxu0 }
  0xe9   :  { %v121_v35 = vcombine.low %v114_v32, %v116_v34 }
  0xeb   :  { %v128_v37 = vrot.slane %v121_v35, %v2010_v33 }
  0xed   :  { %v130_v38 = vadd.f32 %v128_v37, %v43_v36 }
  0xef   :  { %141 = vrot.lane.b32.xlu1 %v130_v38, %s1866_s29  ;;  %v1480_v39 = vmul.f32 -1.442695, %v130_v38  ;;  %v138_v40 = vrot.slane %v130_v38, 2 }
  0xf1   :  { %1699 = vpow2.f32 %v1480_v39 }
  0xf2   :  { %1701 = vtanh.f32 %v138_v40 }
  0xfb   :  { %v1700_v41 = vpop.eup %1699 }
  0xfc   :  { %v134_v42 = vadd.f32 1.0, %v1700_v41  ;;  %v1702_v43 = vpop.eup %1701 }
  0xfe   :  { %1703 = vrcp.f32 %v134_v42  ;;  %v1488_v42 = vld [vmem:[%s2289_s0 + $0x8] sm:$0xf] }
 0x108   :  { %v1704_v44 = vpop.eup %1703 }
 0x109   :  { %v163_v45 = vmul.f32 %v1704_v44, %v1702_v43  ;;  %v162_v47 = vmul.f32 %v1704_v44, %v160_v46 }
 0x10b   :  { %165 = vrot.lane.b32.xlu0 %v163_v45, %s1866_s29 }
 0x161   :  { %v142_v52 = vpop.permute.xlu1 %141 }
 0x162   :  { %v143_v53 = vrot.slane %v142_v52, 2 }
 0x164   :  { %v1481_v54 = vmul.f32 -1.442695, %v143_v53 }
 0x17d   :  { %v166_v48 = vpop.permute.xlu0 %165 }
 0x17e   :  { %v168_v49 = vadd.f32 %v166_v48, %v162_v47 }
 0x180   :  { %1705 = vtanh.f32 %v168_v49  ;;  %v182_v50 = vrot.slane %v168_v49, %v2010_v33 }
 0x181   :  { %1707 = vpow2.f32 %v1481_v54 }
 0x182   :  { %183 = vrot.lane.b32.xlu0 %v182_v50, %s1866_s29 }
 0x18a   :  { %v1706_v51 = vpop.eup %1705 }
 0x18b   :  { %171 = vrot.lane.b32.xlu1 %v1706_v51, %s1866_s29  ;;  %v1708_v55 = vpop.eup %1707 }
 0x18c   :  { %v148_v56 = vadd.f32 1.0, %v1708_v55 }
 0x18e   :  { %1709 = vrcp.f32 %v148_v56 }
 0x198   :  { %v1710_v59 = vpop.eup %1709 }
 0x1f4   :  { %v184_v57 = vpop.permute.xlu0 %183 }
 0x1f5   :  { %186 = vst.msk [vmem:[#allocation3] sm:$0x3] %vm22_vm0, %v184_v57 }
 0x1fc   :  { %v1487_v58 = vld.sshfl [vmem:[#allocation3] sm:$0x3 pattern:$0x76325410] }
 0x1fd   :  { %321 = vrot.lane.b32.xlu1 %v1487_v58, %s1866_s29  ;;  %v172_v60 = vpop.permute.xlu1 %171 }
 0x1fe   :  { %v2023_v61 = vmul.f32 %v1710_v59, %v172_v60 }
 0x200   :  { %187 = vst.msk [vmem:[#allocation2] sm:$0x3] %vm22_vm0, %v2023_v61 }
 0x201   :  { %189 = vst.msk [vmem:[#allocation4] sm:$0x3] %vm188_vm2, %v2023_v61 }
 0x207   :  { %v203_v62 = vld [vmem:[#allocation2] sm:$0x3] }
 0x208   :  { %1484 = vmatmul.mubr.msk.f32.vlgmr.msra.gmra.mrb[0].mxu1 %vm44_vm1, %v203_v62 }
 0x209   :  { %1599 = vmatpush1.bf16.msra.mxu1 %v1937_v8  ;;  %598 = vmatprep.mubr.f32.mxu1 %v1865_v7 }
 0x20a   :  { %1601 = vmatprep.subr.bf16.mxu1 %v1939_v9 }
 0x20d   :  { %1603 = vmatpush1.bf16.msra.mxu1 %v1956_v14 }
 0x20e   :  { %1605 = vmatprep.subr.bf16.mxu1 %v1960_v15 }
 0x211   :  { %1607 = vmatpush1.bf16.msra.mxu1 %v1976_v20 }
 0x212   :  { %1609 = vmatprep.subr.bf16.mxu1 %v1980_v22 }
 0x215   :  { %1611 = vmatpush1.bf16.msra.mxu1 %v1991_v25 }
 0x216   :  { %1629 = vmatprep.subr.bf16.mxu1 %v1920_v3 }
 0x26f   :  { %v322_v18 = vpop.permute.xlu1 %321 }
 0x2db   :  { %v276_v63 = vpop.f32.mrb[0].mxu1 }
 0x2dc   :  { %v278_v0 = vpop.f32.mrb[1].mxu1 }
 0x2dd   :  { %v283_v1 = vcombine.low %v276_v63, %v278_v0 }
 0x2df   :  { %v290_v4 = vrot.slane %v283_v1, %v2010_v33 }
 0x2e1   :  { %v292_v5 = vadd.f32 %v1483_v2, %v290_v4 }
 0x2e3   :  { %303 = vrot.lane.b32.xlu1 %v292_v5, %s1866_s29  ;;  %v1485_v6 = vmul.f32 -1.442695, %v292_v5  ;;  %v300_v10 = vrot.slane %v292_v5, 2 }
 0x2e5   :  { %1711 = vpow2.f32 %v1485_v6 }
 0x2e6   :  { %1713 = vtanh.f32 %v300_v10 }
 0x2ef   :  { %v1712_v11 = vpop.eup %1711 }
 0x2f0   :  { %v296_v12 = vadd.f32 1.0, %v1712_v11  ;;  %v1714_v13 = vpop.eup %1713 }
 0x2f2   :  { %1715 = vrcp.f32 %v296_v12 }
 0x2fc   :  { %v1716_v16 = vpop.eup %1715 }
 0x2fd   :  { %v325_v17 = vmul.f32 %v1716_v16, %v1714_v13  ;;  %v324_v19 = vmul.f32 %v1716_v16, %v322_v18  ;;  %v1493_v13 = vld [vmem:[%s2289_s0 + $0xc] sm:$0xf] }
 0x2ff   :  { %327 = vrot.lane.b32.xlu0 %v325_v17, %s1866_s29 }
 0x355   :  { %v304_v27 = vpop.permute.xlu1 %303 }
 0x356   :  { %v305_v28 = vrot.slane %v304_v27, 2 }
 0x358   :  { %v1486_v29 = vmul.f32 -1.442695, %v305_v28 }
 0x371   :  { %v328_v21 = vpop.permute.xlu0 %327 }
 0x372   :  { %v330_v23 = vadd.f32 %v328_v21, %v324_v19 }
 0x374   :  { %1717 = vtanh.f32 %v330_v23  ;;  %v344_v24 = vrot.slane %v330_v23, %v2010_v33 }
 0x375   :  { %1719 = vpow2.f32 %v1486_v29 }
 0x376   :  { %345 = vrot.lane.b32.xlu1 %v344_v24, %s1866_s29 }
 0x37e   :  { %v1718_v26 = vpop.eup %1717 }
 0x37f   :  { %333 = vrot.lane.b32.xlu0 %v1718_v26, %s1866_s29  ;;  %v1720_v30 = vpop.eup %1719 }
 0x380   :  { %v310_v31 = vadd.f32 1.0, %v1720_v30 }
 0x382   :  { %1721 = vrcp.f32 %v310_v31 }
 0x38c   :  { %v1722_v35 = vpop.eup %1721 }
 0x3e8   :  { %v346_v32 = vpop.permute.xlu1 %345 }
 0x3e9   :  { %348 = vst.msk [vmem:[#allocation3] sm:$0x3] %vm22_vm0, %v346_v32 }
 0x3f0   :  { %v1492_v34 = vld.sshfl [vmem:[#allocation3] sm:$0x3 pattern:$0x76325410] }
 0x3f1   :  { %v334_v36 = vpop.permute.xlu0 %333  ;;  %483 = vrot.lane.b32.xlu0 %v1492_v34, %s1866_s29 }
 0x3f2   :  { %v2050_v37 = vmul.f32 %v1722_v35, %v334_v36 }
 0x3f4   :  { %349 = vst.msk [vmem:[#allocation2] sm:$0x3] %vm22_vm0, %v2050_v37 }
 0x3f5   :  { %351 = vst.msk [vmem:[#allocation4 + $0x2] sm:$0x3] %vm188_vm2, %v2050_v37 }
 0x3fb   :  { %v365_v38 = vld [vmem:[#allocation2] sm:$0x3] }
 0x3fc   :  { %1489 = vmatmul.mubr.msk.f32.vlgmr.msra.gmra.mrb[2].mxu0 %vm44_vm1, %v365_v38 }
 0x3fd   :  { %1615 = vmatpush1.bf16.msra.mxu0 %v1937_v8  ;;  %760 = vmatprep.mubr.f32.mxu0 %v1865_v7 }
 0x3fe   :  { %1617 = vmatprep.subr.bf16.mxu0 %v1939_v9 }
 0x401   :  { %1619 = vmatpush1.bf16.msra.mxu0 %v1956_v14 }
 0x402   :  { %1621 = vmatprep.subr.bf16.mxu0 %v1960_v15 }
 0x405   :  { %1623 = vmatpush1.bf16.msra.mxu0 %v1976_v20 }
 0x406   :  { %1625 = vmatprep.subr.bf16.mxu0 %v1980_v22 }
 0x409   :  { %1627 = vmatpush1.bf16.msra.mxu0 %v1991_v25 }
 0x40a   :  { %1645 = vmatprep.subr.bf16.mxu0 %v1920_v3 }
 0x463   :  { %v484_v52 = vpop.permute.xlu0 %483 }
 0x4cf   :  { %v438_v39 = vpop.f32.mrb[2].mxu0 }
 0x4d0   :  { %v440_v40 = vpop.f32.mrb[3].mxu0 }
 0x4d1   :  { %v445_v41 = vcombine.low %v438_v39, %v440_v40 }
 0x4d3   :  { %v452_v43 = vrot.slane %v445_v41, %v2010_v33 }
 0x4d5   :  { %v454_v44 = vadd.f32 %v1488_v42, %v452_v43 }
 0x4d7   :  { %v1490_v45 = vmul.f32 -1.442695, %v454_v44  ;;  %465 = vrot.lane.b32.xlu0 %v454_v44, %s1866_s29  ;;  %v462_v46 = vrot.slane %v454_v44, 2 }
 0x4d9   :  { %1723 = vpow2.f32 %v1490_v45 }
 0x4da   :  { %1725 = vtanh.f32 %v462_v46 }
 0x4e3   :  { %v1724_v47 = vpop.eup %1723 }
 0x4e4   :  { %v458_v48 = vadd.f32 1.0, %v1724_v47  ;;  %v1726_v49 = vpop.eup %1725 }
 0x4e6   :  { %1727 = vrcp.f32 %v458_v48 }
 0x4f0   :  { %v1728_v50 = vpop.eup %1727 }
 0x4f1   :  { %v487_v51 = vmul.f32 %v1728_v50, %v1726_v49  ;;  %v486_v53 = vmul.f32 %v1728_v50, %v484_v52  ;;  %v1498_v49 = vld [vmem:[%s2289_s0 + $0x10] sm:$0xf] }
 0x4f3   :  { %489 = vrot.lane.b32.xlu1 %v487_v51, %s1866_s29 }
 0x549   :  { %v466_v58 = vpop.permute.xlu0 %465 }
 0x54a   :  { %v467_v59 = vrot.slane %v466_v58, 2 }
 0x54c   :  { %v1491_v60 = vmul.f32 -1.442695, %v467_v59 }
 0x565   :  { %v490_v54 = vpop.permute.xlu1 %489 }
 0x566   :  { %v492_v55 = vadd.f32 %v490_v54, %v486_v53 }
 0x568   :  { %1729 = vtanh.f32 %v492_v55  ;;  %v506_v56 = vrot.slane %v492_v55, %v2010_v33 }
 0x569   :  { %1731 = vpow2.f32 %v1491_v60 }
 0x56a   :  { %507 = vrot.lane.b32.xlu0 %v506_v56, %s1866_s29 }
 0x572   :  { %v1730_v57 = vpop.eup %1729 }
 0x573   :  { %495 = vrot.lane.b32.xlu1 %v1730_v57, %s1866_s29  ;;  %v1732_v62 = vpop.eup %1731 }
 0x574   :  { %v472_v63 = vadd.f32 1.0, %v1732_v62 }
 0x576   :  { %1733 = vrcp.f32 %v472_v63 }
 0x580   :  { %v1734_v2 = vpop.eup %1733 }
 0x5dc   :  { %v508_v0 = vpop.permute.xlu0 %507 }
 0x5dd   :  { %510 = vst.msk [vmem:[#allocation3] sm:$0x3] %vm22_vm0, %v508_v0 }
 0x5e4   :  { %v1497_v1 = vld.sshfl [vmem:[#allocation3] sm:$0x3 pattern:$0x76325410] }
 0x5e5   :  { %645 = vrot.lane.b32.xlu1 %v1497_v1, %s1866_s29  ;;  %v496_v4 = vpop.permute.xlu1 %495 }
 0x5e6   :  { %v2077_v5 = vmul.f32 %v1734_v2, %v496_v4 }
 0x5e8   :  { %511 = vst.msk [vmem:[#allocation2] sm:$0x3] %vm22_vm0, %v2077_v5 }
 0x5e9   :  { %513 = vst.msk [vmem:[#allocation4 + $0x4] sm:$0x3] %vm188_vm2, %v2077_v5 }
 0x5ef   :  { %v527_v6 = vld [vmem:[#allocation2] sm:$0x3] }
 0x5f0   :  { %1494 = vmatmul.mubr.msk.f32.vlgmr.msra.gmra.mrb[2].mxu1 %vm44_vm1, %v527_v6 }
 0x5f1   :  { %1631 = vmatpush1.bf16.msra.mxu1 %v1937_v8  ;;  %922 = vmatprep.mubr.f32.mxu1 %v1865_v7 }
 0x5f2   :  { %1633 = vmatprep.subr.bf16.mxu1 %v1939_v9 }
 0x5f5   :  { %1635 = vmatpush1.bf16.msra.mxu1 %v1956_v14 }
 0x5f6   :  { %1637 = vmatprep.subr.bf16.mxu1 %v1960_v15 }
 0x5f9   :  { %1639 = vmatpush1.bf16.msra.mxu1 %v1976_v20 }
 0x5fa   :  { %1641 = vmatprep.subr.bf16.mxu1 %v1980_v22 }
 0x5fd   :  { %1643 = vmatpush1.bf16.msra.mxu1 %v1991_v25 }
 0x5fe   :  { %1661 = vmatprep.subr.bf16.mxu1 %v1920_v3 }
 0x657   :  { %v646_v27 = vpop.permute.xlu1 %645 }
 0x6c3   :  { %v600_v10 = vpop.f32.mrb[2].mxu1 }
 0x6c4   :  { %v602_v11 = vpop.f32.mrb[3].mxu1 }
 0x6c5   :  { %v607_v12 = vcombine.low %v600_v10, %v602_v11 }
 0x6c7   :  { %v614_v16 = vrot.slane %v607_v12, %v2010_v33 }
 0x6c9   :  { %v616_v17 = vadd.f32 %v1493_v13, %v614_v16 }
 0x6cb   :  { %627 = vrot.lane.b32.xlu1 %v616_v17, %s1866_s29  ;;  %v1495_v18 = vmul.f32 -1.442695, %v616_v17  ;;  %v624_v19 = vrot.slane %v616_v17, 2 }
 0x6cd   :  { %1735 = vpow2.f32 %v1495_v18 }
 0x6ce   :  { %1737 = vtanh.f32 %v624_v19 }
 0x6d7   :  { %v1736_v21 = vpop.eup %1735 }
 0x6d8   :  { %v620_v23 = vadd.f32 1.0, %v1736_v21  ;;  %v1738_v3 = vpop.eup %1737 }
 0x6da   :  { %1739 = vrcp.f32 %v620_v23 }
 0x6e4   :  { %v1740_v24 = vpop.eup %1739 }
 0x6e5   :  { %v649_v26 = vmul.f32 %v1740_v24, %v1738_v3  ;;  %v648_v28 = vmul.f32 %v1740_v24, %v646_v27 }
 0x6e7   :  { %651 = vrot.lane.b32.xlu0 %v649_v26, %s1866_s29 }
 0x73d   :  { %v628_v34 = vpop.permute.xlu1 %627 }
 0x73e   :  { %v629_v35 = vrot.slane %v628_v34, 2 }
 0x740   :  { %v1496_v36 = vmul.f32 -1.442695, %v629_v35 }
 0x759   :  { %v652_v29 = vpop.permute.xlu0 %651 }
 0x75a   :  { %v654_v30 = vadd.f32 %v652_v29, %v648_v28 }
 0x75c   :  { %1741 = vtanh.f32 %v654_v30  ;;  %v668_v31 = vrot.slane %v654_v30, %v2010_v33 }
 0x75d   :  { %1743 = vpow2.f32 %v1496_v36 }
 0x75e   :  { %669 = vrot.lane.b32.xlu1 %v668_v31, %s1866_s29 }
 0x766   :  { %v1742_v32 = vpop.eup %1741 }
 0x767   :  { %657 = vrot.lane.b32.xlu0 %v1742_v32, %s1866_s29  ;;  %v1744_v38 = vpop.eup %1743 }
 0x768   :  { %v634_v39 = vadd.f32 1.0, %v1744_v38 }
 0x76a   :  { %1745 = vrcp.f32 %v634_v39 }
 0x774   :  { %v1746_v42 = vpop.eup %1745 }
 0x7d0   :  { %v670_v40 = vpop.permute.xlu1 %669 }
 0x7d1   :  { %672 = vst.msk [vmem:[#allocation3] sm:$0x3] %vm22_vm0, %v670_v40 }
 0x7d8   :  { %v1502_v41 = vld.sshfl [vmem:[#allocation3] sm:$0x3 pattern:$0x76325410] }
 0x7d9   :  { %v658_v43 = vpop.permute.xlu0 %657  ;;  %807 = vrot.lane.b32.xlu0 %v1502_v41, %s1866_s29 }
 0x7da   :  { %v2104_v44 = vmul.f32 %v1746_v42, %v658_v43 }
 0x7dc   :  { %673 = vst.msk [vmem:[#allocation2] sm:$0x3] %vm22_vm0, %v2104_v44 }
 0x7dd   :  { %675 = vst.msk [vmem:[#allocation4 + $0x6] sm:$0x3] %vm188_vm2, %v2104_v44 }
 0x7e3   :  { %v689_v45 = vld [vmem:[#allocation2] sm:$0x3] }
 0x7e4   :  { %1499 = vmatmul.mubr.msk.f32.vlgmr.msra.gmra.mrb[4].mxu0 %vm44_vm1, %v689_v45 }
 0x7e5   :  { %1647 = vmatpush1.bf16.msra.mxu0 %v1937_v8  ;;  %1084 = vmatprep.mubr.f32.mxu0 %v1865_v7 }
 0x7e6   :  { %1649 = vmatprep.subr.bf16.mxu0 %v1939_v9 }
 0x7e9   :  { %1651 = vmatpush1.bf16.msra.mxu0 %v1956_v14 }
 0x7ea   :  { %1653 = vmatprep.subr.bf16.mxu0 %v1960_v15 }
 0x7ed   :  { %1655 = vmatpush1.bf16.msra.mxu0 %v1976_v20 }
 0x7ee   :  { %1657 = vmatprep.subr.bf16.mxu0 %v1980_v22 }
 0x7f1   :  { %1659 = vmatpush1.bf16.msra.mxu0 %v1991_v25 }
 0x84b   :  { %v808_v59 = vpop.permute.xlu0 %807 }
 0x8b7   :  { %v762_v46 = vpop.f32.mrb[4].mxu0 }
 0x8b8   :  { %v764_v47 = vpop.f32.mrb[5].mxu0 }
 0x8b9   :  { %v769_v48 = vcombine.low %v762_v46, %v764_v47 }
 0x8bb   :  { %v776_v50 = vrot.slane %v769_v48, %v2010_v33 }
 0x8bd   :  { %v778_v51 = vadd.f32 %v1498_v49, %v776_v50 }
 0x8bf   :  { %v1500_v52 = vmul.f32 -1.442695, %v778_v51  ;;  %789 = vrot.lane.b32.xlu0 %v778_v51, %s1866_s29  ;;  %v786_v53 = vrot.slane %v778_v51, 2  ;;  %v1508_v51 = vld [vmem:[%s2289_s0 + $0x18] sm:$0xf] }
 0x8c1   :  { %1747 = vpow2.f32 %v1500_v52 }
 0x8c2   :  { %1749 = vtanh.f32 %v786_v53 }
 0x8cb   :  { %v1748_v54 = vpop.eup %1747 }
 0x8cc   :  { %v782_v55 = vadd.f32 1.0, %v1748_v54  ;;  %v1750_v56 = vpop.eup %1749 }
 0x8ce   :  { %1751 = vrcp.f32 %v782_v55 }
 0x8d8   :  { %v1752_v57 = vpop.eup %1751 }
 0x8d9   :  { %v811_v58 = vmul.f32 %v1752_v57, %v1750_v56  ;;  %v810_v60 = vmul.f32 %v1752_v57, %v808_v59 }
 0x8db   :  { %813 = vrot.lane.b32.xlu1 %v811_v58, %s1866_s29 }
 0x931   :  { %v790_v2 = vpop.permute.xlu0 %789 }
 0x932   :  { %v791_v4 = vrot.slane %v790_v2, 2 }
 0x934   :  { %v1501_v6 = vmul.f32 -1.442695, %v791_v4 }
 0x94d   :  { %v814_v62 = vpop.permute.xlu1 %813 }
 0x94e   :  { %v816_v63 = vadd.f32 %v814_v62, %v810_v60 }
 0x950   :  { %1753 = vtanh.f32 %v816_v63  ;;  %v830_v0 = vrot.slane %v816_v63, %v2010_v33 }
 0x951   :  { %1755 = vpow2.f32 %v1501_v6 }
 0x952   :  { %831 = vrot.lane.b32.xlu0 %v830_v0, %s1866_s29 }
 0x95a   :  { %v1754_v1 = vpop.eup %1753 }
 0x95b   :  { %819 = vrot.lane.b32.xlu1 %v1754_v1, %s1866_s29  ;;  %v1756_v10 = vpop.eup %1755 }
 0x95c   :  { %v796_v11 = vadd.f32 1.0, %v1756_v10 }
 0x95e   :  { %1757 = vrcp.f32 %v796_v11 }
 0x968   :  { %v1758_v16 = vpop.eup %1757 }
 0x9c4   :  { %v832_v12 = vpop.permute.xlu0 %831 }
 0x9c5   :  { %834 = vst.msk [vmem:[#allocation3] sm:$0x3] %vm22_vm0, %v832_v12 }
 0x9cc   :  { %v1507_v13 = vld.sshfl [vmem:[#allocation3] sm:$0x3 pattern:$0x76325410] }
 0x9cd   :  { %969 = vrot.lane.b32.xlu1 %v1507_v13, %s1866_s29  ;;  %v820_v17 = vpop.permute.xlu1 %819 }
 0x9ce   :  { %v2130_v18 = vmul.f32 %v1758_v16, %v820_v17 }
 0x9d0   :  { %835 = vst.msk [vmem:[#allocation2] sm:$0x3] %vm22_vm0, %v2130_v18 }
 0x9d1   :  { %837 = vst.msk [vmem:[#allocation4 + $0x8] sm:$0x3] %vm188_vm2, %v2130_v18 }
 0x9d7   :  { %v851_v19 = vld [vmem:[#allocation2] sm:$0x3] }
 0x9d8   :  { %1504 = vmatmul.mubr.msk.f32.vlgmr.msra.gmra.mrb[4].mxu1 %vm44_vm1, %v851_v19 }
 0x9d9   :  { %1663 = vmatpush1.bf16.msra.mxu1 %v1937_v8  ;;  %1246 = vmatprep.mubr.f32.mxu1 %v1865_v7  ;;  %v1503_v8 = vld [vmem:[%s2289_s0 + $0x14] sm:$0xf] }
 0x9da   :  { %1665 = vmatprep.subr.bf16.mxu1 %v1939_v9 }
 0x9dd   :  { %1667 = vmatpush1.bf16.msra.mxu1 %v1956_v14 }
 0x9de   :  { %1669 = vmatprep.subr.bf16.mxu1 %v1960_v15 }
 0x9e1   :  { %1671 = vmatpush1.bf16.msra.mxu1 %v1976_v20 }
 0x9e2   :  { %1673 = vmatprep.subr.bf16.mxu1 %v1980_v22 }
 0x9e5   :  { %1675 = vmatpush1.bf16.msra.mxu1 %v1991_v25 }
 0xa3f   :  { %v970_v28 = vpop.permute.xlu1 %969 }
 0xaab   :  { %v924_v21 = vpop.f32.mrb[4].mxu1 }
 0xaac   :  { %v926_v23 = vpop.f32.mrb[5].mxu1 }
 0xaad   :  { %v931_v3 = vcombine.low %v924_v21, %v926_v23 }
 0xaaf   :  { %v938_v24 = vrot.slane %v931_v3, %v2010_v33  ;;  %v197_v3 = vrot.slane %v2023_v61, %v2010_v33  ;;  %v1513_v61 = vld [vmem:[%s2289_s0 + $0x1c] sm:$0xf] }
 0xab1   :  { %v940_v9 = vadd.f32 %v1503_v8, %v938_v24 }
 0xab3   :  { %951 = vrot.lane.b32.xlu1 %v940_v9, %s1866_s29  ;;  %v1505_v14 = vmul.f32 -1.442695, %v940_v9  ;;  %v948_v15 = vrot.slane %v940_v9, 2 }
 0xab5   :  { %1759 = vpow2.f32 %v1505_v14 }
 0xab6   :  { %1761 = vtanh.f32 %v948_v15 }
 0xabf   :  { %v1760_v20 = vpop.eup %1759 }
 0xac0   :  { %v944_v26 = vadd.f32 1.0, %v1760_v20  ;;  %v1762_v22 = vpop.eup %1761 }
 0xac2   :  { %1763 = vrcp.f32 %v944_v26 }
 0xacc   :  { %v1764_v25 = vpop.eup %1763 }
 0xacd   :  { %v973_v27 = vmul.f32 %v1764_v25, %v1762_v22  ;;  %v972_v29 = vmul.f32 %v1764_v25, %v970_v28 }
 0xacf   :  { %975 = vrot.lane.b32.xlu0 %v973_v27, %s1866_s29 }
 0xb25   :  { %v952_v35 = vpop.permute.xlu1 %951 }
 0xb26   :  { %v953_v36 = vrot.slane %v952_v35, 2  ;;  %v521_v35 = vrot.slane %v2077_v5, %v2010_v33  ;;  %v1870_v5 = vmov 0.0|0.0  }
 0xb27   :  { %1676 = vmatprep.subr.bf16.mxu0 %v1870_v5 }
 0xb28   :  { %v1506_v38 = vmul.f32 -1.442695, %v953_v36  ;;  %v845_v36 = vrot.slane %v2130_v18, %v2010_v33 }
 0xb41   :  { %v976_v30 = vpop.permute.xlu0 %975 }
 0xb42   :  { %v978_v31 = vadd.f32 %v976_v30, %v972_v29 }
 0xb44   :  { %1765 = vtanh.f32 %v978_v31  ;;  %v992_v32 = vrot.slane %v978_v31, %v2010_v33 }
 0xb45   :  { %1767 = vpow2.f32 %v1506_v38 }
 0xb46   :  { %993 = vrot.lane.b32.xlu1 %v992_v32, %s1866_s29 }
 0xb4e   :  { %v1766_v34 = vpop.eup %1765 }
 0xb4f   :  { %981 = vrot.lane.b32.xlu0 %v1766_v34, %s1866_s29  ;;  %v1768_v39 = vpop.eup %1767 }
 0xb50   :  { %v958_v40 = vadd.f32 1.0, %v1768_v39  ;;  %v1344_v39 = vld [vmem:[%s2291_s2] sm:$0xff] }
 0xb52   :  { %1769 = vrcp.f32 %v958_v40  ;;  %v1345_v40 = vld [vmem:[%s2291_s2 + $0x8] sm:$0xff] }
 0xb5c   :  { %v1770_v43 = vpop.eup %1769 }
 0xbb8   :  { %v994_v41 = vpop.permute.xlu1 %993 }
 0xbb9   :  { %996 = vst.msk [vmem:[#allocation3] sm:$0x3] %vm22_vm0, %v994_v41  ;;  %v1677_v41 = vpack.c.bf16 %v1345_v40, %v1344_v39 }
 0xbc0   :  { %v1512_v42 = vld.sshfl [vmem:[#allocation3] sm:$0x3 pattern:$0x76325410] }
 0xbc1   :  { %v982_v45 = vpop.permute.xlu0 %981  ;;  %1131 = vrot.lane.b32.xlu0 %v1512_v42, %s1866_s29  ;;  %v1346_v42 = vld [vmem:[%s2291_s2 + $0x10] sm:$0xff] }
 0xbc2   :  { %v2156_v46 = vmul.f32 %v1770_v43, %v982_v45  ;;  %v1347_v43 = vld [vmem:[%s2291_s2 + $0x18] sm:$0xff] }
 0xbc4   :  { %999 = vst.msk [vmem:[#allocation4 + $0xa] sm:$0x3] %vm188_vm2, %v2156_v46 }
 0xbc5   :  { %997 = vst.msk [vmem:[#allocation2] sm:$0x3] %vm22_vm0, %v2156_v46 }
 0xbcc   :  { %v1013_v47 = vld [vmem:[#allocation2] sm:$0x3] }
 0xbcd   :  { %1509 = vmatmul.mubr.msk.f32.vlgmr.msra.gmra.mrb[6].mxu0 %vm44_vm1, %v1013_v47  ;;  %v1680_v47 = vpack.c.bf16 %v1347_v43, %v1346_v42 }
 0xbce   :  { %1678 = vmatpush3.bf16.msra.mxu0 %v1677_v41  ;;  %1545 = vmatprep.mubr.msk.f32.mxu0 %vm1871_vm3, %v1865_v7  ;;  %v1007_v7 = vrot.slane %v2156_v46, %v2010_v33 }
 0xbcf   :  { %1679 = vmatprep.subr.bf16.mxu0 %v1870_v5 }
 0xbd2   :  { %1681 = vmatpush3.bf16.msra.mxu0 %v1680_v47 }
 0xbd3   :  { %1682 = vmatprep.subr.bf16.mxu0 %v1870_v5 }
 0xc33   :  { %v1132_v62 = vpop.permute.xlu0 %1131 }
 0xca0   :  { %v1086_v48 = vpop.f32.mrb[6].mxu0 }
 0xca1   :  { %v1088_v49 = vpop.f32.mrb[7].mxu0 }
 0xca2   :  { %v1093_v50 = vcombine.low %v1086_v48, %v1088_v49 }
 0xca4   :  { %v1100_v52 = vrot.slane %v1093_v50, %v2010_v33  ;;  %v1348_v50 = vld [vmem:[%s2291_s2 + $0x20] sm:$0xff] }
 0xca6   :  { %v1102_v53 = vadd.f32 %v1508_v51, %v1100_v52  ;;  %v1349_v51 = vld [vmem:[%s2291_s2 + $0x28] sm:$0xff] }
 0xca8   :  { %v1510_v54 = vmul.f32 -1.442695, %v1102_v53  ;;  %1113 = vrot.lane.b32.xlu0 %v1102_v53, %s1866_s29  ;;  %v1110_v55 = vrot.slane %v1102_v53, 2  ;;  %v1683_v53 = vpack.c.bf16 %v1349_v51, %v1348_v50 }
 0xcaa   :  { %1771 = vpow2.f32 %v1510_v54  ;;  %1684 = vmatpush3.bf16.msra.mxu0 %v1683_v53  ;;  %v1350_v54 = vld [vmem:[%s2291_s2 + $0x30] sm:$0xff] }
 0xcab   :  { %1773 = vtanh.f32 %v1110_v55  ;;  %1685 = vmatprep.subr.bf16.mxu0 %v1870_v5  ;;  %v1351_v55 = vld [vmem:[%s2291_s2 + $0x38] sm:$0xff]  ;;  %s1872_s2 = smov [#allocation4]  }
 0xcb4   :  { %v1772_v56 = vpop.eup %1771 }
 0xcb5   :  { %v1106_v57 = vadd.f32 1.0, %v1772_v56  ;;  %v1774_v58 = vpop.eup %1773 }
 0xcb7   :  { %1775 = vrcp.f32 %v1106_v57  ;;  %v1686_v57 = vpack.c.bf16 %v1351_v55, %v1350_v54 }
 0xcb9   :  { %1687 = vmatpush3.bf16.msra.mxu0 %v1686_v57 }
 0xcc1   :  { %v1776_v59 = vpop.eup %1775 }
 0xcc2   :  { %v1135_v60 = vmul.f32 %v1776_v59, %v1774_v58  ;;  %v1134_v63 = vmul.f32 %v1776_v59, %v1132_v62  ;;  %v359_v62 = vrot.slane %v2050_v37, %v2010_v33 }
 0xcc4   :  { %1137 = vrot.lane.b32.xlu1 %v1135_v60, %s1866_s29 }
 0xd1a   :  { %v1114_v6 = vpop.permute.xlu0 %1113 }
 0xd1b   :  { %v1115_v10 = vrot.slane %v1114_v6, 2 }
 0xd1d   :  { %v1511_v11 = vmul.f32 -1.442695, %v1115_v10 }
 0xd36   :  { %v1138_v0 = vpop.permute.xlu1 %1137 }
 0xd37   :  { %v1140_v1 = vadd.f32 %v1138_v0, %v1134_v63  ;;  %v683_v0 = vrot.slane %v2104_v44, %v2010_v33 }
 0xd39   :  { %1777 = vtanh.f32 %v1140_v1  ;;  %v1154_v2 = vrot.slane %v1140_v1, %v2010_v33 }
 0xd3a   :  { %1779 = vpow2.f32 %v1511_v11 }
 0xd3b   :  { %1155 = vrot.lane.b32.xlu0 %v1154_v2, %s1866_s29 }
 0xd43   :  { %v1778_v4 = vpop.eup %1777 }
 0xd44   :  { %1143 = vrot.lane.b32.xlu1 %v1778_v4, %s1866_s29  ;;  %v1780_v12 = vpop.eup %1779 }
 0xd45   :  { %v1120_v13 = vadd.f32 1.0, %v1780_v12 }
 0xd47   :  { %1781 = vrcp.f32 %v1120_v13 }
 0xd51   :  { %v1782_v19 = vpop.eup %1781 }
 0xdad   :  { %v1156_v16 = vpop.permute.xlu0 %1155 }
 0xdae   :  { %1158 = vst.msk [vmem:[#allocation3] sm:$0x3] %vm22_vm0, %v1156_v16 }
 0xdb5   :  { %v1517_v17 = vld.sshfl [vmem:[#allocation3] sm:$0x3 pattern:$0x76325410] }
 0xdb6   :  { %1293 = vrot.lane.b32.xlu1 %v1517_v17, %s1866_s29  ;;  %v1144_v21 = vpop.permute.xlu1 %1143 }
 0xdb7   :  { %v1146_v23 = vmul.f32 %v1782_v19, %v1144_v21 }
 0xdb9   :  { %1161 = vst.msk [vmem:[#allocation4 + $0xc] sm:$0x3] %vm188_vm2, %v1146_v23  ;;  %v1169_v38 = vrot.slane %v1146_v23, %v2010_v33 }
 0xdba   :  { %1159 = vst.msk [vmem:[#allocation2] sm:$0x3] %vm22_vm0, %v1146_v23  ;;  %198 = vrot.lane.b32.xlu1 %v197_v3, %s1868_s19 }
 0xdc1   :  { %v1175_v8 = vld [vmem:[#allocation2] sm:$0x3] }
 0xdc2   :  { %1514 = vmatmul.mubr.msk.f32.vlgmr.msra.gmra.mrb[6].mxu1 %vm44_vm1, %v1175_v8 }
 0xe28   :  { %v1294_v24 = vpop.permute.xlu1 %1293 }
 0xe2c   :  { %v199_v9 = vpop.permute.xlu1 %198 }
 0xe2d   :  { %202 = vst.msk [vmem:[#allocation6 + $0xe] sm:$0x3] %vm188_vm2, %v199_v9 }
 0xe34   :  { %v1337_v34 = vld [vmem:[#allocation6 + $0xe] sm:$0x3] }
 0xe95   :  { %v1248_v14 = vpop.f32.mrb[6].mxu1 }
 0xe96   :  { %v1250_v15 = vpop.f32.mrb[7].mxu1 }
 0xe97   :  { %v1255_v20 = vcombine.low %v1248_v14, %v1250_v15 }
 0xe99   :  { %v1262_v26 = vrot.slane %v1255_v20, %v2010_v33 }
 0xe9b   :  { %v1264_v22 = vadd.f32 %v1513_v61, %v1262_v26 }
 0xe9d   :  { %v1515_v25 = vmul.f32 -1.442695, %v1264_v22  ;;  %v1272_v27 = vrot.slane %v1264_v22, 2 }
 0xe9f   :  { %1783 = vpow2.f32 %v1515_v25 }
 0xea0   :  { %1785 = vtanh.f32 %v1272_v27 }
 0xea9   :  { %v1784_v28 = vpop.eup %1783 }
 0xeaa   :  { %v1268_v29 = vadd.f32 1.0, %v1784_v28  ;;  %v1786_v30 = vpop.eup %1785 }
 0xeac   :  { %1787 = vrcp.f32 %v1268_v29 }
 0xeb6   :  { %v1788_v31 = vpop.eup %1787 }
 0xeb7   :  { %v1297_v32 = vmul.f32 %v1788_v31, %v1786_v30  ;;  %v1296_v18 = vmul.f32 %v1788_v31, %v1294_v24 }
 0xeb9   :  { %1299 = vrot.lane.b32.xlu0 %v1297_v32, %s1866_s29 }
 0xebd   :  { %1275 = vrot.lane.b32.xlu0 %v1264_v22, %s1866_s29 }
 0xec1   :  { %1339 = vrot.lane.b32.xlu0 %v1337_v34, %s1869_s22 }
 0xec5   :  { %522 = vrot.lane.b32.xlu0 %v521_v35, %s1868_s19 }
 0xec9   :  { %846 = vrot.lane.b32.xlu0 %v845_v36, %s1868_s19 }
 0xecd   :  { %1170 = vrot.lane.b32.xlu0 %v1169_v38, %s1868_s19 }
 0xf2b   :  { %v1300_v45 = vpop.permute.xlu0 %1299 }
 0xf2c   :  { %v1302_v48 = vadd.f32 %v1300_v45, %v1296_v18 }
 0xf2e   :  { %1789 = vtanh.f32 %v1302_v48  ;;  %v1316_v49 = vrot.slane %v1302_v48, %v2010_v33 }
 0xf2f   :  { %v1276_v52 = vpop.permute.xlu0 %1275 }
 0xf30   :  { %1317 = vrot.lane.b32.xlu0 %v1316_v49, %s1866_s29  ;;  %v1277_v1 = vrot.slane %v1276_v52, 2 }
 0xf32   :  { %v1516_v2 = vmul.f32 -1.442695, %v1277_v1 }
 0xf33   :  { %v1340_v56 = vpop.permute.xlu0 %1339 }
 0xf34   :  { %1791 = vpow2.f32 %v1516_v2 }
 0xf37   :  { %v523_v58 = vpop.permute.xlu0 %522 }
 0xf38   :  { %v1790_v59 = vpop.eup %1789  ;;  %526 = vst.msk [vmem:[#allocation6 + $0xa] sm:$0x3] %vm188_vm2, %v523_v58 }
 0xf39   :  { %1305 = vrot.lane.b32.xlu1 %v1790_v59, %s1866_s29  ;;  %s1439_s29 = sshll.u32 %s1872_s2, 4  ;;  %s1440_s29 = int_to_ptr.vmem [resolvable:$true] %s1439_s29 }
 0xf3a   :  { %s1795_s14 = scalar_lea.vmem %s1440_s29, 256  ;;  %p1800_p1 = scmp.lt.s32.totalorder %s1440_s29, %s1440_s29 }
 0xf3b   :  { %v847_v60 = vpop.permute.xlu0 %846  ;;  %p1796_p0 = scmp.ne.s32.totalorder %s1440_s29, %s1795_s14  ;;  %p1801_p2 = scmp.lt.s32.totalorder %s1795_s14, %s1795_s14 }
 0xf3c   :  { %850 = vst.msk [vmem:[#allocation6 + $0x6] sm:$0x3] %vm188_vm2, %v847_v60 }
 0xf3d   :  { %360 = vrot.lane.b32.xlu1 %v359_v62, %s1868_s19  ;;  %p1802_p3 = por %p1801_p2, %p1800_p1 }
 0xf3e   :  { %v1792_v37 = vpop.eup %1791 }
 0xf3f   :  { %v1171_v63 = vpop.permute.xlu0 %1170  ;;  %v1282_v4 = vadd.f32 1.0, %v1792_v37  ;;  %p1803_p4 = pnand %p1802_p3, %p1796_p0 }
 0xf40   :  { %1174 = vst.msk [vmem:[#allocation6 + $0x2] sm:$0x3] %vm188_vm2, %v1171_v63 }
 0xf41   :  { %684 = vrot.lane.b32.xlu1 %v683_v0, %s1868_s19  ;;  %1793 = vrcp.f32 %v1282_v4 }
 0xf45   :  { %1008 = vrot.lane.b32.xlu1 %v1007_v7, %s1868_s19 }
 0xf4b   :  { %v1794_v10 = vpop.eup %1793 }
 0xfa2   :  { %v1318_v6 = vpop.permute.xlu0 %1317 }
 0xfa3   :  { %1320 = vst.msk [vmem:[#allocation3] sm:$0x3] %vm22_vm0, %v1318_v6 }
 0xfab   :  { %v1306_v44 = vpop.permute.xlu1 %1305 }
 0xfac   :  { %v1308_v11 = vmul.f32 %v1794_v10, %v1306_v44 }
 0xfae   :  { %1321 = vst.msk [vmem:[#allocation2] sm:$0x3] %vm22_vm0, %v1308_v11  ;;  %v1331_v46 = vrot.slane %v1308_v11, %v2010_v33 }
 0xfaf   :  { %1323 = vst.msk [vmem:[#allocation4 + $0xe] sm:$0x3] %vm188_vm2, %v1308_v11  ;;  %v361_v12 = vpop.permute.xlu1 %360 }
 0xfb0   :  { %364 = vst.msk [vmem:[#allocation6 + $0xc] sm:$0x3] %vm188_vm2, %v361_v12  ;;  %1332 = vrot.lane.b32.xlu1 %v1331_v46, %s1868_s19 }
 0xfb3   :  { %v685_v13 = vpop.permute.xlu1 %684 }
 0xfb4   :  { %688 = vst.msk [vmem:[#allocation6 + $0x8] sm:$0x3] %vm188_vm2, %v685_v13 }
 0xfb6   :  { %v1336_v16 = vld [vmem:[#allocation4 + $0xe] sm:$0x3] }
 0xfb7   :  { %v1343_v17 = vsel %vm1342_vm4, %v1336_v16, %v1340_v56  ;;  %v1009_v19 = vpop.permute.xlu1 %1008 }
 0xfb8   :  { %1546 = vmatmul.mubr.msk.f32.vlgmr.msra.gmra.mrb[8].mxu0 %vm44_vm1, %v1343_v17  ;;  %1012 = vst.msk [vmem:[#allocation6 + $0x4] sm:$0x3] %vm188_vm2, %v1009_v19 }
 0xfb9   :  { %1806 = shalt.err (!%p1803_p4)
}
 0xfba   :  { %s1807_s17 = scalar_lea.hbm %s2293_s4, 256 }
 0xfbb   :  { %p1808_p5 = scmp.ne.s32.totalorder %s2293_s4, %s1807_s17  ;;  %p1811_p6 = scmp.lt.u32.totalorder %s1807_s17, %s2293_s4 }
 0xfbd   :  { %p1813_p7 = pnand %p1811_p6, %p1808_p5 }
 0xfbf   :  { %1816 = shalt.err (!%p1813_p7)
}
 0xfc0   :  { %s1873_s0 = smov 2   ;;  %s1874_s25 = smov [#allocation6]  }
 0xfc1   :  { %1445 = dma.vmem_to_hbm [thread:$0]  %s1440_s29, 256, %s2293_s4, [#allocation5], %s1869_s22, %s1869_s22, %s1873_s0  }
 0xfc2   :  { %s1451_s26 = sshll.u32 %s1874_s25, 4  ;;  %s1452_s26 = int_to_ptr.vmem [resolvable:$true] %s1451_s26 }
 0xfc3   :  { %s1817_s27 = scalar_lea.vmem %s1452_s26, 256  ;;  %p1822_p9 = scmp.lt.s32.totalorder %s1452_s26, %s1452_s26 }
 0xfc4   :  { %p1818_p8 = scmp.ne.s32.totalorder %s1452_s26, %s1817_s27  ;;  %p1823_p10 = scmp.lt.s32.totalorder %s1817_s27, %s1817_s27 }
 0xfc6   :  { %p1824_p11 = por %p1823_p10, %p1822_p9 }
 0xfc8   :  { %p1825_p12 = pnand %p1824_p11, %p1818_p8 }
0x1022   :  { %v1333_v33 = vpop.permute.xlu1 %1332 }
0x1023   :  { %1335 = vst.msk [vmem:[#allocation6] sm:$0x3] %vm188_vm2, %v1333_v33 }
0x1024   :  { %1828 = shalt.err (!%p1825_p12)
}
0x1025   :  { %s1829_s30 = scalar_lea.hbm %s2294_s5, 256 }
0x1026   :  { %p1830_p13 = scmp.ne.s32.totalorder %s2294_s5, %s1829_s30  ;;  %p1833_p0 = scmp.lt.u32.totalorder %s1829_s30, %s2294_s5 }
0x1028   :  { %p1835_p1 = pnand %p1833_p0, %p1830_p13 }
0x102a   :  { %1838 = shalt.err (!%p1835_p1)
}
0x102b   :  { %1457 = dma.vmem_to_hbm [thread:$0]  %s1452_s26, 256, %s2294_s5, [#allocation7], %s1869_s22, %s1869_s22, %s1873_s0   ;;  %vm1432_vm5 = vcmask 33792  }
0x102c   :  { %v1518_v21 = vld [vmem:[%s2292_s3] ss:$0 sm:$0xff]  ;;  %s1875_s2 = smov [#allocation8]  }
0x102d   :  { %s1464_s29 = sshll.u32 %s1875_s2, 4  ;;  %s1465_s29 = int_to_ptr.vmem [resolvable:$true] %s1464_s29 }
0x102e   :  { %s1839_s14 = scalar_lea.vmem %s1465_s29, 32  ;;  %p1844_p3 = scmp.lt.s32.totalorder %s1465_s29, %s1465_s29 }
0x102f   :  { %p1840_p2 = scmp.ne.s32.totalorder %s1465_s29, %s1839_s14  ;;  %p1845_p4 = scmp.lt.s32.totalorder %s1839_s14, %s1839_s14 }
0x1031   :  { %p1846_p5 = por %p1845_p4, %p1844_p3 }
0x1033   :  { %p1847_p6 = pnand %p1846_p5, %p1840_p2 }
0x108b   :  { %v1428_v23 = vpop.f32.mrb[8].mxu0 }
0x108c   :  { %v1429_v3 = vadd.f32 %v1518_v21, %v1428_v23  ;;  %v1547_v8 = vpop.f32.mrb[9].mxu0 }
0x108e   :  { %1433 = vst.msk [vmem:[#allocation8] sm:$0x3] %vm1432_vm5, %v1429_v3 }
0x108f   :  { %1850 = shalt.err (!%p1847_p6)
}
0x1090   :  { %s1851_s15 = scalar_lea.hbm %s2295_s6, 32 }
0x1091   :  { %p1852_p7 = scmp.ne.s32.totalorder %s2295_s6, %s1851_s15  ;;  %p1855_p8 = scmp.lt.u32.totalorder %s1851_s15, %s2295_s6 }
0x1093   :  { %p1857_p9 = pnand %p1855_p8, %p1852_p7 }
0x1095   :  { %1860 = shalt.err (!%p1857_p9)
}
0x1096   :  { %1467 = dma.vmem_to_hbm [thread:$0]  %s1465_s29, 32, %s2295_s6, [#allocation7]  }
0x1097   :  { %1861 = dma.done.wait [#allocation5], 256  }
0x1098   :  { %1862 = vsyncadd [#allocation5], 4294967040 }
0x1099   :  { %1863 = dma.done.wait [#allocation7], 288  }
0x109a   :  { %1864 = vsyncadd [#allocation7], 4294967008 }
0x109b   :  { %1477 = vsyncpa [#allocation5], 1 }
0x109c   :  { %1478 = vsyncpa [#allocation7], 1 }

// kernel: bilstm_forward.2
= control target key start
LH: loop header
LB: loop body
LE: loop exit
PB: predicated region body
PF: predicated region fallthrough
CT: control target
= control target key end

     0   :  { %vm13_vm0 = vcmask 517120   ;;  %v1616_v3 = vmov 0.0   ;;  %s1617_s13 = smov 64   ;;  %vm35_vm1 = vcmask 523264   ;;  %v1618_v27 = vmov 1983009808   ;;  %s1996_s1 = inlined_call_operand.vmem [shape: f32[64,256], index: 1, kind: input, shape index: {}]   ;;  %s1997_s0 = inlined_call_operand.vmem [shape: f32[8,2,256], index: 0, kind: input, shape index: {}]   ;;  %s1998_s2 = inlined_call_operand.vmem [shape: f32[8,2,32], index: 2, kind: output, shape index: {0}]   ;;  %s1999_s3 = inlined_call_operand.vmem [shape: f32[8,2,32], index: 3, kind: output, shape index: {1}]  }
   0x1   :  { %v17_v0 = vld [vmem:[%s1996_s1 + $0x8] sm:$0xff]  ;;  %v19_v1 = vld [vmem:[%s1996_s1 + $0x18] sm:$0xff]  ;;  %v16_v2 = vld [vmem:[%s1996_s1] sm:$0xff]  ;;  %14 = vst.msk [vmem:[#allocation2] sm:$0x3] %vm13_vm0, %v1616_v3  ;;  %103 = vmatprep.mubr.f32.mxu0 %v1616_v3  ;;  %265 = vmatprep.mubr.f32.mxu1 %v1616_v3  ;;  %v114_v28 = vunpack.c.l.s4 %v1618_v27  ;;  %v116_v29 = vlaneseq  ;;  %vm179_vm2 = vcmask 254976  }
   0x2   :  { %15 = vst.msk [vmem:[#allocation3] sm:$0x3] %vm13_vm0, %v1616_v3  ;;  %v1655_v4 = vpack.c.bf16 %v19_v1, %v17_v0  ;;  %v18_v5 = vld [vmem:[%s1996_s1 + $0x10] sm:$0xff]  ;;  %v21_v6 = vld [vmem:[%s1996_s1 + $0x28] sm:$0xff]  ;;  %v23_v7 = vld [vmem:[%s1996_s1 + $0x38] sm:$0xff]  ;;  %s1619_s20 = smov 96  }
   0x3   :  { %v1666_v8 = vpack.c.bf16 %v18_v5, %v16_v2  ;;  %v1668_v9 = vpack.c.bf16 %v23_v7, %v21_v6  ;;  %v20_v10 = vld [vmem:[%s1996_s1 + $0x20] sm:$0xff]  ;;  %v22_v11 = vld [vmem:[%s1996_s1 + $0x30] sm:$0xff]  ;;  %v25_v12 = vld [vmem:[%s1996_s1 + $0x48] sm:$0xff]  ;;  %v115_v30 = vunpack.c.0.s8 %v114_v28  ;;  %v117_v31 = vshrl.u32 %v116_v29, 7 }
   0x4   :  { %1389 = vmatprep.subr.bf16.mxu0 %v1655_v4  ;;  %v27_v13 = vld [vmem:[%s1996_s1 + $0x58] sm:$0xff]  ;;  %1405 = vmatprep.subr.bf16.mxu1 %v1655_v4  ;;  %v1685_v14 = vpack.c.bf16 %v22_v11, %v20_v10  ;;  %v24_v16 = vld [vmem:[%s1996_s1 + $0x40] sm:$0xff]  ;;  %v26_v17 = vld [vmem:[%s1996_s1 + $0x50] sm:$0xff] }
   0x5   :  { %1391 = vmatpush1.bf16.msra.mxu0 %v1666_v8  ;;  %1407 = vmatpush1.bf16.msra.mxu1 %v1666_v8  ;;  %v1689_v15 = vpack.c.bf16 %v27_v13, %v25_v12  ;;  %v29_v18 = vld [vmem:[%s1996_s1 + $0x68] sm:$0xff]  ;;  %v31_v19 = vld [vmem:[%s1996_s1 + $0x78] sm:$0xff]  ;;  %v1705_v21 = vpack.c.bf16 %v26_v17, %v24_v16  ;;  %v28_v23 = vld [vmem:[%s1996_s1 + $0x60] sm:$0xff]  ;;  %v1739_v33 = vsub.s32 %v115_v30, %v117_v31 }
   0x6   :  { %1393 = vmatprep.subr.bf16.mxu0 %v1668_v9  ;;  %1409 = vmatprep.subr.bf16.mxu1 %v1668_v9  ;;  %v1709_v22 = vpack.c.bf16 %v31_v19, %v29_v18  ;;  %v30_v24 = vld [vmem:[%s1996_s1 + $0x70] sm:$0xff]  ;;  %v34_v36 = vld [vmem:[%s1997_s0] sm:$0xf]  ;;  %v1340_v2 = vld [vmem:[%s1997_s0 + $0x4] sm:$0xf] }
   0x7   :  { %v1720_v25 = vpack.c.bf16 %v30_v24, %v28_v23 }
   0x8   :  { %v32_v26 = vld [vmem:[#allocation2] sm:$0x3] }
   0x9   :  { %v1338_v20 = vld.sshfl [vmem:[#allocation3] sm:$0x3 pattern:$0x76325410]  ;;  %1395 = vmatpush1.bf16.msra.mxu0 %v1685_v14  ;;  %1411 = vmatpush1.bf16.msra.mxu1 %v1685_v14 }
   0xa   :  { %150 = vrot.lane.b32.xlu0 %v1338_v20, %s1617_s13  ;;  %1397 = vmatprep.subr.bf16.mxu0 %v1689_v15 }
   0xb   :  { %1413 = vmatprep.subr.bf16.mxu1 %v1689_v15 }
   0xd   :  { %1399 = vmatpush1.bf16.msra.mxu0 %v1705_v21  ;;  %1415 = vmatpush1.bf16.msra.mxu1 %v1705_v21 }
   0xe   :  { %1401 = vmatprep.subr.bf16.mxu0 %v1709_v22  ;;  %1417 = vmatprep.subr.bf16.mxu1 %v1709_v22 }
  0x11   :  { %1403 = vmatpush1.bf16.msra.mxu0 %v1720_v25  ;;  %1419 = vmatpush1.bf16.msra.mxu1 %v1720_v25 }
  0x12   :  { %1421 = vmatprep.subr.bf16.mxu0 %v1655_v4  ;;  %1437 = vmatprep.subr.bf16.mxu1 %v1655_v4 }
  0x14   :  { %1335 = vmatmul.mubr.msk.f32.vlgmr.msra.gmra.mrb[0].mxu0 %vm35_vm1, %v32_v26 }
  0x15   :  { %1423 = vmatpush1.bf16.msra.mxu0 %v1666_v8  ;;  %427 = vmatprep.mubr.f32.mxu0 %v1616_v3 }
  0x16   :  { %1425 = vmatprep.subr.bf16.mxu0 %v1668_v9 }
  0x19   :  { %1427 = vmatpush1.bf16.msra.mxu0 %v1685_v14 }
  0x1a   :  { %1429 = vmatprep.subr.bf16.mxu0 %v1689_v15 }
  0x1d   :  { %1431 = vmatpush1.bf16.msra.mxu0 %v1705_v21 }
  0x1e   :  { %1433 = vmatprep.subr.bf16.mxu0 %v1709_v22 }
  0x21   :  { %1435 = vmatpush1.bf16.msra.mxu0 %v1720_v25 }
  0x22   :  { %1453 = vmatprep.subr.bf16.mxu0 %v1655_v4 }
  0x7c   :  { %v151_v46 = vpop.permute.xlu0 %150 }
  0xe7   :  { %v105_v32 = vpop.f32.mrb[0].mxu0 }
  0xe8   :  { %v107_v34 = vpop.f32.mrb[1].mxu0 }
  0xe9   :  { %v112_v35 = vcombine.low %v105_v32, %v107_v34 }
  0xeb   :  { %v119_v37 = vrot.slane %v112_v35, %v1739_v33 }
  0xed   :  { %v121_v38 = vadd.f32 %v119_v37, %v34_v36 }
  0xef   :  { %132 = vrot.lane.b32.xlu1 %v121_v38, %s1617_s13  ;;  %v1336_v39 = vmul.f32 -1.442695, %v121_v38  ;;  %v129_v40 = vrot.slane %v121_v38, 2 }
  0xf1   :  { %1520 = vpow2.f32 %v1336_v39 }
  0xf2   :  { %1522 = vtanh.f32 %v129_v40 }
  0xfb   :  { %v1521_v41 = vpop.eup %1520 }
  0xfc   :  { %v125_v42 = vadd.f32 1.0, %v1521_v41  ;;  %v1523_v43 = vpop.eup %1522 }
  0xfe   :  { %1524 = vrcp.f32 %v125_v42  ;;  %v1347_v42 = vld [vmem:[%s1997_s0 + $0x8] sm:$0xf] }
 0x108   :  { %v1525_v44 = vpop.eup %1524 }
 0x109   :  { %v154_v45 = vmul.f32 %v1525_v44, %v1523_v43  ;;  %v153_v47 = vmul.f32 %v1525_v44, %v151_v46 }
 0x10b   :  { %156 = vrot.lane.b32.xlu0 %v154_v45, %s1617_s13 }
 0x161   :  { %v133_v52 = vpop.permute.xlu1 %132 }
 0x162   :  { %v134_v53 = vrot.slane %v133_v52, 2 }
 0x164   :  { %v1337_v54 = vmul.f32 -1.442695, %v134_v53 }
 0x17d   :  { %v157_v48 = vpop.permute.xlu0 %156 }
 0x17e   :  { %v159_v49 = vadd.f32 %v157_v48, %v153_v47 }
 0x180   :  { %1526 = vtanh.f32 %v159_v49  ;;  %v173_v50 = vrot.slane %v159_v49, %v1739_v33 }
 0x181   :  { %1528 = vpow2.f32 %v1337_v54 }
 0x182   :  { %174 = vrot.lane.b32.xlu0 %v173_v50, %s1617_s13 }
 0x18a   :  { %v1527_v51 = vpop.eup %1526 }
 0x18b   :  { %162 = vrot.lane.b32.xlu1 %v1527_v51, %s1617_s13  ;;  %v1529_v55 = vpop.eup %1528 }
 0x18c   :  { %v139_v56 = vadd.f32 1.0, %v1529_v55 }
 0x18e   :  { %1530 = vrcp.f32 %v139_v56 }
 0x198   :  { %v1531_v59 = vpop.eup %1530 }
 0x1f4   :  { %v175_v57 = vpop.permute.xlu0 %174 }
 0x1f5   :  { %177 = vst.msk [vmem:[#allocation3] sm:$0x3] %vm13_vm0, %v175_v57 }
 0x1fc   :  { %v1344_v58 = vld.sshfl [vmem:[#allocation3] sm:$0x3 pattern:$0x76325410] }
 0x1fd   :  { %312 = vrot.lane.b32.xlu1 %v1344_v58, %s1617_s13  ;;  %v163_v60 = vpop.permute.xlu1 %162 }
 0x1fe   :  { %v1752_v61 = vmul.f32 %v1531_v59, %v163_v60 }
 0x200   :  { %178 = vst.msk [vmem:[#allocation2] sm:$0x3] %vm13_vm0, %v1752_v61 }
 0x201   :  { %180 = vst.msk [vmem:[%s1998_s2] sm:$0x3] %vm179_vm2, %v1752_v61 }
 0x207   :  { %v194_v62 = vld [vmem:[#allocation2] sm:$0x3] }
 0x208   :  { %1341 = vmatmul.mubr.msk.f32.vlgmr.msra.gmra.mrb[0].mxu1 %vm35_vm1, %v194_v62 }
 0x209   :  { %1439 = vmatpush1.bf16.msra.mxu1 %v1666_v8  ;;  %589 = vmatprep.mubr.f32.mxu1 %v1616_v3 }
 0x20a   :  { %1441 = vmatprep.subr.bf16.mxu1 %v1668_v9 }
 0x20d   :  { %1443 = vmatpush1.bf16.msra.mxu1 %v1685_v14 }
 0x20e   :  { %1445 = vmatprep.subr.bf16.mxu1 %v1689_v15 }
 0x211   :  { %1447 = vmatpush1.bf16.msra.mxu1 %v1705_v21 }
 0x212   :  { %1449 = vmatprep.subr.bf16.mxu1 %v1709_v22 }
 0x215   :  { %1451 = vmatpush1.bf16.msra.mxu1 %v1720_v25 }
 0x216   :  { %1469 = vmatprep.subr.bf16.mxu1 %v1655_v4 }
 0x26f   :  { %v313_v18 = vpop.permute.xlu1 %312 }
 0x2db   :  { %v267_v63 = vpop.f32.mrb[0].mxu1 }
 0x2dc   :  { %v269_v0 = vpop.f32.mrb[1].mxu1 }
 0x2dd   :  { %v274_v1 = vcombine.low %v267_v63, %v269_v0 }
 0x2df   :  { %v281_v5 = vrot.slane %v274_v1, %v1739_v33 }
 0x2e1   :  { %v283_v6 = vadd.f32 %v1340_v2, %v281_v5 }
 0x2e3   :  { %294 = vrot.lane.b32.xlu1 %v283_v6, %s1617_s13  ;;  %v1342_v7 = vmul.f32 -1.442695, %v283_v6  ;;  %v291_v10 = vrot.slane %v283_v6, 2 }
 0x2e5   :  { %1532 = vpow2.f32 %v1342_v7 }
 0x2e6   :  { %1534 = vtanh.f32 %v291_v10 }
 0x2ef   :  { %v1533_v11 = vpop.eup %1532 }
 0x2f0   :  { %v287_v12 = vadd.f32 1.0, %v1533_v11  ;;  %v1535_v13 = vpop.eup %1534 }
 0x2f2   :  { %1536 = vrcp.f32 %v287_v12 }
 0x2fc   :  { %v1537_v16 = vpop.eup %1536 }
 0x2fd   :  { %v316_v17 = vmul.f32 %v1537_v16, %v1535_v13  ;;  %v315_v19 = vmul.f32 %v1537_v16, %v313_v18  ;;  %v1354_v13 = vld [vmem:[%s1997_s0 + $0xc] sm:$0xf] }
 0x2ff   :  { %318 = vrot.lane.b32.xlu0 %v316_v17, %s1617_s13 }
 0x355   :  { %v295_v27 = vpop.permute.xlu1 %294 }
 0x356   :  { %v296_v28 = vrot.slane %v295_v27, 2 }
 0x358   :  { %v1343_v29 = vmul.f32 -1.442695, %v296_v28 }
 0x371   :  { %v319_v20 = vpop.permute.xlu0 %318 }
 0x372   :  { %v321_v23 = vadd.f32 %v319_v20, %v315_v19 }
 0x374   :  { %1538 = vtanh.f32 %v321_v23  ;;  %v335_v24 = vrot.slane %v321_v23, %v1739_v33 }
 0x375   :  { %1540 = vpow2.f32 %v1343_v29 }
 0x376   :  { %336 = vrot.lane.b32.xlu1 %v335_v24, %s1617_s13 }
 0x37e   :  { %v1539_v26 = vpop.eup %1538 }
 0x37f   :  { %324 = vrot.lane.b32.xlu0 %v1539_v26, %s1617_s13  ;;  %v1541_v30 = vpop.eup %1540 }
 0x380   :  { %v301_v31 = vadd.f32 1.0, %v1541_v30 }
 0x382   :  { %1542 = vrcp.f32 %v301_v31 }
 0x38c   :  { %v1543_v35 = vpop.eup %1542 }
 0x3e8   :  { %v337_v32 = vpop.permute.xlu1 %336 }
 0x3e9   :  { %339 = vst.msk [vmem:[#allocation3] sm:$0x3] %vm13_vm0, %v337_v32 }
 0x3f0   :  { %v1351_v34 = vld.sshfl [vmem:[#allocation3] sm:$0x3 pattern:$0x76325410] }
 0x3f1   :  { %v325_v36 = vpop.permute.xlu0 %324  ;;  %474 = vrot.lane.b32.xlu0 %v1351_v34, %s1617_s13 }
 0x3f2   :  { %v1782_v37 = vmul.f32 %v1543_v35, %v325_v36 }
 0x3f4   :  { %340 = vst.msk [vmem:[#allocation2] sm:$0x3] %vm13_vm0, %v1782_v37 }
 0x3f5   :  { %1345 = vst.msk [vmem:[%s1998_s2 + $0x2] sm:$0x3] %vm179_vm2, %v1782_v37 }
 0x3fb   :  { %v356_v38 = vld [vmem:[#allocation2] sm:$0x3] }
 0x3fc   :  { %1348 = vmatmul.mubr.msk.f32.vlgmr.msra.gmra.mrb[2].mxu0 %vm35_vm1, %v356_v38 }
 0x3fd   :  { %1455 = vmatpush1.bf16.msra.mxu0 %v1666_v8  ;;  %751 = vmatprep.mubr.f32.mxu0 %v1616_v3 }
 0x3fe   :  { %1457 = vmatprep.subr.bf16.mxu0 %v1668_v9 }
 0x401   :  { %1459 = vmatpush1.bf16.msra.mxu0 %v1685_v14 }
 0x402   :  { %1461 = vmatprep.subr.bf16.mxu0 %v1689_v15 }
 0x405   :  { %1463 = vmatpush1.bf16.msra.mxu0 %v1705_v21 }
 0x406   :  { %1465 = vmatprep.subr.bf16.mxu0 %v1709_v22 }
 0x409   :  { %1467 = vmatpush1.bf16.msra.mxu0 %v1720_v25 }
 0x40a   :  { %1485 = vmatprep.subr.bf16.mxu0 %v1655_v4 }
 0x463   :  { %v475_v52 = vpop.permute.xlu0 %474 }
 0x4cf   :  { %v429_v39 = vpop.f32.mrb[2].mxu0 }
 0x4d0   :  { %v431_v40 = vpop.f32.mrb[3].mxu0 }
 0x4d1   :  { %v436_v41 = vcombine.low %v429_v39, %v431_v40 }
 0x4d3   :  { %v443_v43 = vrot.slane %v436_v41, %v1739_v33 }
 0x4d5   :  { %v445_v44 = vadd.f32 %v1347_v42, %v443_v43 }
 0x4d7   :  { %v1349_v45 = vmul.f32 -1.442695, %v445_v44  ;;  %456 = vrot.lane.b32.xlu0 %v445_v44, %s1617_s13  ;;  %v453_v46 = vrot.slane %v445_v44, 2 }
 0x4d9   :  { %1544 = vpow2.f32 %v1349_v45 }
 0x4da   :  { %1546 = vtanh.f32 %v453_v46 }
 0x4e3   :  { %v1545_v47 = vpop.eup %1544 }
 0x4e4   :  { %v449_v48 = vadd.f32 1.0, %v1545_v47  ;;  %v1547_v49 = vpop.eup %1546 }
 0x4e6   :  { %1548 = vrcp.f32 %v449_v48 }
 0x4f0   :  { %v1549_v50 = vpop.eup %1548 }
 0x4f1   :  { %v478_v51 = vmul.f32 %v1549_v50, %v1547_v49  ;;  %v477_v53 = vmul.f32 %v1549_v50, %v475_v52  ;;  %v1361_v49 = vld [vmem:[%s1997_s0 + $0x10] sm:$0xf] }
 0x4f3   :  { %480 = vrot.lane.b32.xlu1 %v478_v51, %s1617_s13 }
 0x549   :  { %v457_v58 = vpop.permute.xlu0 %456 }
 0x54a   :  { %v458_v59 = vrot.slane %v457_v58, 2 }
 0x54c   :  { %v1350_v60 = vmul.f32 -1.442695, %v458_v59 }
 0x565   :  { %v481_v54 = vpop.permute.xlu1 %480 }
 0x566   :  { %v483_v55 = vadd.f32 %v481_v54, %v477_v53 }
 0x568   :  { %1550 = vtanh.f32 %v483_v55  ;;  %v497_v56 = vrot.slane %v483_v55, %v1739_v33 }
 0x569   :  { %1552 = vpow2.f32 %v1350_v60 }
 0x56a   :  { %498 = vrot.lane.b32.xlu0 %v497_v56, %s1617_s13 }
 0x572   :  { %v1551_v57 = vpop.eup %1550 }
 0x573   :  { %486 = vrot.lane.b32.xlu1 %v1551_v57, %s1617_s13  ;;  %v1553_v62 = vpop.eup %1552 }
 0x574   :  { %v463_v63 = vadd.f32 1.0, %v1553_v62 }
 0x576   :  { %1554 = vrcp.f32 %v463_v63 }
 0x580   :  { %v1555_v2 = vpop.eup %1554 }
 0x5dc   :  { %v499_v0 = vpop.permute.xlu0 %498 }
 0x5dd   :  { %501 = vst.msk [vmem:[#allocation3] sm:$0x3] %vm13_vm0, %v499_v0 }
 0x5e4   :  { %v1358_v1 = vld.sshfl [vmem:[#allocation3] sm:$0x3 pattern:$0x76325410] }
 0x5e5   :  { %636 = vrot.lane.b32.xlu1 %v1358_v1, %s1617_s13  ;;  %v487_v5 = vpop.permute.xlu1 %486 }
 0x5e6   :  { %v1812_v6 = vmul.f32 %v1555_v2, %v487_v5 }
 0x5e8   :  { %502 = vst.msk [vmem:[#allocation2] sm:$0x3] %vm13_vm0, %v1812_v6 }
 0x5e9   :  { %1352 = vst.msk [vmem:[%s1998_s2 + $0x4] sm:$0x3] %vm179_vm2, %v1812_v6 }
 0x5ef   :  { %v518_v7 = vld [vmem:[#allocation2] sm:$0x3] }
 0x5f0   :  { %1355 = vmatmul.mubr.msk.f32.vlgmr.msra.gmra.mrb[2].mxu1 %vm35_vm1, %v518_v7 }
 0x5f1   :  { %1471 = vmatpush1.bf16.msra.mxu1 %v1666_v8  ;;  %913 = vmatprep.mubr.f32.mxu1 %v1616_v3 }
 0x5f2   :  { %1473 = vmatprep.subr.bf16.mxu1 %v1668_v9 }
 0x5f5   :  { %1475 = vmatpush1.bf16.msra.mxu1 %v1685_v14 }
 0x5f6   :  { %1477 = vmatprep.subr.bf16.mxu1 %v1689_v15 }
 0x5f9   :  { %1479 = vmatpush1.bf16.msra.mxu1 %v1705_v21 }
 0x5fa   :  { %1481 = vmatprep.subr.bf16.mxu1 %v1709_v22 }
 0x5fd   :  { %1483 = vmatpush1.bf16.msra.mxu1 %v1720_v25 }
 0x5fe   :  { %1501 = vmatprep.subr.bf16.mxu1 %v1655_v4 }
 0x657   :  { %v637_v27 = vpop.permute.xlu1 %636 }
 0x6c3   :  { %v591_v10 = vpop.f32.mrb[2].mxu1 }
 0x6c4   :  { %v593_v11 = vpop.f32.mrb[3].mxu1 }
 0x6c5   :  { %v598_v12 = vcombine.low %v591_v10, %v593_v11 }
 0x6c7   :  { %v605_v16 = vrot.slane %v598_v12, %v1739_v33 }
 0x6c9   :  { %v607_v17 = vadd.f32 %v1354_v13, %v605_v16 }
 0x6cb   :  { %618 = vrot.lane.b32.xlu1 %v607_v17, %s1617_s13  ;;  %v1356_v18 = vmul.f32 -1.442695, %v607_v17  ;;  %v615_v19 = vrot.slane %v607_v17, 2 }
 0x6cd   :  { %1556 = vpow2.f32 %v1356_v18 }
 0x6ce   :  { %1558 = vtanh.f32 %v615_v19 }
 0x6d7   :  { %v1557_v20 = vpop.eup %1556 }
 0x6d8   :  { %v611_v23 = vadd.f32 1.0, %v1557_v20  ;;  %v1559_v4 = vpop.eup %1558 }
 0x6da   :  { %1560 = vrcp.f32 %v611_v23 }
 0x6e4   :  { %v1561_v24 = vpop.eup %1560 }
 0x6e5   :  { %v640_v26 = vmul.f32 %v1561_v24, %v1559_v4  ;;  %v639_v28 = vmul.f32 %v1561_v24, %v637_v27 }
 0x6e7   :  { %642 = vrot.lane.b32.xlu0 %v640_v26, %s1617_s13 }
 0x73d   :  { %v619_v34 = vpop.permute.xlu1 %618 }
 0x73e   :  { %v620_v35 = vrot.slane %v619_v34, 2 }
 0x740   :  { %v1357_v36 = vmul.f32 -1.442695, %v620_v35 }
 0x759   :  { %v643_v29 = vpop.permute.xlu0 %642 }
 0x75a   :  { %v645_v30 = vadd.f32 %v643_v29, %v639_v28 }
 0x75c   :  { %1562 = vtanh.f32 %v645_v30  ;;  %v659_v31 = vrot.slane %v645_v30, %v1739_v33 }
 0x75d   :  { %1564 = vpow2.f32 %v1357_v36 }
 0x75e   :  { %660 = vrot.lane.b32.xlu1 %v659_v31, %s1617_s13 }
 0x766   :  { %v1563_v32 = vpop.eup %1562 }
 0x767   :  { %648 = vrot.lane.b32.xlu0 %v1563_v32, %s1617_s13  ;;  %v1565_v38 = vpop.eup %1564 }
 0x768   :  { %v625_v39 = vadd.f32 1.0, %v1565_v38 }
 0x76a   :  { %1566 = vrcp.f32 %v625_v39 }
 0x774   :  { %v1567_v42 = vpop.eup %1566 }
 0x7d0   :  { %v661_v40 = vpop.permute.xlu1 %660 }
 0x7d1   :  { %663 = vst.msk [vmem:[#allocation3] sm:$0x3] %vm13_vm0, %v661_v40 }
 0x7d8   :  { %v1365_v41 = vld.sshfl [vmem:[#allocation3] sm:$0x3 pattern:$0x76325410] }
 0x7d9   :  { %v649_v43 = vpop.permute.xlu0 %648  ;;  %798 = vrot.lane.b32.xlu0 %v1365_v41, %s1617_s13 }
 0x7da   :  { %v1842_v44 = vmul.f32 %v1567_v42, %v649_v43 }
 0x7dc   :  { %664 = vst.msk [vmem:[#allocation2] sm:$0x3] %vm13_vm0, %v1842_v44 }
 0x7dd   :  { %1359 = vst.msk [vmem:[%s1998_s2 + $0x6] sm:$0x3] %vm179_vm2, %v1842_v44 }
 0x7e3   :  { %v680_v45 = vld [vmem:[#allocation2] sm:$0x3] }
 0x7e4   :  { %1362 = vmatmul.mubr.msk.f32.vlgmr.msra.gmra.mrb[4].mxu0 %vm35_vm1, %v680_v45 }
 0x7e5   :  { %1487 = vmatpush1.bf16.msra.mxu0 %v1666_v8  ;;  %1075 = vmatprep.mubr.f32.mxu0 %v1616_v3 }
 0x7e6   :  { %1489 = vmatprep.subr.bf16.mxu0 %v1668_v9 }
 0x7e9   :  { %1491 = vmatpush1.bf16.msra.mxu0 %v1685_v14 }
 0x7ea   :  { %1493 = vmatprep.subr.bf16.mxu0 %v1689_v15 }
 0x7ed   :  { %1495 = vmatpush1.bf16.msra.mxu0 %v1705_v21 }
 0x7ee   :  { %1497 = vmatprep.subr.bf16.mxu0 %v1709_v22 }
 0x7f1   :  { %1499 = vmatpush1.bf16.msra.mxu0 %v1720_v25 }
 0x84b   :  { %v799_v59 = vpop.permute.xlu0 %798 }
 0x8b7   :  { %v753_v46 = vpop.f32.mrb[4].mxu0 }
 0x8b8   :  { %v755_v47 = vpop.f32.mrb[5].mxu0 }
 0x8b9   :  { %v760_v48 = vcombine.low %v753_v46, %v755_v47 }
 0x8bb   :  { %v767_v50 = vrot.slane %v760_v48, %v1739_v33 }
 0x8bd   :  { %v769_v51 = vadd.f32 %v1361_v49, %v767_v50  ;;  %v1375_v50 = vld [vmem:[%s1997_s0 + $0x18] sm:$0xf] }
 0x8bf   :  { %v1363_v52 = vmul.f32 -1.442695, %v769_v51  ;;  %780 = vrot.lane.b32.xlu0 %v769_v51, %s1617_s13  ;;  %v777_v53 = vrot.slane %v769_v51, 2 }
 0x8c1   :  { %1568 = vpow2.f32 %v1363_v52 }
 0x8c2   :  { %1570 = vtanh.f32 %v777_v53 }
 0x8cb   :  { %v1569_v54 = vpop.eup %1568 }
 0x8cc   :  { %v773_v55 = vadd.f32 1.0, %v1569_v54  ;;  %v1571_v56 = vpop.eup %1570 }
 0x8ce   :  { %1572 = vrcp.f32 %v773_v55 }
 0x8d8   :  { %v1573_v57 = vpop.eup %1572 }
 0x8d9   :  { %v802_v58 = vmul.f32 %v1573_v57, %v1571_v56  ;;  %v801_v60 = vmul.f32 %v1573_v57, %v799_v59 }
 0x8db   :  { %804 = vrot.lane.b32.xlu1 %v802_v58, %s1617_s13 }
 0x931   :  { %v781_v2 = vpop.permute.xlu0 %780 }
 0x932   :  { %v782_v5 = vrot.slane %v781_v2, 2 }
 0x934   :  { %v1364_v7 = vmul.f32 -1.442695, %v782_v5 }
 0x94d   :  { %v805_v62 = vpop.permute.xlu1 %804 }
 0x94e   :  { %v807_v63 = vadd.f32 %v805_v62, %v801_v60 }
 0x950   :  { %1574 = vtanh.f32 %v807_v63  ;;  %v821_v0 = vrot.slane %v807_v63, %v1739_v33 }
 0x951   :  { %1576 = vpow2.f32 %v1364_v7 }
 0x952   :  { %822 = vrot.lane.b32.xlu0 %v821_v0, %s1617_s13 }
 0x95a   :  { %v1575_v1 = vpop.eup %1574 }
 0x95b   :  { %810 = vrot.lane.b32.xlu1 %v1575_v1, %s1617_s13  ;;  %v1577_v10 = vpop.eup %1576 }
 0x95c   :  { %v787_v11 = vadd.f32 1.0, %v1577_v10 }
 0x95e   :  { %1578 = vrcp.f32 %v787_v11 }
 0x968   :  { %v1579_v16 = vpop.eup %1578 }
 0x9c4   :  { %v823_v12 = vpop.permute.xlu0 %822 }
 0x9c5   :  { %825 = vst.msk [vmem:[#allocation3] sm:$0x3] %vm13_vm0, %v823_v12 }
 0x9cc   :  { %v1372_v13 = vld.sshfl [vmem:[#allocation3] sm:$0x3 pattern:$0x76325410] }
 0x9cd   :  { %960 = vrot.lane.b32.xlu1 %v1372_v13, %s1617_s13  ;;  %v811_v17 = vpop.permute.xlu1 %810 }
 0x9ce   :  { %v1871_v18 = vmul.f32 %v1579_v16, %v811_v17 }
 0x9d0   :  { %826 = vst.msk [vmem:[#allocation2] sm:$0x3] %vm13_vm0, %v1871_v18 }
 0x9d1   :  { %1366 = vst.msk [vmem:[%s1998_s2 + $0x8] sm:$0x3] %vm179_vm2, %v1871_v18 }
 0x9d7   :  { %v842_v19 = vld [vmem:[#allocation2] sm:$0x3] }
 0x9d8   :  { %1369 = vmatmul.mubr.msk.f32.vlgmr.msra.gmra.mrb[4].mxu1 %vm35_vm1, %v842_v19 }
 0x9d9   :  { %1503 = vmatpush1.bf16.msra.mxu1 %v1666_v8  ;;  %1237 = vmatprep.mubr.f32.mxu1 %v1616_v3  ;;  %v1368_v8 = vld [vmem:[%s1997_s0 + $0x14] sm:$0xf] }
 0x9da   :  { %1505 = vmatprep.subr.bf16.mxu1 %v1668_v9 }
 0x9dd   :  { %1507 = vmatpush1.bf16.msra.mxu1 %v1685_v14 }
 0x9de   :  { %1509 = vmatprep.subr.bf16.mxu1 %v1689_v15 }
 0x9e1   :  { %1511 = vmatpush1.bf16.msra.mxu1 %v1705_v21 }
 0x9e2   :  { %1513 = vmatprep.subr.bf16.mxu1 %v1709_v22 }
 0x9e5   :  { %1515 = vmatpush1.bf16.msra.mxu1 %v1720_v25 }
 0xa3f   :  { %v961_v27 = vpop.permute.xlu1 %960 }
 0xaab   :  { %v915_v20 = vpop.f32.mrb[4].mxu1 }
 0xaac   :  { %v917_v23 = vpop.f32.mrb[5].mxu1 }
 0xaad   :  { %v922_v4 = vcombine.low %v915_v20, %v917_v23 }
 0xaaf   :  { %v929_v3 = vrot.slane %v922_v4, %v1739_v33 }
 0xab1   :  { %v931_v9 = vadd.f32 %v1368_v8, %v929_v3 }
 0xab3   :  { %942 = vrot.lane.b32.xlu1 %v931_v9, %s1617_s13  ;;  %v1370_v14 = vmul.f32 -1.442695, %v931_v9  ;;  %v939_v15 = vrot.slane %v931_v9, 2  ;;  %v1382_v9 = vld [vmem:[%s1997_s0 + $0x1c] sm:$0xf] }
 0xab5   :  { %1580 = vpow2.f32 %v1370_v14 }
 0xab6   :  { %1582 = vtanh.f32 %v939_v15 }
 0xabf   :  { %v1581_v21 = vpop.eup %1580 }
 0xac0   :  { %v935_v24 = vadd.f32 1.0, %v1581_v21  ;;  %v1583_v22 = vpop.eup %1582 }
 0xac2   :  { %1584 = vrcp.f32 %v935_v24  ;;  %v188_v24 = vrot.slane %v1752_v61, %v1739_v33 }
 0xacc   :  { %v1585_v25 = vpop.eup %1584 }
 0xacd   :  { %v964_v26 = vmul.f32 %v1585_v25, %v1583_v22  ;;  %v963_v28 = vmul.f32 %v1585_v25, %v961_v27  ;;  %v512_v22 = vrot.slane %v1812_v6, %v1739_v33 }
 0xacf   :  { %966 = vrot.lane.b32.xlu0 %v964_v26, %s1617_s13  ;;  %v836_v26 = vrot.slane %v1871_v18, %v1739_v33 }
 0xb25   :  { %v943_v34 = vpop.permute.xlu1 %942 }
 0xb26   :  { %v944_v35 = vrot.slane %v943_v34, 2 }
 0xb28   :  { %v1371_v36 = vmul.f32 -1.442695, %v944_v35 }
 0xb41   :  { %v967_v29 = vpop.permute.xlu0 %966 }
 0xb42   :  { %v969_v30 = vadd.f32 %v967_v29, %v963_v28 }
 0xb44   :  { %1586 = vtanh.f32 %v969_v30  ;;  %v983_v31 = vrot.slane %v969_v30, %v1739_v33 }
 0xb45   :  { %1588 = vpow2.f32 %v1371_v36 }
 0xb46   :  { %984 = vrot.lane.b32.xlu1 %v983_v31, %s1617_s13 }
 0xb4e   :  { %v1587_v32 = vpop.eup %1586 }
 0xb4f   :  { %972 = vrot.lane.b32.xlu0 %v1587_v32, %s1617_s13  ;;  %v1589_v38 = vpop.eup %1588 }
 0xb50   :  { %v949_v39 = vadd.f32 1.0, %v1589_v38 }
 0xb52   :  { %1590 = vrcp.f32 %v949_v39 }
 0xb5c   :  { %v1591_v42 = vpop.eup %1590 }
 0xbb8   :  { %v985_v40 = vpop.permute.xlu1 %984 }
 0xbb9   :  { %987 = vst.msk [vmem:[#allocation3] sm:$0x3] %vm13_vm0, %v985_v40 }
 0xbc0   :  { %v1379_v41 = vld.sshfl [vmem:[#allocation3] sm:$0x3 pattern:$0x76325410] }
 0xbc1   :  { %v973_v43 = vpop.permute.xlu0 %972  ;;  %1122 = vrot.lane.b32.xlu0 %v1379_v41, %s1617_s13 }
 0xbc2   :  { %v1900_v45 = vmul.f32 %v1591_v42, %v973_v43  ;;  %v350_v42 = vrot.slane %v1782_v37, %v1739_v33  ;;  %v674_v43 = vrot.slane %v1842_v44, %v1739_v33 }
 0xbc4   :  { %1373 = vst.msk [vmem:[%s1998_s2 + $0xa] sm:$0x3] %vm179_vm2, %v1900_v45 }
 0xbc5   :  { %988 = vst.msk [vmem:[#allocation2] sm:$0x3] %vm13_vm0, %v1900_v45 }
 0xbcc   :  { %v1004_v46 = vld [vmem:[#allocation2] sm:$0x3] }
 0xbcd   :  { %1376 = vmatmul.mubr.msk.f32.vlgmr.msra.gmra.mrb[6].mxu0 %vm35_vm1, %v1004_v46  ;;  %v998_v46 = vrot.slane %v1900_v45, %v1739_v33 }
 0xc33   :  { %v1123_v60 = vpop.permute.xlu0 %1122 }
 0xca0   :  { %v1077_v47 = vpop.f32.mrb[6].mxu0 }
 0xca1   :  { %v1079_v48 = vpop.f32.mrb[7].mxu0 }
 0xca2   :  { %v1084_v49 = vcombine.low %v1077_v47, %v1079_v48 }
 0xca4   :  { %v1091_v51 = vrot.slane %v1084_v49, %v1739_v33 }
 0xca6   :  { %v1093_v52 = vadd.f32 %v1375_v50, %v1091_v51 }
 0xca8   :  { %v1377_v53 = vmul.f32 -1.442695, %v1093_v52  ;;  %1104 = vrot.lane.b32.xlu0 %v1093_v52, %s1617_s13  ;;  %v1101_v54 = vrot.slane %v1093_v52, 2 }
 0xcaa   :  { %1592 = vpow2.f32 %v1377_v53 }
 0xcab   :  { %1594 = vtanh.f32 %v1101_v54 }
 0xcb4   :  { %v1593_v55 = vpop.eup %1592 }
 0xcb5   :  { %v1097_v56 = vadd.f32 1.0, %v1593_v55  ;;  %v1595_v57 = vpop.eup %1594 }
 0xcb7   :  { %1596 = vrcp.f32 %v1097_v56 }
 0xcc1   :  { %v1597_v58 = vpop.eup %1596 }
 0xcc2   :  { %v1126_v59 = vmul.f32 %v1597_v58, %v1595_v57  ;;  %v1125_v62 = vmul.f32 %v1597_v58, %v1123_v60 }
 0xcc4   :  { %1128 = vrot.lane.b32.xlu1 %v1126_v59, %s1617_s13 }
 0xd1a   :  { %v1105_v5 = vpop.permute.xlu0 %1104 }
 0xd1b   :  { %v1106_v7 = vrot.slane %v1105_v5, 2 }
 0xd1d   :  { %v1378_v10 = vmul.f32 -1.442695, %v1106_v7 }
 0xd36   :  { %v1129_v63 = vpop.permute.xlu1 %1128 }
 0xd37   :  { %v1131_v0 = vadd.f32 %v1129_v63, %v1125_v62 }
 0xd39   :  { %1598 = vtanh.f32 %v1131_v0  ;;  %v1145_v1 = vrot.slane %v1131_v0, %v1739_v33 }
 0xd3a   :  { %1600 = vpow2.f32 %v1378_v10 }
 0xd3b   :  { %1146 = vrot.lane.b32.xlu0 %v1145_v1, %s1617_s13 }
 0xd43   :  { %v1599_v2 = vpop.eup %1598 }
 0xd44   :  { %1134 = vrot.lane.b32.xlu1 %v1599_v2, %s1617_s13  ;;  %v1601_v11 = vpop.eup %1600 }
 0xd45   :  { %v1111_v12 = vadd.f32 1.0, %v1601_v11 }
 0xd47   :  { %1602 = vrcp.f32 %v1111_v12 }
 0xd51   :  { %v1603_v17 = vpop.eup %1602 }
 0xdad   :  { %v1147_v13 = vpop.permute.xlu0 %1146 }
 0xdae   :  { %1149 = vst.msk [vmem:[#allocation3] sm:$0x3] %vm13_vm0, %v1147_v13 }
 0xdb5   :  { %v1386_v16 = vld.sshfl [vmem:[#allocation3] sm:$0x3 pattern:$0x76325410] }
 0xdb6   :  { %1284 = vrot.lane.b32.xlu1 %v1386_v16, %s1617_s13  ;;  %v1135_v19 = vpop.permute.xlu1 %1134 }
 0xdb7   :  { %v1137_v20 = vmul.f32 %v1603_v17, %v1135_v19 }
 0xdb9   :  { %1380 = vst.msk [vmem:[%s1998_s2 + $0xc] sm:$0x3] %vm179_vm2, %v1137_v20  ;;  %v1160_v29 = vrot.slane %v1137_v20, %v1739_v33 }
 0xdba   :  { %1150 = vst.msk [vmem:[#allocation2] sm:$0x3] %vm13_vm0, %v1137_v20 }
 0xdc1   :  { %v1166_v23 = vld [vmem:[#allocation2] sm:$0x3] }
 0xdc2   :  { %1383 = vmatmul.mubr.msk.f32.vlgmr.msra.gmra.mrb[6].mxu1 %vm35_vm1, %v1166_v23 }
 0xe28   :  { %v1285_v6 = vpop.permute.xlu1 %1284 }
 0xe95   :  { %v1239_v4 = vpop.f32.mrb[6].mxu1 }
 0xe96   :  { %v1241_v8 = vpop.f32.mrb[7].mxu1 }
 0xe97   :  { %v1246_v3 = vcombine.low %v1239_v4, %v1241_v8 }
 0xe99   :  { %v1253_v14 = vrot.slane %v1246_v3, %v1739_v33 }
 0xe9b   :  { %v1255_v15 = vadd.f32 %v1382_v9, %v1253_v14 }
 0xe9d   :  { %1266 = vrot.lane.b32.xlu1 %v1255_v15, %s1617_s13  ;;  %v1384_v21 = vmul.f32 -1.442695, %v1255_v15  ;;  %v1263_v25 = vrot.slane %v1255_v15, 2 }
 0xe9f   :  { %1604 = vpow2.f32 %v1384_v21 }
 0xea0   :  { %1606 = vtanh.f32 %v1263_v25 }
 0xea1   :  { %189 = vrot.lane.b32.xlu1 %v188_v24, %s1619_s20 }
 0xea5   :  { %513 = vrot.lane.b32.xlu1 %v512_v22, %s1619_s20 }
 0xea9   :  { %v1605_v27 = vpop.eup %1604  ;;  %837 = vrot.lane.b32.xlu1 %v836_v26, %s1619_s20 }
 0xeaa   :  { %v1259_v28 = vadd.f32 1.0, %v1605_v27  ;;  %v1607_v61 = vpop.eup %1606 }
 0xeac   :  { %1608 = vrcp.f32 %v1259_v28 }
 0xead   :  { %1161 = vrot.lane.b32.xlu1 %v1160_v29, %s1619_s20 }
 0xeb6   :  { %v1609_v30 = vpop.eup %1608 }
 0xeb7   :  { %v1288_v31 = vmul.f32 %v1609_v30, %v1607_v61  ;;  %v1287_v38 = vmul.f32 %v1609_v30, %v1285_v6 }
 0xeb9   :  { %1290 = vrot.lane.b32.xlu0 %v1288_v31, %s1617_s13 }
 0xf0f   :  { %v1267_v32 = vpop.permute.xlu1 %1266 }
 0xf10   :  { %v1268_v48 = vrot.slane %v1267_v32, 2 }
 0xf12   :  { %v1385_v49 = vmul.f32 -1.442695, %v1268_v48 }
 0xf13   :  { %v190_v34 = vpop.permute.xlu1 %189 }
 0xf14   :  { %1339 = vst.msk [vmem:[%s1999_s3 + $0xe] sm:$0x3] %vm179_vm2, %v190_v34 }
 0xf17   :  { %v514_v18 = vpop.permute.xlu1 %513 }
 0xf18   :  { %1353 = vst.msk [vmem:[%s1999_s3 + $0xa] sm:$0x3] %vm179_vm2, %v514_v18 }
 0xf1b   :  { %v838_v35 = vpop.permute.xlu1 %837 }
 0xf1c   :  { %1367 = vst.msk [vmem:[%s1999_s3 + $0x6] sm:$0x3] %vm179_vm2, %v838_v35 }
 0xf1f   :  { %v1162_v36 = vpop.permute.xlu1 %1161 }
 0xf20   :  { %1381 = vst.msk [vmem:[%s1999_s3 + $0x2] sm:$0x3] %vm179_vm2, %v1162_v36 }
 0xf2b   :  { %v1291_v39 = vpop.permute.xlu0 %1290 }
 0xf2c   :  { %v1293_v40 = vadd.f32 %v1291_v39, %v1287_v38 }
 0xf2e   :  { %1610 = vtanh.f32 %v1293_v40  ;;  %v1307_v47 = vrot.slane %v1293_v40, %v1739_v33 }
 0xf2f   :  { %1612 = vpow2.f32 %v1385_v49 }
 0xf38   :  { %v1611_v41 = vpop.eup %1610 }
 0xf39   :  { %1296 = vrot.lane.b32.xlu0 %v1611_v41, %s1617_s13  ;;  %v1613_v37 = vpop.eup %1612 }
 0xf3a   :  { %v1273_v50 = vadd.f32 1.0, %v1613_v37 }
 0xf3c   :  { %1614 = vrcp.f32 %v1273_v50 }
 0xf3d   :  { %351 = vrot.lane.b32.xlu0 %v350_v42, %s1619_s20 }
 0xf41   :  { %675 = vrot.lane.b32.xlu0 %v674_v43, %s1619_s20 }
 0xf45   :  { %999 = vrot.lane.b32.xlu0 %v998_v46, %s1619_s20 }
 0xf46   :  { %v1615_v51 = vpop.eup %1614 }
 0xf49   :  { %1308 = vrot.lane.b32.xlu0 %v1307_v47, %s1617_s13 }
 0xfab   :  { %v1297_v52 = vpop.permute.xlu0 %1296 }
 0xfac   :  { %v1299_v44 = vmul.f32 %v1615_v51, %v1297_v52 }
 0xfae   :  { %1312 = vst.msk [vmem:[#allocation2] sm:$0x3] %vm13_vm0, %v1299_v44  ;;  %v1322_v45 = vrot.slane %v1299_v44, %v1739_v33 }
 0xfaf   :  { %1387 = vst.msk [vmem:[%s1998_s2 + $0xe] sm:$0x3] %vm179_vm2, %v1299_v44  ;;  %v352_v53 = vpop.permute.xlu0 %351 }
 0xfb0   :  { %1346 = vst.msk [vmem:[%s1999_s3 + $0xc] sm:$0x3] %vm179_vm2, %v352_v53  ;;  %1323 = vrot.lane.b32.xlu1 %v1322_v45, %s1619_s20 }
 0xfb3   :  { %v676_v54 = vpop.permute.xlu0 %675 }
 0xfb4   :  { %1360 = vst.msk [vmem:[%s1999_s3 + $0x8] sm:$0x3] %vm179_vm2, %v676_v54 }
 0xfb7   :  { %v1000_v55 = vpop.permute.xlu0 %999 }
 0xfb8   :  { %1374 = vst.msk [vmem:[%s1999_s3 + $0x4] sm:$0x3] %vm179_vm2, %v1000_v55 }
 0xfbb   :  { %v1309_v33 = vpop.permute.xlu0 %1308 }
 0xfbc   :  { %1311 = vst.msk [vmem:[#allocation3] sm:$0x3] %vm13_vm0, %v1309_v33 }
0x1022   :  { %v1324_v56 = vpop.permute.xlu1 %1323 }
0x1023   :  { %1326 = vst.msk [vmem:[%s1999_s3] sm:$0x3] %vm179_vm2, %v1324_v56 }

</bundles_post_ra>
